<compile_context>
chip_gen: v7x
topology: tpu7x:2x2x1
jax: 0.10.0
libtpu: 0.0.40
codegen_flags: <defaults>
</compile_context>

<pallas_src>
import functools

import jax
import jax.numpy as jnp
from jax.experimental import pallas as pl
from jax.experimental.pallas import tpu as pltpu

# TODO(synk): the reference repo uses a custom LayerNorm; PyTorch nn.LayerNorm
# default eps is 1e-5 (used here) -- adjust if the custom module differs.
_LN_EPS = 1e-5


def _round_up(x, m):
    return (x + m - 1) // m * m


def _vmem_limit_bytes():
    # Per-generation scoped-VMEM budget (~75% of physical, capped at 100 MiB).
    try:
        cap = int(pltpu.get_tpu_info().vmem_capacity_bytes)
        return min(cap * 3 // 4, 100 * 1024 * 1024)
    except Exception:
        return None  # fall back to the compiler default scoped limit


_VMEM_LIMIT = _vmem_limit_bytes()


def _compiler_params(semantics):
    return pltpu.CompilerParams(dimension_semantics=tuple(semantics),
                                vmem_limit_bytes=_VMEM_LIMIT)


def _pick_row_tile(m, max_tile=256):
    if m <= max_tile:
        return m
    for t in range(max_tile, 7, -8):
        if m % t == 0:
            return t
    return max_tile  # caller pads


def _pick_col_tile(n, max_tile=512):
    if n <= max_tile:
        return n
    for t in (512, 256, 128):
        if t <= max_tile and n % t == 0:
            return t
    return n


def _pick_seq_tile(s, max_tile):
    if s <= max_tile:
        return s
    for t in (512, 256, 128, 64):
        if t <= max_tile and s % t == 0:
            return t
    return s  # whole sequence (no tiling)


# ------------------------- in-kernel helpers (traced) ------------------------

def _layernorm(y, gamma, beta):
    mu = jnp.mean(y, axis=-1, keepdims=True)
    var = jnp.mean((y - mu) ** 2, axis=-1, keepdims=True)
    return (y - mu) * jax.lax.rsqrt(var + _LN_EPS) * gamma + beta


def _mha_accumulate(q_bf, xkv_get, bias_get, wkv_ref, bkv, wo_ref, *,
                    n_head, dhp, sk_len, tk):
    """Flash-style multi-head attention, accumulating context @ Wo per head.

    q_bf:  [tq, n_head*dhp] bf16 query projections (pre-scaled, bias added);
           head h occupies the 128-aligned column block [h*dhp, (h+1)*dhp).
    xkv_get(s0, lk): bf16 [lk, D] slice of the key/value source sequence.
    bias_get(s0, lk): f32 additive bias [tq, lk] or [1, lk] for keys [s0, s0+lk).
    Returns f32 [tq, d_model] = sum_h softmax(q_h k_h^T + bias) v_h @ Wo_h.
    """
    dp = n_head * dhp
    tq = q_bf.shape[0]
    n_kv = sk_len // tk

    m = [jnp.full((tq, 1), -1e30, jnp.float32) for _ in range(n_head)]
    l = [jnp.zeros((tq, 1), jnp.float32) for _ in range(n_head)]
    ctx = [jnp.zeros((tq, dhp), jnp.float32) for _ in range(n_head)]

    for t in range(n_kv):
        s0 = t * tk
        x_kv = xkv_get(s0, tk)                                   # [tk, D] bf16
        kv = jnp.dot(x_kv, wkv_ref[...],
                     preferred_element_type=jnp.float32) + bkv   # [tk, 2*dp] f32
        kv = kv.astype(jnp.bfloat16)
        bias = bias_get(s0, tk)                                  # computed once per tile
        for h in range(n_head):
            q_h = q_bf[:, h * dhp:(h + 1) * dhp]
            k_h = kv[:, h * dhp:(h + 1) * dhp]
            v_h = kv[:, dp + h * dhp:dp + (h + 1) * dhp]
            s = jax.lax.dot_general(q_h, k_h, (((1,), (1,)), ((), ())),
                                    preferred_element_type=jnp.float32)
            s = s + bias
            m_new = jnp.maximum(m[h], jnp.max(s, axis=-1, keepdims=True))
            alpha = jnp.exp(m[h] - m_new)
            p = jnp.exp(s - m_new)
            l[h] = alpha * l[h] + jnp.sum(p, axis=-1, keepdims=True)
            ctx[h] = alpha * ctx[h] + jnp.dot(p.astype(jnp.bfloat16), v_h,
                                              preferred_element_type=jnp.float32)
            m[h] = m_new

    d_model = wo_ref.shape[1]
    acc = jnp.zeros((tq, d_model), jnp.float32)
    for h in range(n_head):
        c = ctx[h] * pl.reciprocal(l[h], approx=True)
        acc = acc + jnp.dot(c.astype(jnp.bfloat16),
                            wo_ref[h * dhp:(h + 1) * dhp, :],
                            preferred_element_type=jnp.float32)
    return acc


# ------------------------------ Pallas kernels -------------------------------

def _self_attn_block_kernel(x_ref, wq_ref, bq_ref, wkv_ref, bkv_ref, wo_ref,
                            bo_ref, g_ref, bln_ref, o_ref,
                            *, n_head, dhp, tq, tk):
    # TODO(synk): only causal t_mask is supported (generated in-kernel); arbitrary
    # self-attention masks would need an extra additive-bias input.
    s_len = x_ref.shape[1]
    q_start = pl.multiple_of(pl.program_id(1) * tq, tq)
    x_q = x_ref[0, pl.ds(q_start, tq), :]                        # [tq, D] bf16
    q = jnp.dot(x_q, wq_ref[...],
                preferred_element_type=jnp.float32) + bq_ref[...]
    q_bf = q.astype(jnp.bfloat16)

    def xkv_get(s0, lk):                                         # [lk, D] bf16
        return x_ref[0, s0:s0 + lk, :]

    def bias_get(s0, lk):                                        # causal [tq, lk]
        rows = q_start + jax.lax.broadcasted_iota(jnp.int32, (tq, lk), 0)
        cols = s0 + jax.lax.broadcasted_iota(jnp.int32, (tq, lk), 1)
        return jnp.where(cols <= rows, 0.0, -1e9).astype(jnp.float32)

    ctx = _mha_accumulate(q_bf, xkv_get, bias_get, wkv_ref, bkv_ref[...],
                          wo_ref, n_head=n_head, dhp=dhp, sk_len=s_len, tk=tk)
    y = ctx + bo_ref[...] + x_q.astype(jnp.float32)              # out-proj bias + residual
    o_ref[0] = _layernorm(y, g_ref[...], bln_ref[...]).astype(o_ref.dtype)


def _cross_attn_block_kernel(xq_ref, enc_ref, bias_ref, wq_ref, bq_ref, wkv_ref,
                             bkv_ref, wo_ref, bo_ref, g_ref, bln_ref, o_ref,
                             *, n_head, dhp, tk):
    sk_len = enc_ref.shape[1]
    x_q = xq_ref[0]                                              # [tq, D] bf16
    q = jnp.dot(x_q, wq_ref[...],
                preferred_element_type=jnp.float32) + bq_ref[...]
    q_bf = q.astype(jnp.bfloat16)

    def xkv_get(s0, lk):                                         # [lk, D] bf16
        return enc_ref[0, s0:s0 + lk, :]

    def bias_get(s0, lk):                                        # key padding [1, lk]
        return bias_ref[0, :, s0:s0 + lk]

    ctx = _mha_accumulate(q_bf, xkv_get, bias_get, wkv_ref, bkv_ref[...],
                          wo_ref, n_head=n_head, dhp=dhp, sk_len=sk_len, tk=tk)
    y = ctx + bo_ref[...] + x_q.astype(jnp.float32)
    o_ref[0] = _layernorm(y, g_ref[...], bln_ref[...]).astype(o_ref.dtype)


def _ffn_block_kernel(x_ref, w1_ref, b1_ref, w2_ref, b2_ref, g_ref, bln_ref,
                      o_ref, acc_ref):
    j = pl.program_id(1)

    @pl.when(j == 0)
    def _():
        acc_ref[...] = jnp.zeros_like(acc_ref)

    x = x_ref[...]                                               # bf16 [tm, D]
    h = jnp.dot(x, w1_ref[...],
                preferred_element_type=jnp.float32) + b1_ref[...]
    h = jnp.maximum(h, 0.0)                                      # ReLU
    acc_ref[...] += jnp.dot(h.astype(jnp.bfloat16), w2_ref[...],
                            preferred_element_type=jnp.float32)

    @pl.when(j == pl.num_programs(1) - 1)
    def _():
        y = acc_ref[...] + b2_ref[...] + x.astype(jnp.float32)   # residual
        o_ref[...] = _layernorm(y, g_ref[...], bln_ref[...]).astype(o_ref.dtype)


def _linear_kernel(x_ref, w_ref, b_ref, o_ref):
    o_ref[...] = (jnp.dot(x_ref[...], w_ref[...],
                          preferred_element_type=jnp.float32)
                  + b_ref[...]).astype(o_ref.dtype)


# ------------------------------ kernel wrappers -------------------------------

# TODO(synk): on v7x (64 MiB VMEM) the constant-index weight blocks below should be
# single-buffered (pl.BlockSpec(..., pipeline_mode=pl.Buffered(1))) once available
# in the deployment JAX version; left at the default here for portability.

def self_attn_block(x, p, gamma, beta, n_head, dhp, tq_max=256, tk_max=512):
    """Fused self-attention + out-proj + residual + LayerNorm. x:[B,S,D] bf16."""
    B, S, D = x.shape
    dp = n_head * dhp
    tq = _pick_seq_tile(S, tq_max)
    tk = _pick_seq_tile(S, tk_max)
    kernel = functools.partial(_self_attn_block_kernel, n_head=n_head, dhp=dhp,
                               tq=tq, tk=tk)
    return pl.pallas_call(
        kernel,
        out_shape=jax.ShapeDtypeStruct((B, S, D), jnp.bfloat16),
        grid=(B, S // tq),
        in_specs=[
            pl.BlockSpec((1, S, D), lambda b, q: (b, 0, 0)),      # x (q, kv, residual)
            pl.BlockSpec((D, dp), lambda b, q: (0, 0)),           # W_q (head-packed)
            pl.BlockSpec((1, dp), lambda b, q: (0, 0)),
            pl.BlockSpec((D, 2 * dp), lambda b, q: (0, 0)),       # fused W_kv
            pl.BlockSpec((1, 2 * dp), lambda b, q: (0, 0)),
            pl.BlockSpec((dp, D), lambda b, q: (0, 0)),           # W_o (head-packed rows)
            pl.BlockSpec((1, D), lambda b, q: (0, 0)),
            pl.BlockSpec((1, D), lambda b, q: (0, 0)),            # LN gamma
            pl.BlockSpec((1, D), lambda b, q: (0, 0)),            # LN beta
        ],
        out_specs=pl.BlockSpec((1, tq, D), lambda b, q: (b, q, 0)),
        compiler_params=_compiler_params(("parallel", "parallel")),
    )(x, p['w_q'], p['b_q'], p['w_kv'], p['b_kv'], p['w_o'], p['b_o'],
      gamma, beta)


def cross_attn_block(xq, enc, kv_bias, p, gamma, beta, n_head, dhp,
                     tq_max=256, tk_max=512):
    """Fused cross-attention + out-proj + residual + LayerNorm."""
    B, Sq, D = xq.shape
    Sk = enc.shape[1]
    dp = n_head * dhp
    tq = _pick_seq_tile(Sq, tq_max)
    tk = _pick_seq_tile(Sk, tk_max)
    kernel = functools.partial(_cross_attn_block_kernel, n_head=n_head, dhp=dhp,
                               tk=tk)
    return pl.pallas_call(
        kernel,
        out_shape=jax.ShapeDtypeStruct((B, Sq, D), jnp.bfloat16),
        grid=(B, Sq // tq),
        in_specs=[
            pl.BlockSpec((1, tq, D), lambda b, q: (b, q, 0)),     # decoder query tile
            pl.BlockSpec((1, Sk, D), lambda b, q: (b, 0, 0)),     # encoder output
            pl.BlockSpec((1, 1, Sk), lambda b, q: (b, 0, 0)),     # additive key bias
            pl.BlockSpec((D, dp), lambda b, q: (0, 0)),
            pl.BlockSpec((1, dp), lambda b, q: (0, 0)),
            pl.BlockSpec((D, 2 * dp), lambda b, q: (0, 0)),
            pl.BlockSpec((1, 2 * dp), lambda b, q: (0, 0)),
            pl.BlockSpec((dp, D), lambda b, q: (0, 0)),
            pl.BlockSpec((1, D), lambda b, q: (0, 0)),
            pl.BlockSpec((1, D), lambda b, q: (0, 0)),
            pl.BlockSpec((1, D), lambda b, q: (0, 0)),
        ],
        out_specs=pl.BlockSpec((1, tq, D), lambda b, q: (b, q, 0)),
        compiler_params=_compiler_params(("parallel", "parallel")),
    )(xq, enc, kv_bias, p['w_q'], p['b_q'], p['w_kv'], p['b_kv'],
      p['w_o'], p['b_o'], gamma, beta)


def ffn_block(x2d, p, gamma, beta, tm_max=256, th_max=512):
    """Fused FFN + residual + LayerNorm, hidden dim tiled on a reduction axis."""
    M, D = x2d.shape
    H = p['w1'].shape[1]
    tm = _pick_row_tile(M, tm_max)
    th = _pick_col_tile(H, th_max)
    Mp = _round_up(M, tm)
    xp = x2d if Mp == M else jnp.pad(x2d, ((0, Mp - M), (0, 0)))
    out = pl.pallas_call(
        _ffn_block_kernel,
        out_shape=jax.ShapeDtypeStruct((Mp, D), jnp.bfloat16),
        grid=(Mp // tm, H // th),
        in_specs=[
            pl.BlockSpec((tm, D), lambda i, j: (i, 0)),
            pl.BlockSpec((D, th), lambda i, j: (0, j)),
            pl.BlockSpec((1, th), lambda i, j: (0, j)),
            pl.BlockSpec((th, D), lambda i, j: (j, 0)),
            pl.BlockSpec((1, D), lambda i, j: (0, 0)),
            pl.BlockSpec((1, D), lambda i, j: (0, 0)),
            pl.BlockSpec((1, D), lambda i, j: (0, 0)),
        ],
        out_specs=pl.BlockSpec((tm, D), lambda i, j: (i, 0)),
        scratch_shapes=[pltpu.VMEM((tm, D), jnp.float32)],
        compiler_params=_compiler_params(("parallel", "arbitrary")),
    )(xp, p['w1'], p['b1'], p['w2'], p['b2'], gamma, beta)
    return out if Mp == M else out[:M]


def linear_tiled(x, w, b, out_dtype=jnp.bfloat16, tm_max=256, tn_max=512):
    """(M,N)-tiled y = x @ w + b. w/b must be pre-padded to a 128-lane multiple."""
    M, K = x.shape
    N = w.shape[1]
    tm = _pick_row_tile(M, tm_max)
    tn = _pick_col_tile(N, tn_max)
    Mp = _round_up(M, tm)
    xp = x if Mp == M else jnp.pad(x, ((0, Mp - M), (0, 0)))
    out = pl.pallas_call(
        _linear_kernel,
        out_shape=jax.ShapeDtypeStruct((Mp, N), out_dtype),
        grid=(Mp // tm, N // tn),
        in_specs=[
            pl.BlockSpec((tm, K), lambda i, j: (i, 0)),
            pl.BlockSpec((K, tn), lambda i, j: (0, j)),
            pl.BlockSpec((1, tn), lambda i, j: (0, j)),
        ],
        out_specs=pl.BlockSpec((tm, tn), lambda i, j: (i, j)),
        compiler_params=_compiler_params(("parallel", "parallel")),
    )(xp, w, b)
    return out if Mp == M else out[:M]


# ------------------------------- model (glue) --------------------------------

def decoder_forward(params, dec_ids, enc, s_mask_pad, *, n_head, dhp, vocab):
    """dec_ids:[B,S] int, enc:[B,Sk,D] f32, s_mask_pad:[B,Sk] (1=attend, 0=mask)."""
    # TODO(synk): the original PyTorch forward calls `self.embedding(enc)` which
    # type-mismatches (nn.Embedding needs int ids, `enc` is the float encoder
    # output); we embed the decoder token ids (standard decoder semantics).
    B, S = dec_ids.shape
    tok = jnp.take(params['tok_emb'], dec_ids, axis=0)           # [B,S,D] bf16
    x = tok + params['pos_emb'][:S][None, :, :]                  # bf16 gather+add
    enc_bf = enc.astype(jnp.bfloat16)
    # Cross-attention key-padding bias, computed once for all layers.
    s_bias = ((s_mask_pad.astype(jnp.float32) - 1.0) * 1e9)[:, None, :]  # [B,1,Sk]

    for lp in params['layers']:
        x = self_attn_block(x, lp['attn1'], lp['ln1_g'], lp['ln1_b'], n_head, dhp)
        x = cross_attn_block(x, enc_bf, s_bias, lp['xattn'], lp['ln2_g'],
                             lp['ln2_b'], n_head, dhp)
        Bx, Sx, D = x.shape
        x = ffn_block(x.reshape(Bx * Sx, D), lp['ffn'], lp['ln3_g'],
                      lp['ln3_b']).reshape(Bx, Sx, D)

    D = x.shape[-1]
    logits = linear_tiled(x.reshape(B * S, D), params['fc_w'], params['fc_b'],
                          out_dtype=jnp.bfloat16)
    return logits[:, :vocab].reshape(B, S, vocab)


# ------------------------------ parameter init -------------------------------

def sinusoid_pe(max_len, d_model):
    pos = jnp.arange(max_len, dtype=jnp.float32)[:, None]
    i = jnp.arange(0, d_model, 2, dtype=jnp.float32)
    angle = pos / jnp.power(10000.0, i / d_model)
    pe = jnp.zeros((max_len, d_model), jnp.float32)
    pe = pe.at[:, 0::2].set(jnp.sin(angle))
    pe = pe.at[:, 1::2].set(jnp.cos(angle))
    return pe


def _pack_cols(w, n_head, dhp):
    """(D, n_head*d_head) -> (D, n_head*dhp), each head's cols left-aligned."""
    d_in, hd = w.shape
    d_head = hd // n_head
    w = w.reshape(d_in, n_head, d_head)
    w = jnp.pad(w, ((0, 0), (0, 0), (0, dhp - d_head)))
    return w.reshape(d_in, n_head * dhp)


def _pack_rows(w, n_head, dhp):
    """(n_head*d_head, D) -> (n_head*dhp, D), each head's rows left-aligned."""
    hd, d_out = w.shape
    d_head = hd // n_head
    w = w.reshape(n_head, d_head, d_out)
    w = jnp.pad(w, ((0, 0), (0, dhp - d_head), (0, 0)))
    return w.reshape(n_head * dhp, d_out)


def init_params(key, vocab, max_len, d_model, ffn_hidden, n_head, n_layer, dhp):
    keys = iter(jax.random.split(key, 256))

    def w(shape):
        return jax.random.normal(next(keys), shape, jnp.float32) * 0.02

    dp = n_head * dhp
    # 1/sqrt(d_head) attention scale folded into the Q projection.
    q_scale = 1.0 / float(d_model // n_head) ** 0.5

    def attn_params():
        wq, wk, wv, wo = (w((d_model, d_model)), w((d_model, d_model)),
                          w((d_model, d_model)), w((d_model, d_model)))
        return {
            'w_q': _pack_cols(wq * q_scale, n_head, dhp).astype(jnp.bfloat16),
            'b_q': jnp.zeros((1, dp), jnp.float32),
            'w_kv': jnp.concatenate(
                [_pack_cols(wk, n_head, dhp), _pack_cols(wv, n_head, dhp)],
                axis=1).astype(jnp.bfloat16),
            'b_kv': jnp.zeros((1, 2 * dp), jnp.float32),
            'w_o': _pack_rows(wo, n_head, dhp).astype(jnp.bfloat16),
            'b_o': jnp.zeros((1, d_model), jnp.float32),
        }

    layers = []
    for _ in range(n_layer):
        layers.append({
            'attn1': attn_params(),
            'xattn': attn_params(),
            'ln1_g': jnp.ones((1, d_model), jnp.float32),
            'ln1_b': jnp.zeros((1, d_model), jnp.float32),
            'ln2_g': jnp.ones((1, d_model), jnp.float32),
            'ln2_b': jnp.zeros((1, d_model), jnp.float32),
            'ln3_g': jnp.ones((1, d_model), jnp.float32),
            'ln3_b': jnp.zeros((1, d_model), jnp.float32),
            'ffn': {
                'w1': w((d_model, ffn_hidden)).astype(jnp.bfloat16),
                'b1': jnp.zeros((1, ffn_hidden), jnp.float32),
                'w2': w((ffn_hidden, d_model)).astype(jnp.bfloat16),
                'b2': jnp.zeros((1, d_model), jnp.float32),
            },
        })

    # Final vocab projection, pre-padded to a 128-lane multiple at init
    # (outside jit -> no per-forward jnp.pad of the big weight).
    vocab_pad = _round_up(vocab, 128)
    fc_w = jnp.pad(w((d_model, vocab)),
                   ((0, 0), (0, vocab_pad - vocab))).astype(jnp.bfloat16)
    fc_b = jnp.zeros((1, vocab_pad), jnp.float32)

    return {
        'tok_emb': w((vocab, d_model)).astype(jnp.bfloat16),
        'pos_emb': sinusoid_pe(max_len, d_model).astype(jnp.bfloat16),
        'fc_w': fc_w,
        'fc_b': fc_b,
        'layers': layers,
    }


# ----------------------------------- main ------------------------------------

if __name__ == "__main__":
    B, S, D_MODEL, N_HEAD = 2, 8, 32, 4
    FFN_HIDDEN, N_LAYER, VOCAB, MAX_LEN = 64, 2, 50, 16
    DHP = _round_up(D_MODEL // N_HEAD, 128)   # per-head width padded to 128 lanes

    key = jax.random.PRNGKey(0)
    kp, kd, ke = jax.random.split(key, 3)
    params = init_params(kp, VOCAB, MAX_LEN, D_MODEL, FFN_HIDDEN, N_HEAD,
                         N_LAYER, DHP)

    dec_ids = jax.random.randint(kd, (B, S), 0, VOCAB)             # decoder ids
    enc = jax.random.normal(ke, (B, S, D_MODEL), jnp.float32)      # encoder output
    s_mask_pad = jnp.ones((B, S), jnp.float32)                     # 1 = attend
    # (the causal t_mask is generated inside the self-attention kernel)

    fwd = jax.jit(functools.partial(decoder_forward, n_head=N_HEAD, dhp=DHP,
                                    vocab=VOCAB))
    out = fwd(params, dec_ids, enc, s_mask_pad)
    jax.block_until_ready(out)
    assert out.shape == (B, S, VOCAB)
    assert bool(jnp.all(jnp.isfinite(out.astype(jnp.float32))))
    print("KERNEL_OK")
</pallas_src>

<mosaic_0001>
module attributes {stable_mosaic.version = 11 : i64} {
  func.func @_self_attn_block_kernel(%arg0: i32, %arg1: i32, %arg2: memref<1x8x32xbf16, #tpu.memory_space<vmem>>, %arg3: memref<32x512xbf16, #tpu.memory_space<vmem>>, %arg4: memref<1x512xf32, #tpu.memory_space<vmem>>, %arg5: memref<32x1024xbf16, #tpu.memory_space<vmem>>, %arg6: memref<1x1024xf32, #tpu.memory_space<vmem>>, %arg7: memref<512x32xbf16, #tpu.memory_space<vmem>>, %arg8: memref<1x32xf32, #tpu.memory_space<vmem>>, %arg9: memref<1x32xf32, #tpu.memory_space<vmem>>, %arg10: memref<1x32xf32, #tpu.memory_space<vmem>>, %arg11: memref<1x8x32xbf16, #tpu.memory_space<vmem>>) attributes {dimension_semantics = [#tpu.dimension_semantics<parallel>, #tpu.dimension_semantics<parallel>], iteration_bounds = array<i64: 2, 1>, scalar_prefetch = 0 : i64, scratch_operands = 0 : i64, tpu.core_type = #tpu.core_type<tc>, window_params = [{transform_indices = @transform_0, window_bounds = array<i64: 1, 8, 32>}, {pipeline_mode = #tpu.pipeline_mode<synchronous>, transform_indices = @transform_1, window_bounds = array<i64: 32, 512>}, {pipeline_mode = #tpu.pipeline_mode<synchronous>, transform_indices = @transform_2, window_bounds = array<i64: 1, 512>}, {pipeline_mode = #tpu.pipeline_mode<synchronous>, transform_indices = @transform_3, window_bounds = array<i64: 32, 1024>}, {pipeline_mode = #tpu.pipeline_mode<synchronous>, transform_indices = @transform_4, window_bounds = array<i64: 1, 1024>}, {pipeline_mode = #tpu.pipeline_mode<synchronous>, transform_indices = @transform_5, window_bounds = array<i64: 512, 32>}, {pipeline_mode = #tpu.pipeline_mode<synchronous>, transform_indices = @transform_6, window_bounds = array<i64: 1, 32>}, {pipeline_mode = #tpu.pipeline_mode<synchronous>, transform_indices = @transform_7, window_bounds = array<i64: 1, 32>}, {pipeline_mode = #tpu.pipeline_mode<synchronous>, transform_indices = @transform_8, window_bounds = array<i64: 1, 32>}, {transform_indices = @transform_9, window_bounds = array<i64: 1, 8, 32>}]} {
    %c8_i32 = arith.constant 8 : i32
    %0 = arith.muli %arg1, %c8_i32 : i32
    %1 = tpu.assume_multiple %0, 8 : i32
    %c0 = arith.constant 0 : index
    %2 = arith.index_cast %1 : i32 to index
    %c0_0 = arith.constant 0 : index
    %3 = vector.load %arg2[%c0, %2, %c0_0] : memref<1x8x32xbf16, #tpu.memory_space<vmem>>, vector<1x8x32xbf16>
    %4 = vector.shape_cast %3 : vector<1x8x32xbf16> to vector<8x32xbf16>
    %c0_1 = arith.constant 0 : index
    %c0_2 = arith.constant 0 : index
    %5 = vector.load %arg3[%c0_1, %c0_2] : memref<32x512xbf16, #tpu.memory_space<vmem>>, vector<32x512xbf16>
    %cst = arith.constant dense<0.000000e+00> : vector<8x512xf32>
    %6 = tpu.matmul %4, %5, %cst {dimension_numbers = #tpu.dot_dimension_numbers<[1], [0], [0], [1], [0, 0, 1, 1], [], []>} : vector<8x32xbf16>, vector<32x512xbf16>, vector<8x512xf32> -> vector<8x512xf32>
    %c0_3 = arith.constant 0 : index
    %c0_4 = arith.constant 0 : index
    %7 = vector.load %arg4[%c0_3, %c0_4] : memref<1x512xf32, #tpu.memory_space<vmem>>, vector<1x512xf32>
    %8 = vector.broadcast %7 : vector<1x512xf32> to vector<8x512xf32>
    %9 = arith.addf %6, %8 : vector<8x512xf32>
    %10 = arith.truncf %9 : vector<8x512xf32> to vector<8x512xbf16>
    %c0_5 = arith.constant 0 : index
    %c0_6 = arith.constant 0 : index
    %11 = vector.load %arg6[%c0_5, %c0_6] : memref<1x1024xf32, #tpu.memory_space<vmem>>, vector<1x1024xf32>
    %cst_7 = arith.constant -1.000000e+30 : f32
    %12 = vector.broadcast %cst_7 : f32 to vector<8x1xf32>
    %cst_8 = arith.constant -1.000000e+30 : f32
    %13 = vector.broadcast %cst_8 : f32 to vector<8x1xf32>
    %cst_9 = arith.constant -1.000000e+30 : f32
    %14 = vector.broadcast %cst_9 : f32 to vector<8x1xf32>
    %cst_10 = arith.constant -1.000000e+30 : f32
    %15 = vector.broadcast %cst_10 : f32 to vector<8x1xf32>
    %cst_11 = arith.constant 0.000000e+00 : f32
    %16 = vector.broadcast %cst_11 : f32 to vector<8x1xf32>
    %cst_12 = arith.constant 0.000000e+00 : f32
    %17 = vector.broadcast %cst_12 : f32 to vector<8x1xf32>
    %cst_13 = arith.constant 0.000000e+00 : f32
    %18 = vector.broadcast %cst_13 : f32 to vector<8x1xf32>
    %cst_14 = arith.constant 0.000000e+00 : f32
    %19 = vector.broadcast %cst_14 : f32 to vector<8x1xf32>
    %cst_15 = arith.constant 0.000000e+00 : f32
    %20 = vector.broadcast %cst_15 : f32 to vector<8x128xf32>
    %cst_16 = arith.constant 0.000000e+00 : f32
    %21 = vector.broadcast %cst_16 : f32 to vector<8x128xf32>
    %cst_17 = arith.constant 0.000000e+00 : f32
    %22 = vector.broadcast %cst_17 : f32 to vector<8x128xf32>
    %cst_18 = arith.constant 0.000000e+00 : f32
    %23 = vector.broadcast %cst_18 : f32 to vector<8x128xf32>
    %c0_19 = arith.constant 0 : index
    %c0_20 = arith.constant 0 : index
    %c0_21 = arith.constant 0 : index
    %24 = vector.load %arg2[%c0_19, %c0_20, %c0_21] : memref<1x8x32xbf16, #tpu.memory_space<vmem>>, vector<1x8x32xbf16>
    %25 = vector.shape_cast %24 : vector<1x8x32xbf16> to vector<8x32xbf16>
    %c0_22 = arith.constant 0 : index
    %c0_23 = arith.constant 0 : index
    %26 = vector.load %arg5[%c0_22, %c0_23] : memref<32x1024xbf16, #tpu.memory_space<vmem>>, vector<32x1024xbf16>
    %cst_24 = arith.constant dense<0.000000e+00> : vector<8x1024xf32>
    %27 = tpu.matmul %25, %26, %cst_24 {dimension_numbers = #tpu.dot_dimension_numbers<[1], [0], [0], [1], [0, 0, 1, 1], [], []>} : vector<8x32xbf16>, vector<32x1024xbf16>, vector<8x1024xf32> -> vector<8x1024xf32>
    %28 = vector.broadcast %11 : vector<1x1024xf32> to vector<8x1024xf32>
    %29 = arith.addf %27, %28 : vector<8x1024xf32>
    %30 = arith.truncf %29 : vector<8x1024xf32> to vector<8x1024xbf16>
    %31 = tpu.iota {dimensions = array<i32: 0>} : vector<8x8xi32>
    %32 = vector.broadcast %1 : i32 to vector<8x8xi32>
    %33 = arith.addi %32, %31 : vector<8x8xi32>
    %34 = tpu.iota {dimensions = array<i32: 1>} : vector<8x8xi32>
    %c0_i32 = arith.constant 0 : i32
    %35 = vector.broadcast %c0_i32 : i32 to vector<8x8xi32>
    %36 = arith.addi %35, %34 : vector<8x8xi32>
    %37 = arith.cmpi sle, %36, %33 : vector<8x8xi32>
    %cst_25 = arith.constant 0.000000e+00 : f32
    %cst_26 = arith.constant -1.000000e+09 : f32
    %38 = vector.broadcast %cst_25 : f32 to vector<8x8xf32>
    %39 = vector.broadcast %cst_26 : f32 to vector<8x8xf32>
    %40 = arith.select %37, %38, %39 : vector<8x8xi1>, vector<8x8xf32>
    %41 = vector.extract_strided_slice %10 {offsets = [0, 0], sizes = [8, 128], strides = [1, 1]} : vector<8x512xbf16> to vector<8x128xbf16>
    %42 = vector.extract_strided_slice %30 {offsets = [0, 0], sizes = [8, 128], strides = [1, 1]} : vector<8x1024xbf16> to vector<8x128xbf16>
    %43 = vector.extract_strided_slice %30 {offsets = [0, 512], sizes = [8, 128], strides = [1, 1]} : vector<8x1024xbf16> to vector<8x128xbf16>
    %cst_27 = arith.constant dense<0.000000e+00> : vector<8x8xf32>
    %44 = tpu.matmul %41, %42, %cst_27 {dimension_numbers = #tpu.dot_dimension_numbers<[1], [1], [0], [0], [0, 0, 1, 0], [], []>} : vector<8x128xbf16>, vector<8x128xbf16>, vector<8x8xf32> -> vector<8x8xf32>
    %45 = arith.addf %44, %40 : vector<8x8xf32>
    %cst_28 = arith.constant dense<0xFF800000> : vector<8xf32>
    %46 = vector.multi_reduction <maximumf>, %45, %cst_28 [1] : vector<8x8xf32> to vector<8xf32>
    %47 = vector.shape_cast %46 : vector<8xf32> to vector<8x1xf32>
    %48 = arith.maximumf %12, %47 : vector<8x1xf32>
    %49 = arith.subf %12, %48 : vector<8x1xf32>
    %50 = math.exp %49 : vector<8x1xf32>
    %51 = vector.broadcast %48 : vector<8x1xf32> to vector<8x8xf32>
    %52 = arith.subf %45, %51 : vector<8x8xf32>
    %53 = math.exp %52 : vector<8x8xf32>
    %54 = arith.mulf %50, %16 : vector<8x1xf32>
    %cst_29 = arith.constant dense<0.000000e+00> : vector<8xf32>
    %55 = vector.multi_reduction <add>, %53, %cst_29 [1] : vector<8x8xf32> to vector<8xf32>
    %56 = vector.shape_cast %55 : vector<8xf32> to vector<8x1xf32>
    %57 = arith.addf %54, %56 : vector<8x1xf32>
    %58 = vector.broadcast %50 : vector<8x1xf32> to vector<8x128xf32>
    %59 = arith.mulf %58, %20 : vector<8x128xf32>
    %60 = arith.truncf %53 : vector<8x8xf32> to vector<8x8xbf16>
    %cst_30 = arith.constant dense<0.000000e+00> : vector<8x128xf32>
    %61 = tpu.matmul %60, %43, %cst_30 {dimension_numbers = #tpu.dot_dimension_numbers<[1], [0], [0], [1], [0, 0, 1, 1], [], []>} : vector<8x8xbf16>, vector<8x128xbf16>, vector<8x128xf32> -> vector<8x128xf32>
    %62 = arith.addf %59, %61 : vector<8x128xf32>
    %63 = vector.extract_strided_slice %10 {offsets = [0, 128], sizes = [8, 128], strides = [1, 1]} : vector<8x512xbf16> to vector<8x128xbf16>
    %64 = vector.extract_strided_slice %30 {offsets = [0, 128], sizes = [8, 128], strides = [1, 1]} : vector<8x1024xbf16> to vector<8x128xbf16>
    %65 = vector.extract_strided_slice %30 {offsets = [0, 640], sizes = [8, 128], strides = [1, 1]} : vector<8x1024xbf16> to vector<8x128xbf16>
    %cst_31 = arith.constant dense<0.000000e+00> : vector<8x8xf32>
    %66 = tpu.matmul %63, %64, %cst_31 {dimension_numbers = #tpu.dot_dimension_numbers<[1], [1], [0], [0], [0, 0, 1, 0], [], []>} : vector<8x128xbf16>, vector<8x128xbf16>, vector<8x8xf32> -> vector<8x8xf32>
    %67 = arith.addf %66, %40 : vector<8x8xf32>
    %cst_32 = arith.constant dense<0xFF800000> : vector<8xf32>
    %68 = vector.multi_reduction <maximumf>, %67, %cst_32 [1] : vector<8x8xf32> to vector<8xf32>
    %69 = vector.shape_cast %68 : vector<8xf32> to vector<8x1xf32>
    %70 = arith.maximumf %13, %69 : vector<8x1xf32>
    %71 = arith.subf %13, %70 : vector<8x1xf32>
    %72 = math.exp %71 : vector<8x1xf32>
    %73 = vector.broadcast %70 : vector<8x1xf32> to vector<8x8xf32>
    %74 = arith.subf %67, %73 : vector<8x8xf32>
    %75 = math.exp %74 : vector<8x8xf32>
    %76 = arith.mulf %72, %17 : vector<8x1xf32>
    %cst_33 = arith.constant dense<0.000000e+00> : vector<8xf32>
    %77 = vector.multi_reduction <add>, %75, %cst_33 [1] : vector<8x8xf32> to vector<8xf32>
    %78 = vector.shape_cast %77 : vector<8xf32> to vector<8x1xf32>
    %79 = arith.addf %76, %78 : vector<8x1xf32>
    %80 = vector.broadcast %72 : vector<8x1xf32> to vector<8x128xf32>
    %81 = arith.mulf %80, %21 : vector<8x128xf32>
    %82 = arith.truncf %75 : vector<8x8xf32> to vector<8x8xbf16>
    %cst_34 = arith.constant dense<0.000000e+00> : vector<8x128xf32>
    %83 = tpu.matmul %82, %65, %cst_34 {dimension_numbers = #tpu.dot_dimension_numbers<[1], [0], [0], [1], [0, 0, 1, 1], [], []>} : vector<8x8xbf16>, vector<8x128xbf16>, vector<8x128xf32> -> vector<8x128xf32>
    %84 = arith.addf %81, %83 : vector<8x128xf32>
    %85 = vector.extract_strided_slice %10 {offsets = [0, 256], sizes = [8, 128], strides = [1, 1]} : vector<8x512xbf16> to vector<8x128xbf16>
    %86 = vector.extract_strided_slice %30 {offsets = [0, 256], sizes = [8, 128], strides = [1, 1]} : vector<8x1024xbf16> to vector<8x128xbf16>
    %87 = vector.extract_strided_slice %30 {offsets = [0, 768], sizes = [8, 128], strides = [1, 1]} : vector<8x1024xbf16> to vector<8x128xbf16>
    %cst_35 = arith.constant dense<0.000000e+00> : vector<8x8xf32>
    %88 = tpu.matmul %85, %86, %cst_35 {dimension_numbers = #tpu.dot_dimension_numbers<[1], [1], [0], [0], [0, 0, 1, 0], [], []>} : vector<8x128xbf16>, vector<8x128xbf16>, vector<8x8xf32> -> vector<8x8xf32>
    %89 = arith.addf %88, %40 : vector<8x8xf32>
    %cst_36 = arith.constant dense<0xFF800000> : vector<8xf32>
    %90 = vector.multi_reduction <maximumf>, %89, %cst_36 [1] : vector<8x8xf32> to vector<8xf32>
    %91 = vector.shape_cast %90 : vector<8xf32> to vector<8x1xf32>
    %92 = arith.maximumf %14, %91 : vector<8x1xf32>
    %93 = arith.subf %14, %92 : vector<8x1xf32>
    %94 = math.exp %93 : vector<8x1xf32>
    %95 = vector.broadcast %92 : vector<8x1xf32> to vector<8x8xf32>
    %96 = arith.subf %89, %95 : vector<8x8xf32>
    %97 = math.exp %96 : vector<8x8xf32>
    %98 = arith.mulf %94, %18 : vector<8x1xf32>
    %cst_37 = arith.constant dense<0.000000e+00> : vector<8xf32>
    %99 = vector.multi_reduction <add>, %97, %cst_37 [1] : vector<8x8xf32> to vector<8xf32>
    %100 = vector.shape_cast %99 : vector<8xf32> to vector<8x1xf32>
    %101 = arith.addf %98, %100 : vector<8x1xf32>
    %102 = vector.broadcast %94 : vector<8x1xf32> to vector<8x128xf32>
    %103 = arith.mulf %102, %22 : vector<8x128xf32>
    %104 = arith.truncf %97 : vector<8x8xf32> to vector<8x8xbf16>
    %cst_38 = arith.constant dense<0.000000e+00> : vector<8x128xf32>
    %105 = tpu.matmul %104, %87, %cst_38 {dimension_numbers = #tpu.dot_dimension_numbers<[1], [0], [0], [1], [0, 0, 1, 1], [], []>} : vector<8x8xbf16>, vector<8x128xbf16>, vector<8x128xf32> -> vector<8x128xf32>
    %106 = arith.addf %103, %105 : vector<8x128xf32>
    %107 = vector.extract_strided_slice %10 {offsets = [0, 384], sizes = [8, 128], strides = [1, 1]} : vector<8x512xbf16> to vector<8x128xbf16>
    %108 = vector.extract_strided_slice %30 {offsets = [0, 384], sizes = [8, 128], strides = [1, 1]} : vector<8x1024xbf16> to vector<8x128xbf16>
    %109 = vector.extract_strided_slice %30 {offsets = [0, 896], sizes = [8, 128], strides = [1, 1]} : vector<8x1024xbf16> to vector<8x128xbf16>
    %cst_39 = arith.constant dense<0.000000e+00> : vector<8x8xf32>
    %110 = tpu.matmul %107, %108, %cst_39 {dimension_numbers = #tpu.dot_dimension_numbers<[1], [1], [0], [0], [0, 0, 1, 0], [], []>} : vector<8x128xbf16>, vector<8x128xbf16>, vector<8x8xf32> -> vector<8x8xf32>
    %111 = arith.addf %110, %40 : vector<8x8xf32>
    %cst_40 = arith.constant dense<0xFF800000> : vector<8xf32>
    %112 = vector.multi_reduction <maximumf>, %111, %cst_40 [1] : vector<8x8xf32> to vector<8xf32>
    %113 = vector.shape_cast %112 : vector<8xf32> to vector<8x1xf32>
    %114 = arith.maximumf %15, %113 : vector<8x1xf32>
    %115 = arith.subf %15, %114 : vector<8x1xf32>
    %116 = math.exp %115 : vector<8x1xf32>
    %117 = vector.broadcast %114 : vector<8x1xf32> to vector<8x8xf32>
    %118 = arith.subf %111, %117 : vector<8x8xf32>
    %119 = math.exp %118 : vector<8x8xf32>
    %120 = arith.mulf %116, %19 : vector<8x1xf32>
    %cst_41 = arith.constant dense<0.000000e+00> : vector<8xf32>
    %121 = vector.multi_reduction <add>, %119, %cst_41 [1] : vector<8x8xf32> to vector<8xf32>
    %122 = vector.shape_cast %121 : vector<8xf32> to vector<8x1xf32>
    %123 = arith.addf %120, %122 : vector<8x1xf32>
    %124 = vector.broadcast %116 : vector<8x1xf32> to vector<8x128xf32>
    %125 = arith.mulf %124, %23 : vector<8x128xf32>
    %126 = arith.truncf %119 : vector<8x8xf32> to vector<8x8xbf16>
    %cst_42 = arith.constant dense<0.000000e+00> : vector<8x128xf32>
    %127 = tpu.matmul %126, %109, %cst_42 {dimension_numbers = #tpu.dot_dimension_numbers<[1], [0], [0], [1], [0, 0, 1, 1], [], []>} : vector<8x8xbf16>, vector<8x128xbf16>, vector<8x128xf32> -> vector<8x128xf32>
    %128 = arith.addf %125, %127 : vector<8x128xf32>
    %cst_43 = arith.constant 0.000000e+00 : f32
    %129 = vector.broadcast %cst_43 : f32 to vector<8x32xf32>
    %130 = tpu.reciprocal %57 {approx = true} : vector<8x1xf32> -> vector<8x1xf32>
    %131 = vector.broadcast %130 : vector<8x1xf32> to vector<8x128xf32>
    %132 = arith.mulf %62, %131 : vector<8x128xf32>
    %133 = arith.truncf %132 : vector<8x128xf32> to vector<8x128xbf16>
    %c0_44 = arith.constant 0 : index
    %c0_45 = arith.constant 0 : index
    %134 = vector.load %arg7[%c0_44, %c0_45] : memref<512x32xbf16, #tpu.memory_space<vmem>>, vector<128x32xbf16>
    %cst_46 = arith.constant dense<0.000000e+00> : vector<8x32xf32>
    %135 = tpu.matmul %133, %134, %cst_46 {dimension_numbers = #tpu.dot_dimension_numbers<[1], [0], [0], [1], [0, 0, 1, 1], [], []>} : vector<8x128xbf16>, vector<128x32xbf16>, vector<8x32xf32> -> vector<8x32xf32>
    %136 = arith.addf %129, %135 : vector<8x32xf32>
    %137 = tpu.reciprocal %79 {approx = true} : vector<8x1xf32> -> vector<8x1xf32>
    %138 = vector.broadcast %137 : vector<8x1xf32> to vector<8x128xf32>
    %139 = arith.mulf %84, %138 : vector<8x128xf32>
    %140 = arith.truncf %139 : vector<8x128xf32> to vector<8x128xbf16>
    %c128 = arith.constant 128 : index
    %c0_47 = arith.constant 0 : index
    %141 = vector.load %arg7[%c128, %c0_47] : memref<512x32xbf16, #tpu.memory_space<vmem>>, vector<128x32xbf16>
    %cst_48 = arith.constant dense<0.000000e+00> : vector<8x32xf32>
    %142 = tpu.matmul %140, %141, %cst_48 {dimension_numbers = #tpu.dot_dimension_numbers<[1], [0], [0], [1], [0, 0, 1, 1], [], []>} : vector<8x128xbf16>, vector<128x32xbf16>, vector<8x32xf32> -> vector<8x32xf32>
    %143 = arith.addf %136, %142 : vector<8x32xf32>
    %144 = tpu.reciprocal %101 {approx = true} : vector<8x1xf32> -> vector<8x1xf32>
    %145 = vector.broadcast %144 : vector<8x1xf32> to vector<8x128xf32>
    %146 = arith.mulf %106, %145 : vector<8x128xf32>
    %147 = arith.truncf %146 : vector<8x128xf32> to vector<8x128xbf16>
    %c256 = arith.constant 256 : index
    %c0_49 = arith.constant 0 : index
    %148 = vector.load %arg7[%c256, %c0_49] : memref<512x32xbf16, #tpu.memory_space<vmem>>, vector<128x32xbf16>
    %cst_50 = arith.constant dense<0.000000e+00> : vector<8x32xf32>
    %149 = tpu.matmul %147, %148, %cst_50 {dimension_numbers = #tpu.dot_dimension_numbers<[1], [0], [0], [1], [0, 0, 1, 1], [], []>} : vector<8x128xbf16>, vector<128x32xbf16>, vector<8x32xf32> -> vector<8x32xf32>
    %150 = arith.addf %143, %149 : vector<8x32xf32>
    %151 = tpu.reciprocal %123 {approx = true} : vector<8x1xf32> -> vector<8x1xf32>
    %152 = vector.broadcast %151 : vector<8x1xf32> to vector<8x128xf32>
    %153 = arith.mulf %128, %152 : vector<8x128xf32>
    %154 = arith.truncf %153 : vector<8x128xf32> to vector<8x128xbf16>
    %c384 = arith.constant 384 : index
    %c0_51 = arith.constant 0 : index
    %155 = vector.load %arg7[%c384, %c0_51] : memref<512x32xbf16, #tpu.memory_space<vmem>>, vector<128x32xbf16>
    %cst_52 = arith.constant dense<0.000000e+00> : vector<8x32xf32>
    %156 = tpu.matmul %154, %155, %cst_52 {dimension_numbers = #tpu.dot_dimension_numbers<[1], [0], [0], [1], [0, 0, 1, 1], [], []>} : vector<8x128xbf16>, vector<128x32xbf16>, vector<8x32xf32> -> vector<8x32xf32>
    %157 = arith.addf %150, %156 : vector<8x32xf32>
    %c0_53 = arith.constant 0 : index
    %c0_54 = arith.constant 0 : index
    %158 = vector.load %arg8[%c0_53, %c0_54] : memref<1x32xf32, #tpu.memory_space<vmem>>, vector<1x32xf32>
    %159 = vector.broadcast %158 : vector<1x32xf32> to vector<8x32xf32>
    %160 = arith.addf %157, %159 : vector<8x32xf32>
    %161 = arith.extf %4 : vector<8x32xbf16> to vector<8x32xf32>
    %162 = arith.addf %160, %161 : vector<8x32xf32>
    %c0_55 = arith.constant 0 : index
    %c0_56 = arith.constant 0 : index
    %163 = vector.load %arg9[%c0_55, %c0_56] : memref<1x32xf32, #tpu.memory_space<vmem>>, vector<1x32xf32>
    %c0_57 = arith.constant 0 : index
    %c0_58 = arith.constant 0 : index
    %164 = vector.load %arg10[%c0_57, %c0_58] : memref<1x32xf32, #tpu.memory_space<vmem>>, vector<1x32xf32>
    %cst_59 = arith.constant dense<0.000000e+00> : vector<8xf32>
    %165 = vector.multi_reduction <add>, %162, %cst_59 [1] : vector<8x32xf32> to vector<8xf32>
    %166 = vector.shape_cast %165 : vector<8xf32> to vector<8x1xf32>
    %cst_60 = arith.constant 3.200000e+01 : f32
    %167 = vector.broadcast %cst_60 : f32 to vector<8x1xf32>
    %168 = arith.divf %166, %167 : vector<8x1xf32>
    %169 = vector.broadcast %168 : vector<8x1xf32> to vector<8x32xf32>
    %170 = arith.subf %162, %169 : vector<8x32xf32>
    %171 = arith.mulf %170, %170 : vector<8x32xf32>
    %cst_61 = arith.constant dense<0.000000e+00> : vector<8xf32>
    %172 = vector.multi_reduction <add>, %171, %cst_61 [1] : vector<8x32xf32> to vector<8xf32>
    %173 = vector.shape_cast %172 : vector<8xf32> to vector<8x1xf32>
    %cst_62 = arith.constant 3.200000e+01 : f32
    %174 = vector.broadcast %cst_62 : f32 to vector<8x1xf32>
    %175 = arith.divf %173, %174 : vector<8x1xf32>
    %176 = vector.broadcast %168 : vector<8x1xf32> to vector<8x32xf32>
    %177 = arith.subf %162, %176 : vector<8x32xf32>
    %cst_63 = arith.constant 9.99999974E-6 : f32
    %178 = vector.broadcast %cst_63 : f32 to vector<8x1xf32>
    %179 = arith.addf %175, %178 : vector<8x1xf32>
    %180 = math.rsqrt %179 : vector<8x1xf32>
    %181 = vector.broadcast %180 : vector<8x1xf32> to vector<8x32xf32>
    %182 = arith.mulf %177, %181 : vector<8x32xf32>
    %183 = vector.broadcast %163 : vector<1x32xf32> to vector<8x32xf32>
    %184 = arith.mulf %182, %183 : vector<8x32xf32>
    %185 = vector.broadcast %164 : vector<1x32xf32> to vector<8x32xf32>
    %186 = arith.addf %184, %185 : vector<8x32xf32>
    %187 = arith.truncf %186 : vector<8x32xf32> to vector<8x32xbf16>
    %c0_64 = arith.constant 0 : index
    %c0_65 = arith.constant 0 : index
    %c0_66 = arith.constant 0 : index
    %188 = vector.load %arg11[%c0_64, %c0_65, %c0_66] : memref<1x8x32xbf16, #tpu.memory_space<vmem>>, vector<1x8x32xbf16>
    %189 = vector.shape_cast %188 : vector<1x8x32xbf16> to vector<8x32xbf16>
    %190 = vector.shape_cast %187 : vector<8x32xbf16> to vector<1x8x32xbf16>
    tpu.vector_store %arg11[%c0_64, %c0_65, %c0_66], %190 {strides = array<i32>} : memref<1x8x32xbf16, #tpu.memory_space<vmem>>, vector<1x8x32xbf16>,
    return
  }
  func.func @transform_0(%arg0: i32, %arg1: i32) -> (i32, i32, i32) {
    %c0_i32 = arith.constant 0 : i32
    %c0_i32_0 = arith.constant 0 : i32
    %c0_i32_1 = arith.constant 0 : i32
    return %arg0, %c0_i32, %c0_i32_0 : i32, i32, i32
  }
  func.func @transform_1(%arg0: i32, %arg1: i32) -> (i32, i32) {
    %c0_i32 = arith.constant 0 : i32
    %c0_i32_0 = arith.constant 0 : i32
    %c0_i32_1 = arith.constant 0 : i32
    return %c0_i32, %c0_i32_0 : i32, i32
  }
  func.func @transform_2(%arg0: i32, %arg1: i32) -> (i32, i32) {
    %c0_i32 = arith.constant 0 : i32
    %c0_i32_0 = arith.constant 0 : i32
    %c0_i32_1 = arith.constant 0 : i32
    return %c0_i32, %c0_i32_0 : i32, i32
  }
  func.func @transform_3(%arg0: i32, %arg1: i32) -> (i32, i32) {
    %c0_i32 = arith.constant 0 : i32
    %c0_i32_0 = arith.constant 0 : i32
    %c0_i32_1 = arith.constant 0 : i32
    return %c0_i32, %c0_i32_0 : i32, i32
  }
  func.func @transform_4(%arg0: i32, %arg1: i32) -> (i32, i32) {
    %c0_i32 = arith.constant 0 : i32
    %c0_i32_0 = arith.constant 0 : i32
    %c0_i32_1 = arith.constant 0 : i32
    return %c0_i32, %c0_i32_0 : i32, i32
  }
  func.func @transform_5(%arg0: i32, %arg1: i32) -> (i32, i32) {
    %c0_i32 = arith.constant 0 : i32
    %c0_i32_0 = arith.constant 0 : i32
    %c0_i32_1 = arith.constant 0 : i32
    return %c0_i32, %c0_i32_0 : i32, i32
  }
  func.func @transform_6(%arg0: i32, %arg1: i32) -> (i32, i32) {
    %c0_i32 = arith.constant 0 : i32
    %c0_i32_0 = arith.constant 0 : i32
    %c0_i32_1 = arith.constant 0 : i32
    return %c0_i32, %c0_i32_0 : i32, i32
  }
  func.func @transform_7(%arg0: i32, %arg1: i32) -> (i32, i32) {
    %c0_i32 = arith.constant 0 : i32
    %c0_i32_0 = arith.constant 0 : i32
    %c0_i32_1 = arith.constant 0 : i32
    return %c0_i32, %c0_i32_0 : i32, i32
  }
  func.func @transform_8(%arg0: i32, %arg1: i32) -> (i32, i32) {
    %c0_i32 = arith.constant 0 : i32
    %c0_i32_0 = arith.constant 0 : i32
    %c0_i32_1 = arith.constant 0 : i32
    return %c0_i32, %c0_i32_0 : i32, i32
  }
  func.func @transform_9(%arg0: i32, %arg1: i32) -> (i32, i32, i32) {
    %c0_i32 = arith.constant 0 : i32
    %c0_i32_0 = arith.constant 0 : i32
    return %arg0, %arg1, %c0_i32 : i32, i32, i32
  }
}

module attributes {stable_mosaic.version = 11 : i64} {
  func.func @_ffn_block_kernel(%arg0: i32, %arg1: i32, %arg2: memref<16x32xbf16, #tpu.memory_space<vmem>>, %arg3: memref<32x64xbf16, #tpu.memory_space<vmem>>, %arg4: memref<1x64xf32, #tpu.memory_space<vmem>>, %arg5: memref<64x32xbf16, #tpu.memory_space<vmem>>, %arg6: memref<1x32xf32, #tpu.memory_space<vmem>>, %arg7: memref<1x32xf32, #tpu.memory_space<vmem>>, %arg8: memref<1x32xf32, #tpu.memory_space<vmem>>, %arg9: memref<16x32xbf16, #tpu.memory_space<vmem>>, %arg10: memref<16x32xf32, #tpu.memory_space<vmem>>) attributes {dimension_semantics = [#tpu.dimension_semantics<parallel>, #tpu.dimension_semantics<arbitrary>], iteration_bounds = array<i64: 1, 1>, scalar_prefetch = 0 : i64, scratch_operands = 1 : i64, tpu.core_type = #tpu.core_type<tc>, window_params = [{transform_indices = @transform_0, window_bounds = array<i64: 16, 32>}, {transform_indices = @transform_1, window_bounds = array<i64: 32, 64>}, {transform_indices = @transform_2, window_bounds = array<i64: 1, 64>}, {transform_indices = @transform_3, window_bounds = array<i64: 64, 32>}, {pipeline_mode = #tpu.pipeline_mode<synchronous>, transform_indices = @transform_4, window_bounds = array<i64: 1, 32>}, {pipeline_mode = #tpu.pipeline_mode<synchronous>, transform_indices = @transform_5, window_bounds = array<i64: 1, 32>}, {pipeline_mode = #tpu.pipeline_mode<synchronous>, transform_indices = @transform_6, window_bounds = array<i64: 1, 32>}, {transform_indices = @transform_7, window_bounds = array<i64: 16, 32>}]} {
    %c0_i32 = arith.constant 0 : i32
    %0 = arith.cmpi eq, %arg1, %c0_i32 : i32
    %1 = arith.extui %0 : i1 to i32
    %c0_i32_0 = arith.constant 0 : i32
    %2 = arith.cmpi ne, %1, %c0_i32_0 : i32
    scf.if %2 {
      %cst_16 = arith.constant 0.000000e+00 : f32
      %20 = vector.broadcast %cst_16 : f32 to vector<16x32xf32>
      %c0_17 = arith.constant 0 : index
      %c0_18 = arith.constant 0 : index
      %21 = vector.load %arg10[%c0_17, %c0_18] : memref<16x32xf32, #tpu.memory_space<vmem>>, vector<16x32xf32>
      tpu.vector_store %arg10[%c0_17, %c0_18], %20 {strides = array<i32>} : memref<16x32xf32, #tpu.memory_space<vmem>>, vector<16x32xf32>,
    } else {
    }
    %c0 = arith.constant 0 : index
    %c0_1 = arith.constant 0 : index
    %3 = vector.load %arg2[%c0, %c0_1] : memref<16x32xbf16, #tpu.memory_space<vmem>>, vector<16x32xbf16>
    %c0_2 = arith.constant 0 : index
    %c0_3 = arith.constant 0 : index
    %4 = vector.load %arg3[%c0_2, %c0_3] : memref<32x64xbf16, #tpu.memory_space<vmem>>, vector<32x64xbf16>
    %cst = arith.constant dense<0.000000e+00> : vector<16x64xf32>
    %5 = tpu.matmul %3, %4, %cst {dimension_numbers = #tpu.dot_dimension_numbers<[1], [0], [0], [1], [0, 0, 1, 1], [], []>} : vector<16x32xbf16>, vector<32x64xbf16>, vector<16x64xf32> -> vector<16x64xf32>
    %c0_4 = arith.constant 0 : index
    %c0_5 = arith.constant 0 : index
    %6 = vector.load %arg4[%c0_4, %c0_5] : memref<1x64xf32, #tpu.memory_space<vmem>>, vector<1x64xf32>
    %7 = vector.broadcast %6 : vector<1x64xf32> to vector<16x64xf32>
    %8 = arith.addf %5, %7 : vector<16x64xf32>
    %cst_6 = arith.constant 0.000000e+00 : f32
    %9 = vector.broadcast %cst_6 : f32 to vector<16x64xf32>
    %10 = arith.maximumf %8, %9 : vector<16x64xf32>
    %c0_7 = arith.constant 0 : index
    %c0_8 = arith.constant 0 : index
    %11 = vector.load %arg10[%c0_7, %c0_8] : memref<16x32xf32, #tpu.memory_space<vmem>>, vector<16x32xf32>
    %12 = arith.truncf %10 : vector<16x64xf32> to vector<16x64xbf16>
    %c0_9 = arith.constant 0 : index
    %c0_10 = arith.constant 0 : index
    %13 = vector.load %arg5[%c0_9, %c0_10] : memref<64x32xbf16, #tpu.memory_space<vmem>>, vector<64x32xbf16>
    %cst_11 = arith.constant dense<0.000000e+00> : vector<16x32xf32>
    %14 = tpu.matmul %12, %13, %cst_11 {dimension_numbers = #tpu.dot_dimension_numbers<[1], [0], [0], [1], [0, 0, 1, 1], [], []>} : vector<16x64xbf16>, vector<64x32xbf16>, vector<16x32xf32> -> vector<16x32xf32>
    %15 = arith.addf %11, %14 : vector<16x32xf32>
    %c0_12 = arith.constant 0 : index
    %c0_13 = arith.constant 0 : index
    %16 = vector.load %arg10[%c0_12, %c0_13] : memref<16x32xf32, #tpu.memory_space<vmem>>, vector<16x32xf32>
    tpu.vector_store %arg10[%c0_12, %c0_13], %15 {strides = array<i32>} : memref<16x32xf32, #tpu.memory_space<vmem>>, vector<16x32xf32>,
    %c0_i32_14 = arith.constant 0 : i32
    %17 = arith.cmpi eq, %arg1, %c0_i32_14 : i32
    %18 = arith.extui %17 : i1 to i32
    %c0_i32_15 = arith.constant 0 : i32
    %19 = arith.cmpi ne, %18, %c0_i32_15 : i32
    scf.if %19 {
      %c0_16 = arith.constant 0 : index
      %c0_17 = arith.constant 0 : index
      %20 = vector.load %arg10[%c0_16, %c0_17] : memref<16x32xf32, #tpu.memory_space<vmem>>, vector<16x32xf32>
      %c0_18 = arith.constant 0 : index
      %c0_19 = arith.constant 0 : index
      %21 = vector.load %arg6[%c0_18, %c0_19] : memref<1x32xf32, #tpu.memory_space<vmem>>, vector<1x32xf32>
      %22 = vector.broadcast %21 : vector<1x32xf32> to vector<16x32xf32>
      %23 = arith.addf %20, %22 : vector<16x32xf32>
      %24 = arith.extf %3 : vector<16x32xbf16> to vector<16x32xf32>
      %25 = arith.addf %23, %24 : vector<16x32xf32>
      %c0_20 = arith.constant 0 : index
      %c0_21 = arith.constant 0 : index
      %26 = vector.load %arg7[%c0_20, %c0_21] : memref<1x32xf32, #tpu.memory_space<vmem>>, vector<1x32xf32>
      %c0_22 = arith.constant 0 : index
      %c0_23 = arith.constant 0 : index
      %27 = vector.load %arg8[%c0_22, %c0_23] : memref<1x32xf32, #tpu.memory_space<vmem>>, vector<1x32xf32>
      %cst_24 = arith.constant dense<0.000000e+00> : vector<16xf32>
      %28 = vector.multi_reduction <add>, %25, %cst_24 [1] : vector<16x32xf32> to vector<16xf32>
      %29 = vector.shape_cast %28 : vector<16xf32> to vector<16x1xf32>
      %cst_25 = arith.constant 3.200000e+01 : f32
      %30 = vector.broadcast %cst_25 : f32 to vector<16x1xf32>
      %31 = arith.divf %29, %30 : vector<16x1xf32>
      %32 = vector.broadcast %31 : vector<16x1xf32> to vector<16x32xf32>
      %33 = arith.subf %25, %32 : vector<16x32xf32>
      %34 = arith.mulf %33, %33 : vector<16x32xf32>
      %cst_26 = arith.constant dense<0.000000e+00> : vector<16xf32>
      %35 = vector.multi_reduction <add>, %34, %cst_26 [1] : vector<16x32xf32> to vector<16xf32>
      %36 = vector.shape_cast %35 : vector<16xf32> to vector<16x1xf32>
      %cst_27 = arith.constant 3.200000e+01 : f32
      %37 = vector.broadcast %cst_27 : f32 to vector<16x1xf32>
      %38 = arith.divf %36, %37 : vector<16x1xf32>
      %39 = vector.broadcast %31 : vector<16x1xf32> to vector<16x32xf32>
      %40 = arith.subf %25, %39 : vector<16x32xf32>
      %cst_28 = arith.constant 9.99999974E-6 : f32
      %41 = vector.broadcast %cst_28 : f32 to vector<16x1xf32>
      %42 = arith.addf %38, %41 : vector<16x1xf32>
      %43 = math.rsqrt %42 : vector<16x1xf32>
      %44 = vector.broadcast %43 : vector<16x1xf32> to vector<16x32xf32>
      %45 = arith.mulf %40, %44 : vector<16x32xf32>
      %46 = vector.broadcast %26 : vector<1x32xf32> to vector<16x32xf32>
      %47 = arith.mulf %45, %46 : vector<16x32xf32>
      %48 = vector.broadcast %27 : vector<1x32xf32> to vector<16x32xf32>
      %49 = arith.addf %47, %48 : vector<16x32xf32>
      %50 = arith.truncf %49 : vector<16x32xf32> to vector<16x32xbf16>
      %c0_29 = arith.constant 0 : index
      %c0_30 = arith.constant 0 : index
      %51 = vector.load %arg9[%c0_29, %c0_30] : memref<16x32xbf16, #tpu.memory_space<vmem>>, vector<16x32xbf16>
      tpu.vector_store %arg9[%c0_29, %c0_30], %50 {strides = array<i32>} : memref<16x32xbf16, #tpu.memory_space<vmem>>, vector<16x32xbf16>,
    } else {
    }
    return
  }
  func.func @transform_0(%arg0: i32, %arg1: i32) -> (i32, i32) {
    %c0_i32 = arith.constant 0 : i32
    %c0_i32_0 = arith.constant 0 : i32
    return %arg0, %c0_i32 : i32, i32
  }
  func.func @transform_1(%arg0: i32, %arg1: i32) -> (i32, i32) {
    %c0_i32 = arith.constant 0 : i32
    %c0_i32_0 = arith.constant 0 : i32
    return %c0_i32, %arg1 : i32, i32
  }
  func.func @transform_2(%arg0: i32, %arg1: i32) -> (i32, i32) {
    %c0_i32 = arith.constant 0 : i32
    %c0_i32_0 = arith.constant 0 : i32
    return %c0_i32, %arg1 : i32, i32
  }
  func.func @transform_3(%arg0: i32, %arg1: i32) -> (i32, i32) {
    %c0_i32 = arith.constant 0 : i32
    %c0_i32_0 = arith.constant 0 : i32
    return %arg1, %c0_i32 : i32, i32
  }
  func.func @transform_4(%arg0: i32, %arg1: i32) -> (i32, i32) {
    %c0_i32 = arith.constant 0 : i32
    %c0_i32_0 = arith.constant 0 : i32
    %c0_i32_1 = arith.constant 0 : i32
    return %c0_i32, %c0_i32_0 : i32, i32
  }
  func.func @transform_5(%arg0: i32, %arg1: i32) -> (i32, i32) {
    %c0_i32 = arith.constant 0 : i32
    %c0_i32_0 = arith.constant 0 : i32
    %c0_i32_1 = arith.constant 0 : i32
    return %c0_i32, %c0_i32_0 : i32, i32
  }
  func.func @transform_6(%arg0: i32, %arg1: i32) -> (i32, i32) {
    %c0_i32 = arith.constant 0 : i32
    %c0_i32_0 = arith.constant 0 : i32
    %c0_i32_1 = arith.constant 0 : i32
    return %c0_i32, %c0_i32_0 : i32, i32
  }
  func.func @transform_7(%arg0: i32, %arg1: i32) -> (i32, i32) {
    %c0_i32 = arith.constant 0 : i32
    %c0_i32_0 = arith.constant 0 : i32
    return %arg0, %c0_i32 : i32, i32
  }
}

module attributes {stable_mosaic.version = 11 : i64} {
  func.func @_linear_kernel(%arg0: i32, %arg1: i32, %arg2: memref<16x32xbf16, #tpu.memory_space<vmem>>, %arg3: memref<32x128xbf16, #tpu.memory_space<vmem>>, %arg4: memref<1x128xf32, #tpu.memory_space<vmem>>, %arg5: memref<16x128xbf16, #tpu.memory_space<vmem>>) attributes {dimension_semantics = [#tpu.dimension_semantics<parallel>, #tpu.dimension_semantics<parallel>], iteration_bounds = array<i64: 1, 1>, scalar_prefetch = 0 : i64, scratch_operands = 0 : i64, tpu.core_type = #tpu.core_type<tc>, window_params = [{transform_indices = @transform_0, window_bounds = array<i64: 16, 32>}, {transform_indices = @transform_1, window_bounds = array<i64: 32, 128>}, {transform_indices = @transform_2, window_bounds = array<i64: 1, 128>}, {transform_indices = @transform_3, window_bounds = array<i64: 16, 128>}]} {
    %c0 = arith.constant 0 : index
    %c0_0 = arith.constant 0 : index
    %0 = vector.load %arg2[%c0, %c0_0] : memref<16x32xbf16, #tpu.memory_space<vmem>>, vector<16x32xbf16>
    %c0_1 = arith.constant 0 : index
    %c0_2 = arith.constant 0 : index
    %1 = vector.load %arg3[%c0_1, %c0_2] : memref<32x128xbf16, #tpu.memory_space<vmem>>, vector<32x128xbf16>
    %cst = arith.constant dense<0.000000e+00> : vector<16x128xf32>
    %2 = tpu.matmul %0, %1, %cst {dimension_numbers = #tpu.dot_dimension_numbers<[1], [0], [0], [1], [0, 0, 1, 1], [], []>} : vector<16x32xbf16>, vector<32x128xbf16>, vector<16x128xf32> -> vector<16x128xf32>
    %c0_3 = arith.constant 0 : index
    %c0_4 = arith.constant 0 : index
    %3 = vector.load %arg4[%c0_3, %c0_4] : memref<1x128xf32, #tpu.memory_space<vmem>>, vector<1x128xf32>
    %4 = vector.broadcast %3 : vector<1x128xf32> to vector<16x128xf32>
    %5 = arith.addf %2, %4 : vector<16x128xf32>
    %6 = arith.truncf %5 : vector<16x128xf32> to vector<16x128xbf16>
    %c0_5 = arith.constant 0 : index
    %c0_6 = arith.constant 0 : index
    %7 = vector.load %arg5[%c0_5, %c0_6] : memref<16x128xbf16, #tpu.memory_space<vmem>>, vector<16x128xbf16>
    tpu.vector_store %arg5[%c0_5, %c0_6], %6 {strides = array<i32>} : memref<16x128xbf16, #tpu.memory_space<vmem>>, vector<16x128xbf16>,
    return
  }
  func.func @transform_0(%arg0: i32, %arg1: i32) -> (i32, i32) {
    %c0_i32 = arith.constant 0 : i32
    %c0_i32_0 = arith.constant 0 : i32
    return %arg0, %c0_i32 : i32, i32
  }
  func.func @transform_1(%arg0: i32, %arg1: i32) -> (i32, i32) {
    %c0_i32 = arith.constant 0 : i32
    %c0_i32_0 = arith.constant 0 : i32
    return %c0_i32, %arg1 : i32, i32
  }
  func.func @transform_2(%arg0: i32, %arg1: i32) -> (i32, i32) {
    %c0_i32 = arith.constant 0 : i32
    %c0_i32_0 = arith.constant 0 : i32
    return %c0_i32, %arg1 : i32, i32
  }
  func.func @transform_3(%arg0: i32, %arg1: i32) -> (i32, i32) {
    %c0_i32 = arith.constant 0 : i32
    return %arg0, %arg1 : i32, i32
  }
}

module attributes {stable_mosaic.version = 11 : i64} {
  func.func @_cross_attn_block_kernel(%arg0: i32, %arg1: i32, %arg2: memref<1x8x32xbf16, #tpu.memory_space<vmem>>, %arg3: memref<1x8x32xbf16, #tpu.memory_space<vmem>>, %arg4: memref<1x1x8xf32, #tpu.memory_space<vmem>>, %arg5: memref<32x512xbf16, #tpu.memory_space<vmem>>, %arg6: memref<1x512xf32, #tpu.memory_space<vmem>>, %arg7: memref<32x1024xbf16, #tpu.memory_space<vmem>>, %arg8: memref<1x1024xf32, #tpu.memory_space<vmem>>, %arg9: memref<512x32xbf16, #tpu.memory_space<vmem>>, %arg10: memref<1x32xf32, #tpu.memory_space<vmem>>, %arg11: memref<1x32xf32, #tpu.memory_space<vmem>>, %arg12: memref<1x32xf32, #tpu.memory_space<vmem>>, %arg13: memref<1x8x32xbf16, #tpu.memory_space<vmem>>) attributes {dimension_semantics = [#tpu.dimension_semantics<parallel>, #tpu.dimension_semantics<parallel>], iteration_bounds = array<i64: 2, 1>, scalar_prefetch = 0 : i64, scratch_operands = 0 : i64, tpu.core_type = #tpu.core_type<tc>, window_params = [{transform_indices = @transform_0, window_bounds = array<i64: 1, 8, 32>}, {transform_indices = @transform_1, window_bounds = array<i64: 1, 8, 32>}, {transform_indices = @transform_2, window_bounds = array<i64: 1, 1, 8>}, {pipeline_mode = #tpu.pipeline_mode<synchronous>, transform_indices = @transform_3, window_bounds = array<i64: 32, 512>}, {pipeline_mode = #tpu.pipeline_mode<synchronous>, transform_indices = @transform_4, window_bounds = array<i64: 1, 512>}, {pipeline_mode = #tpu.pipeline_mode<synchronous>, transform_indices = @transform_5, window_bounds = array<i64: 32, 1024>}, {pipeline_mode = #tpu.pipeline_mode<synchronous>, transform_indices = @transform_6, window_bounds = array<i64: 1, 1024>}, {pipeline_mode = #tpu.pipeline_mode<synchronous>, transform_indices = @transform_7, window_bounds = array<i64: 512, 32>}, {pipeline_mode = #tpu.pipeline_mode<synchronous>, transform_indices = @transform_8, window_bounds = array<i64: 1, 32>}, {pipeline_mode = #tpu.pipeline_mode<synchronous>, transform_indices = @transform_9, window_bounds = array<i64: 1, 32>}, {pipeline_mode = #tpu.pipeline_mode<synchronous>, transform_indices = @transform_10, window_bounds = array<i64: 1, 32>}, {transform_indices = @transform_11, window_bounds = array<i64: 1, 8, 32>}]} {
    %c0 = arith.constant 0 : index
    %c0_0 = arith.constant 0 : index
    %c0_1 = arith.constant 0 : index
    %0 = vector.load %arg2[%c0, %c0_0, %c0_1] : memref<1x8x32xbf16, #tpu.memory_space<vmem>>, vector<1x8x32xbf16>
    %1 = vector.shape_cast %0 : vector<1x8x32xbf16> to vector<8x32xbf16>
    %c0_2 = arith.constant 0 : index
    %c0_3 = arith.constant 0 : index
    %2 = vector.load %arg5[%c0_2, %c0_3] : memref<32x512xbf16, #tpu.memory_space<vmem>>, vector<32x512xbf16>
    %cst = arith.constant dense<0.000000e+00> : vector<8x512xf32>
    %3 = tpu.matmul %1, %2, %cst {dimension_numbers = #tpu.dot_dimension_numbers<[1], [0], [0], [1], [0, 0, 1, 1], [], []>} : vector<8x32xbf16>, vector<32x512xbf16>, vector<8x512xf32> -> vector<8x512xf32>
    %c0_4 = arith.constant 0 : index
    %c0_5 = arith.constant 0 : index
    %4 = vector.load %arg6[%c0_4, %c0_5] : memref<1x512xf32, #tpu.memory_space<vmem>>, vector<1x512xf32>
    %5 = vector.broadcast %4 : vector<1x512xf32> to vector<8x512xf32>
    %6 = arith.addf %3, %5 : vector<8x512xf32>
    %7 = arith.truncf %6 : vector<8x512xf32> to vector<8x512xbf16>
    %c0_6 = arith.constant 0 : index
    %c0_7 = arith.constant 0 : index
    %8 = vector.load %arg8[%c0_6, %c0_7] : memref<1x1024xf32, #tpu.memory_space<vmem>>, vector<1x1024xf32>
    %cst_8 = arith.constant -1.000000e+30 : f32
    %9 = vector.broadcast %cst_8 : f32 to vector<8x1xf32>
    %cst_9 = arith.constant -1.000000e+30 : f32
    %10 = vector.broadcast %cst_9 : f32 to vector<8x1xf32>
    %cst_10 = arith.constant -1.000000e+30 : f32
    %11 = vector.broadcast %cst_10 : f32 to vector<8x1xf32>
    %cst_11 = arith.constant -1.000000e+30 : f32
    %12 = vector.broadcast %cst_11 : f32 to vector<8x1xf32>
    %cst_12 = arith.constant 0.000000e+00 : f32
    %13 = vector.broadcast %cst_12 : f32 to vector<8x1xf32>
    %cst_13 = arith.constant 0.000000e+00 : f32
    %14 = vector.broadcast %cst_13 : f32 to vector<8x1xf32>
    %cst_14 = arith.constant 0.000000e+00 : f32
    %15 = vector.broadcast %cst_14 : f32 to vector<8x1xf32>
    %cst_15 = arith.constant 0.000000e+00 : f32
    %16 = vector.broadcast %cst_15 : f32 to vector<8x1xf32>
    %cst_16 = arith.constant 0.000000e+00 : f32
    %17 = vector.broadcast %cst_16 : f32 to vector<8x128xf32>
    %cst_17 = arith.constant 0.000000e+00 : f32
    %18 = vector.broadcast %cst_17 : f32 to vector<8x128xf32>
    %cst_18 = arith.constant 0.000000e+00 : f32
    %19 = vector.broadcast %cst_18 : f32 to vector<8x128xf32>
    %cst_19 = arith.constant 0.000000e+00 : f32
    %20 = vector.broadcast %cst_19 : f32 to vector<8x128xf32>
    %c0_20 = arith.constant 0 : index
    %c0_21 = arith.constant 0 : index
    %c0_22 = arith.constant 0 : index
    %21 = vector.load %arg3[%c0_20, %c0_21, %c0_22] : memref<1x8x32xbf16, #tpu.memory_space<vmem>>, vector<1x8x32xbf16>
    %22 = vector.shape_cast %21 : vector<1x8x32xbf16> to vector<8x32xbf16>
    %c0_23 = arith.constant 0 : index
    %c0_24 = arith.constant 0 : index
    %23 = vector.load %arg7[%c0_23, %c0_24] : memref<32x1024xbf16, #tpu.memory_space<vmem>>, vector<32x1024xbf16>
    %cst_25 = arith.constant dense<0.000000e+00> : vector<8x1024xf32>
    %24 = tpu.matmul %22, %23, %cst_25 {dimension_numbers = #tpu.dot_dimension_numbers<[1], [0], [0], [1], [0, 0, 1, 1], [], []>} : vector<8x32xbf16>, vector<32x1024xbf16>, vector<8x1024xf32> -> vector<8x1024xf32>
    %25 = vector.broadcast %8 : vector<1x1024xf32> to vector<8x1024xf32>
    %26 = arith.addf %24, %25 : vector<8x1024xf32>
    %27 = arith.truncf %26 : vector<8x1024xf32> to vector<8x1024xbf16>
    %c0_26 = arith.constant 0 : index
    %c0_27 = arith.constant 0 : index
    %c0_28 = arith.constant 0 : index
    %28 = vector.load %arg4[%c0_26, %c0_27, %c0_28] : memref<1x1x8xf32, #tpu.memory_space<vmem>>, vector<1x1x8xf32>
    %29 = vector.shape_cast %28 : vector<1x1x8xf32> to vector<1x8xf32>
    %30 = vector.extract_strided_slice %7 {offsets = [0, 0], sizes = [8, 128], strides = [1, 1]} : vector<8x512xbf16> to vector<8x128xbf16>
    %31 = vector.extract_strided_slice %27 {offsets = [0, 0], sizes = [8, 128], strides = [1, 1]} : vector<8x1024xbf16> to vector<8x128xbf16>
    %32 = vector.extract_strided_slice %27 {offsets = [0, 512], sizes = [8, 128], strides = [1, 1]} : vector<8x1024xbf16> to vector<8x128xbf16>
    %cst_29 = arith.constant dense<0.000000e+00> : vector<8x8xf32>
    %33 = tpu.matmul %30, %31, %cst_29 {dimension_numbers = #tpu.dot_dimension_numbers<[1], [1], [0], [0], [0, 0, 1, 0], [], []>} : vector<8x128xbf16>, vector<8x128xbf16>, vector<8x8xf32> -> vector<8x8xf32>
    %34 = vector.broadcast %29 : vector<1x8xf32> to vector<8x8xf32>
    %35 = arith.addf %33, %34 : vector<8x8xf32>
    %cst_30 = arith.constant dense<0xFF800000> : vector<8xf32>
    %36 = vector.multi_reduction <maximumf>, %35, %cst_30 [1] : vector<8x8xf32> to vector<8xf32>
    %37 = vector.shape_cast %36 : vector<8xf32> to vector<8x1xf32>
    %38 = arith.maximumf %9, %37 : vector<8x1xf32>
    %39 = arith.subf %9, %38 : vector<8x1xf32>
    %40 = math.exp %39 : vector<8x1xf32>
    %41 = vector.broadcast %38 : vector<8x1xf32> to vector<8x8xf32>
    %42 = arith.subf %35, %41 : vector<8x8xf32>
    %43 = math.exp %42 : vector<8x8xf32>
    %44 = arith.mulf %40, %13 : vector<8x1xf32>
    %cst_31 = arith.constant dense<0.000000e+00> : vector<8xf32>
    %45 = vector.multi_reduction <add>, %43, %cst_31 [1] : vector<8x8xf32> to vector<8xf32>
    %46 = vector.shape_cast %45 : vector<8xf32> to vector<8x1xf32>
    %47 = arith.addf %44, %46 : vector<8x1xf32>
    %48 = vector.broadcast %40 : vector<8x1xf32> to vector<8x128xf32>
    %49 = arith.mulf %48, %17 : vector<8x128xf32>
    %50 = arith.truncf %43 : vector<8x8xf32> to vector<8x8xbf16>
    %cst_32 = arith.constant dense<0.000000e+00> : vector<8x128xf32>
    %51 = tpu.matmul %50, %32, %cst_32 {dimension_numbers = #tpu.dot_dimension_numbers<[1], [0], [0], [1], [0, 0, 1, 1], [], []>} : vector<8x8xbf16>, vector<8x128xbf16>, vector<8x128xf32> -> vector<8x128xf32>
    %52 = arith.addf %49, %51 : vector<8x128xf32>
    %53 = vector.extract_strided_slice %7 {offsets = [0, 128], sizes = [8, 128], strides = [1, 1]} : vector<8x512xbf16> to vector<8x128xbf16>
    %54 = vector.extract_strided_slice %27 {offsets = [0, 128], sizes = [8, 128], strides = [1, 1]} : vector<8x1024xbf16> to vector<8x128xbf16>
    %55 = vector.extract_strided_slice %27 {offsets = [0, 640], sizes = [8, 128], strides = [1, 1]} : vector<8x1024xbf16> to vector<8x128xbf16>
    %cst_33 = arith.constant dense<0.000000e+00> : vector<8x8xf32>
    %56 = tpu.matmul %53, %54, %cst_33 {dimension_numbers = #tpu.dot_dimension_numbers<[1], [1], [0], [0], [0, 0, 1, 0], [], []>} : vector<8x128xbf16>, vector<8x128xbf16>, vector<8x8xf32> -> vector<8x8xf32>
    %57 = vector.broadcast %29 : vector<1x8xf32> to vector<8x8xf32>
    %58 = arith.addf %56, %57 : vector<8x8xf32>
    %cst_34 = arith.constant dense<0xFF800000> : vector<8xf32>
    %59 = vector.multi_reduction <maximumf>, %58, %cst_34 [1] : vector<8x8xf32> to vector<8xf32>
    %60 = vector.shape_cast %59 : vector<8xf32> to vector<8x1xf32>
    %61 = arith.maximumf %10, %60 : vector<8x1xf32>
    %62 = arith.subf %10, %61 : vector<8x1xf32>
    %63 = math.exp %62 : vector<8x1xf32>
    %64 = vector.broadcast %61 : vector<8x1xf32> to vector<8x8xf32>
    %65 = arith.subf %58, %64 : vector<8x8xf32>
    %66 = math.exp %65 : vector<8x8xf32>
    %67 = arith.mulf %63, %14 : vector<8x1xf32>
    %cst_35 = arith.constant dense<0.000000e+00> : vector<8xf32>
    %68 = vector.multi_reduction <add>, %66, %cst_35 [1] : vector<8x8xf32> to vector<8xf32>
    %69 = vector.shape_cast %68 : vector<8xf32> to vector<8x1xf32>
    %70 = arith.addf %67, %69 : vector<8x1xf32>
    %71 = vector.broadcast %63 : vector<8x1xf32> to vector<8x128xf32>
    %72 = arith.mulf %71, %18 : vector<8x128xf32>
    %73 = arith.truncf %66 : vector<8x8xf32> to vector<8x8xbf16>
    %cst_36 = arith.constant dense<0.000000e+00> : vector<8x128xf32>
    %74 = tpu.matmul %73, %55, %cst_36 {dimension_numbers = #tpu.dot_dimension_numbers<[1], [0], [0], [1], [0, 0, 1, 1], [], []>} : vector<8x8xbf16>, vector<8x128xbf16>, vector<8x128xf32> -> vector<8x128xf32>
    %75 = arith.addf %72, %74 : vector<8x128xf32>
    %76 = vector.extract_strided_slice %7 {offsets = [0, 256], sizes = [8, 128], strides = [1, 1]} : vector<8x512xbf16> to vector<8x128xbf16>
    %77 = vector.extract_strided_slice %27 {offsets = [0, 256], sizes = [8, 128], strides = [1, 1]} : vector<8x1024xbf16> to vector<8x128xbf16>
    %78 = vector.extract_strided_slice %27 {offsets = [0, 768], sizes = [8, 128], strides = [1, 1]} : vector<8x1024xbf16> to vector<8x128xbf16>
    %cst_37 = arith.constant dense<0.000000e+00> : vector<8x8xf32>
    %79 = tpu.matmul %76, %77, %cst_37 {dimension_numbers = #tpu.dot_dimension_numbers<[1], [1], [0], [0], [0, 0, 1, 0], [], []>} : vector<8x128xbf16>, vector<8x128xbf16>, vector<8x8xf32> -> vector<8x8xf32>
    %80 = vector.broadcast %29 : vector<1x8xf32> to vector<8x8xf32>
    %81 = arith.addf %79, %80 : vector<8x8xf32>
    %cst_38 = arith.constant dense<0xFF800000> : vector<8xf32>
    %82 = vector.multi_reduction <maximumf>, %81, %cst_38 [1] : vector<8x8xf32> to vector<8xf32>
    %83 = vector.shape_cast %82 : vector<8xf32> to vector<8x1xf32>
    %84 = arith.maximumf %11, %83 : vector<8x1xf32>
    %85 = arith.subf %11, %84 : vector<8x1xf32>
    %86 = math.exp %85 : vector<8x1xf32>
    %87 = vector.broadcast %84 : vector<8x1xf32> to vector<8x8xf32>
    %88 = arith.subf %81, %87 : vector<8x8xf32>
    %89 = math.exp %88 : vector<8x8xf32>
    %90 = arith.mulf %86, %15 : vector<8x1xf32>
    %cst_39 = arith.constant dense<0.000000e+00> : vector<8xf32>
    %91 = vector.multi_reduction <add>, %89, %cst_39 [1] : vector<8x8xf32> to vector<8xf32>
    %92 = vector.shape_cast %91 : vector<8xf32> to vector<8x1xf32>
    %93 = arith.addf %90, %92 : vector<8x1xf32>
    %94 = vector.broadcast %86 : vector<8x1xf32> to vector<8x128xf32>
    %95 = arith.mulf %94, %19 : vector<8x128xf32>
    %96 = arith.truncf %89 : vector<8x8xf32> to vector<8x8xbf16>
    %cst_40 = arith.constant dense<0.000000e+00> : vector<8x128xf32>
    %97 = tpu.matmul %96, %78, %cst_40 {dimension_numbers = #tpu.dot_dimension_numbers<[1], [0], [0], [1], [0, 0, 1, 1], [], []>} : vector<8x8xbf16>, vector<8x128xbf16>, vector<8x128xf32> -> vector<8x128xf32>
    %98 = arith.addf %95, %97 : vector<8x128xf32>
    %99 = vector.extract_strided_slice %7 {offsets = [0, 384], sizes = [8, 128], strides = [1, 1]} : vector<8x512xbf16> to vector<8x128xbf16>
    %100 = vector.extract_strided_slice %27 {offsets = [0, 384], sizes = [8, 128], strides = [1, 1]} : vector<8x1024xbf16> to vector<8x128xbf16>
    %101 = vector.extract_strided_slice %27 {offsets = [0, 896], sizes = [8, 128], strides = [1, 1]} : vector<8x1024xbf16> to vector<8x128xbf16>
    %cst_41 = arith.constant dense<0.000000e+00> : vector<8x8xf32>
    %102 = tpu.matmul %99, %100, %cst_41 {dimension_numbers = #tpu.dot_dimension_numbers<[1], [1], [0], [0], [0, 0, 1, 0], [], []>} : vector<8x128xbf16>, vector<8x128xbf16>, vector<8x8xf32> -> vector<8x8xf32>
    %103 = vector.broadcast %29 : vector<1x8xf32> to vector<8x8xf32>
    %104 = arith.addf %102, %103 : vector<8x8xf32>
    %cst_42 = arith.constant dense<0xFF800000> : vector<8xf32>
    %105 = vector.multi_reduction <maximumf>, %104, %cst_42 [1] : vector<8x8xf32> to vector<8xf32>
    %106 = vector.shape_cast %105 : vector<8xf32> to vector<8x1xf32>
    %107 = arith.maximumf %12, %106 : vector<8x1xf32>
    %108 = arith.subf %12, %107 : vector<8x1xf32>
    %109 = math.exp %108 : vector<8x1xf32>
    %110 = vector.broadcast %107 : vector<8x1xf32> to vector<8x8xf32>
    %111 = arith.subf %104, %110 : vector<8x8xf32>
    %112 = math.exp %111 : vector<8x8xf32>
    %113 = arith.mulf %109, %16 : vector<8x1xf32>
    %cst_43 = arith.constant dense<0.000000e+00> : vector<8xf32>
    %114 = vector.multi_reduction <add>, %112, %cst_43 [1] : vector<8x8xf32> to vector<8xf32>
    %115 = vector.shape_cast %114 : vector<8xf32> to vector<8x1xf32>
    %116 = arith.addf %113, %115 : vector<8x1xf32>
    %117 = vector.broadcast %109 : vector<8x1xf32> to vector<8x128xf32>
    %118 = arith.mulf %117, %20 : vector<8x128xf32>
    %119 = arith.truncf %112 : vector<8x8xf32> to vector<8x8xbf16>
    %cst_44 = arith.constant dense<0.000000e+00> : vector<8x128xf32>
    %120 = tpu.matmul %119, %101, %cst_44 {dimension_numbers = #tpu.dot_dimension_numbers<[1], [0], [0], [1], [0, 0, 1, 1], [], []>} : vector<8x8xbf16>, vector<8x128xbf16>, vector<8x128xf32> -> vector<8x128xf32>
    %121 = arith.addf %118, %120 : vector<8x128xf32>
    %cst_45 = arith.constant 0.000000e+00 : f32
    %122 = vector.broadcast %cst_45 : f32 to vector<8x32xf32>
    %123 = tpu.reciprocal %47 {approx = true} : vector<8x1xf32> -> vector<8x1xf32>
    %124 = vector.broadcast %123 : vector<8x1xf32> to vector<8x128xf32>
    %125 = arith.mulf %52, %124 : vector<8x128xf32>
    %126 = arith.truncf %125 : vector<8x128xf32> to vector<8x128xbf16>
    %c0_46 = arith.constant 0 : index
    %c0_47 = arith.constant 0 : index
    %127 = vector.load %arg9[%c0_46, %c0_47] : memref<512x32xbf16, #tpu.memory_space<vmem>>, vector<128x32xbf16>
    %cst_48 = arith.constant dense<0.000000e+00> : vector<8x32xf32>
    %128 = tpu.matmul %126, %127, %cst_48 {dimension_numbers = #tpu.dot_dimension_numbers<[1], [0], [0], [1], [0, 0, 1, 1], [], []>} : vector<8x128xbf16>, vector<128x32xbf16>, vector<8x32xf32> -> vector<8x32xf32>
    %129 = arith.addf %122, %128 : vector<8x32xf32>
    %130 = tpu.reciprocal %70 {approx = true} : vector<8x1xf32> -> vector<8x1xf32>
    %131 = vector.broadcast %130 : vector<8x1xf32> to vector<8x128xf32>
    %132 = arith.mulf %75, %131 : vector<8x128xf32>
    %133 = arith.truncf %132 : vector<8x128xf32> to vector<8x128xbf16>
    %c128 = arith.constant 128 : index
    %c0_49 = arith.constant 0 : index
    %134 = vector.load %arg9[%c128, %c0_49] : memref<512x32xbf16, #tpu.memory_space<vmem>>, vector<128x32xbf16>
    %cst_50 = arith.constant dense<0.000000e+00> : vector<8x32xf32>
    %135 = tpu.matmul %133, %134, %cst_50 {dimension_numbers = #tpu.dot_dimension_numbers<[1], [0], [0], [1], [0, 0, 1, 1], [], []>} : vector<8x128xbf16>, vector<128x32xbf16>, vector<8x32xf32> -> vector<8x32xf32>
    %136 = arith.addf %129, %135 : vector<8x32xf32>
    %137 = tpu.reciprocal %93 {approx = true} : vector<8x1xf32> -> vector<8x1xf32>
    %138 = vector.broadcast %137 : vector<8x1xf32> to vector<8x128xf32>
    %139 = arith.mulf %98, %138 : vector<8x128xf32>
    %140 = arith.truncf %139 : vector<8x128xf32> to vector<8x128xbf16>
    %c256 = arith.constant 256 : index
    %c0_51 = arith.constant 0 : index
    %141 = vector.load %arg9[%c256, %c0_51] : memref<512x32xbf16, #tpu.memory_space<vmem>>, vector<128x32xbf16>
    %cst_52 = arith.constant dense<0.000000e+00> : vector<8x32xf32>
    %142 = tpu.matmul %140, %141, %cst_52 {dimension_numbers = #tpu.dot_dimension_numbers<[1], [0], [0], [1], [0, 0, 1, 1], [], []>} : vector<8x128xbf16>, vector<128x32xbf16>, vector<8x32xf32> -> vector<8x32xf32>
    %143 = arith.addf %136, %142 : vector<8x32xf32>
    %144 = tpu.reciprocal %116 {approx = true} : vector<8x1xf32> -> vector<8x1xf32>
    %145 = vector.broadcast %144 : vector<8x1xf32> to vector<8x128xf32>
    %146 = arith.mulf %121, %145 : vector<8x128xf32>
    %147 = arith.truncf %146 : vector<8x128xf32> to vector<8x128xbf16>
    %c384 = arith.constant 384 : index
    %c0_53 = arith.constant 0 : index
    %148 = vector.load %arg9[%c384, %c0_53] : memref<512x32xbf16, #tpu.memory_space<vmem>>, vector<128x32xbf16>
    %cst_54 = arith.constant dense<0.000000e+00> : vector<8x32xf32>
    %149 = tpu.matmul %147, %148, %cst_54 {dimension_numbers = #tpu.dot_dimension_numbers<[1], [0], [0], [1], [0, 0, 1, 1], [], []>} : vector<8x128xbf16>, vector<128x32xbf16>, vector<8x32xf32> -> vector<8x32xf32>
    %150 = arith.addf %143, %149 : vector<8x32xf32>
    %c0_55 = arith.constant 0 : index
    %c0_56 = arith.constant 0 : index
    %151 = vector.load %arg10[%c0_55, %c0_56] : memref<1x32xf32, #tpu.memory_space<vmem>>, vector<1x32xf32>
    %152 = vector.broadcast %151 : vector<1x32xf32> to vector<8x32xf32>
    %153 = arith.addf %150, %152 : vector<8x32xf32>
    %154 = arith.extf %1 : vector<8x32xbf16> to vector<8x32xf32>
    %155 = arith.addf %153, %154 : vector<8x32xf32>
    %c0_57 = arith.constant 0 : index
    %c0_58 = arith.constant 0 : index
    %156 = vector.load %arg11[%c0_57, %c0_58] : memref<1x32xf32, #tpu.memory_space<vmem>>, vector<1x32xf32>
    %c0_59 = arith.constant 0 : index
    %c0_60 = arith.constant 0 : index
    %157 = vector.load %arg12[%c0_59, %c0_60] : memref<1x32xf32, #tpu.memory_space<vmem>>, vector<1x32xf32>
    %cst_61 = arith.constant dense<0.000000e+00> : vector<8xf32>
    %158 = vector.multi_reduction <add>, %155, %cst_61 [1] : vector<8x32xf32> to vector<8xf32>
    %159 = vector.shape_cast %158 : vector<8xf32> to vector<8x1xf32>
    %cst_62 = arith.constant 3.200000e+01 : f32
    %160 = vector.broadcast %cst_62 : f32 to vector<8x1xf32>
    %161 = arith.divf %159, %160 : vector<8x1xf32>
    %162 = vector.broadcast %161 : vector<8x1xf32> to vector<8x32xf32>
    %163 = arith.subf %155, %162 : vector<8x32xf32>
    %164 = arith.mulf %163, %163 : vector<8x32xf32>
    %cst_63 = arith.constant dense<0.000000e+00> : vector<8xf32>
    %165 = vector.multi_reduction <add>, %164, %cst_63 [1] : vector<8x32xf32> to vector<8xf32>
    %166 = vector.shape_cast %165 : vector<8xf32> to vector<8x1xf32>
    %cst_64 = arith.constant 3.200000e+01 : f32
    %167 = vector.broadcast %cst_64 : f32 to vector<8x1xf32>
    %168 = arith.divf %166, %167 : vector<8x1xf32>
    %169 = vector.broadcast %161 : vector<8x1xf32> to vector<8x32xf32>
    %170 = arith.subf %155, %169 : vector<8x32xf32>
    %cst_65 = arith.constant 9.99999974E-6 : f32
    %171 = vector.broadcast %cst_65 : f32 to vector<8x1xf32>
    %172 = arith.addf %168, %171 : vector<8x1xf32>
    %173 = math.rsqrt %172 : vector<8x1xf32>
    %174 = vector.broadcast %173 : vector<8x1xf32> to vector<8x32xf32>
    %175 = arith.mulf %170, %174 : vector<8x32xf32>
    %176 = vector.broadcast %156 : vector<1x32xf32> to vector<8x32xf32>
    %177 = arith.mulf %175, %176 : vector<8x32xf32>
    %178 = vector.broadcast %157 : vector<1x32xf32> to vector<8x32xf32>
    %179 = arith.addf %177, %178 : vector<8x32xf32>
    %180 = arith.truncf %179 : vector<8x32xf32> to vector<8x32xbf16>
    %c0_66 = arith.constant 0 : index
    %c0_67 = arith.constant 0 : index
    %c0_68 = arith.constant 0 : index
    %181 = vector.load %arg13[%c0_66, %c0_67, %c0_68] : memref<1x8x32xbf16, #tpu.memory_space<vmem>>, vector<1x8x32xbf16>
    %182 = vector.shape_cast %181 : vector<1x8x32xbf16> to vector<8x32xbf16>
    %183 = vector.shape_cast %180 : vector<8x32xbf16> to vector<1x8x32xbf16>
    tpu.vector_store %arg13[%c0_66, %c0_67, %c0_68], %183 {strides = array<i32>} : memref<1x8x32xbf16, #tpu.memory_space<vmem>>, vector<1x8x32xbf16>,
    return
  }
  func.func @transform_0(%arg0: i32, %arg1: i32) -> (i32, i32, i32) {
    %c0_i32 = arith.constant 0 : i32
    %c0_i32_0 = arith.constant 0 : i32
    return %arg0, %arg1, %c0_i32 : i32, i32, i32
  }
  func.func @transform_1(%arg0: i32, %arg1: i32) -> (i32, i32, i32) {
    %c0_i32 = arith.constant 0 : i32
    %c0_i32_0 = arith.constant 0 : i32
    %c0_i32_1 = arith.constant 0 : i32
    return %arg0, %c0_i32, %c0_i32_0 : i32, i32, i32
  }
  func.func @transform_2(%arg0: i32, %arg1: i32) -> (i32, i32, i32) {
    %c0_i32 = arith.constant 0 : i32
    %c0_i32_0 = arith.constant 0 : i32
    %c0_i32_1 = arith.constant 0 : i32
    return %arg0, %c0_i32, %c0_i32_0 : i32, i32, i32
  }
  func.func @transform_3(%arg0: i32, %arg1: i32) -> (i32, i32) {
    %c0_i32 = arith.constant 0 : i32
    %c0_i32_0 = arith.constant 0 : i32
    %c0_i32_1 = arith.constant 0 : i32
    return %c0_i32, %c0_i32_0 : i32, i32
  }
  func.func @transform_4(%arg0: i32, %arg1: i32) -> (i32, i32) {
    %c0_i32 = arith.constant 0 : i32
    %c0_i32_0 = arith.constant 0 : i32
    %c0_i32_1 = arith.constant 0 : i32
    return %c0_i32, %c0_i32_0 : i32, i32
  }
  func.func @transform_5(%arg0: i32, %arg1: i32) -> (i32, i32) {
    %c0_i32 = arith.constant 0 : i32
    %c0_i32_0 = arith.constant 0 : i32
    %c0_i32_1 = arith.constant 0 : i32
    return %c0_i32, %c0_i32_0 : i32, i32
  }
  func.func @transform_6(%arg0: i32, %arg1: i32) -> (i32, i32) {
    %c0_i32 = arith.constant 0 : i32
    %c0_i32_0 = arith.constant 0 : i32
    %c0_i32_1 = arith.constant 0 : i32
    return %c0_i32, %c0_i32_0 : i32, i32
  }
  func.func @transform_7(%arg0: i32, %arg1: i32) -> (i32, i32) {
    %c0_i32 = arith.constant 0 : i32
    %c0_i32_0 = arith.constant 0 : i32
    %c0_i32_1 = arith.constant 0 : i32
    return %c0_i32, %c0_i32_0 : i32, i32
  }
  func.func @transform_8(%arg0: i32, %arg1: i32) -> (i32, i32) {
    %c0_i32 = arith.constant 0 : i32
    %c0_i32_0 = arith.constant 0 : i32
    %c0_i32_1 = arith.constant 0 : i32
    return %c0_i32, %c0_i32_0 : i32, i32
  }
  func.func @transform_9(%arg0: i32, %arg1: i32) -> (i32, i32) {
    %c0_i32 = arith.constant 0 : i32
    %c0_i32_0 = arith.constant 0 : i32
    %c0_i32_1 = arith.constant 0 : i32
    return %c0_i32, %c0_i32_0 : i32, i32
  }
  func.func @transform_10(%arg0: i32, %arg1: i32) -> (i32, i32) {
    %c0_i32 = arith.constant 0 : i32
    %c0_i32_0 = arith.constant 0 : i32
    %c0_i32_1 = arith.constant 0 : i32
    return %c0_i32, %c0_i32_0 : i32, i32
  }
  func.func @transform_11(%arg0: i32, %arg1: i32) -> (i32, i32, i32) {
    %c0_i32 = arith.constant 0 : i32
    %c0_i32_0 = arith.constant 0 : i32
    return %arg0, %arg1, %c0_i32 : i32, i32, i32
  }
}

</mosaic_0001>

<bundles_post_ra>
// kernel: decoder_forward.13
= control target key start
LH: loop header
LB: loop body
LE: loop exit
PB: predicated region body
PF: predicated region fallthrough
CT: control target
= control target key end

     0   :  { %v134_v0 = vmov 0.0   ;;  %vm135_vm0 = vmmov 0   ;;  %vm45_vm1 = vcmask 261120   ;;  %s171_s1 = inlined_call_operand.vmem [shape: bf16[32,128], index: 1, kind: input, shape index: {}]   ;;  %s172_s0 = inlined_call_operand.vmem [shape: bf16[16,32], index: 0, kind: input, shape index: {}]   ;;  %s173_s2 = inlined_call_operand.vmem [shape: f32[1,128], index: 2, kind: input, shape index: {}]   ;;  %s174_s3 = inlined_call_operand.vmem [shape: bf16[16,128], index: 3, kind: output, shape index: {}]  }
   0x1   :  { %121 = vmatprep.subr.bf16.mxu0 %v134_v0  ;;  %v131_v1 = vld [vmem:[%s171_s1] sm:$0xff]   ;;  %125 = vmatprep.mubr.msk.bf16.mxu0 %vm135_vm0, %v134_v0  ;;  %v132_v2 = vld [vmem:[%s171_s1 + $0x8] sm:$0xff]  }
   0x2   :  { %122 = vmatpush3.bf16.msra.mxu0 %v131_v1  ;;  %v133_v3 = vld [vmem:[%s172_s0] sm:$0xff]  }
   0x3   :  { %123 = vmatprep.subr.bf16.mxu0 %v134_v0  ;;  %v104_v4 = vld [vmem:[%s173_s2] ss:$0 sm:$0xff] }
   0x6   :  { %124 = vmatpush3.bf16.msra.mxu0 %v132_v2 }
   0x9   :  { %126 = vmatmul.mubr.msk.bf16.vlgmr.msra.gmra.mrb[0].mxu0 %vm45_vm1, %v133_v3 }
  0xdc   :  { %v83_v5 = vpop.f32.mrb[0].mxu0 }
  0xdd   :  { %v127_v6 = vpop.f32.mrb[1].mxu0  ;;  %v84_v8 = vadd.f32 %v104_v4, %v83_v5 }
  0xde   :  { %v86_v7 = vpop.f32.mrb[2].mxu0 }
  0xdf   :  { %v87_v9 = vadd.f32 %v104_v4, %v86_v7  ;;  %v128_v10 = vpop.f32.mrb[3].mxu0 }
  0xe1   :  { %v116_v11 = vpack.c.bf16 %v87_v9, %v84_v8 }
  0xe3   :  { %117 = vst [vmem:[%s174_s3] sm:$0xff] %v116_v11  }

// kernel: decoder_forward.9
= control target key start
LH: loop header
LB: loop body
LE: loop exit
PB: predicated region body
PF: predicated region fallthrough
CT: control target
= control target key end

     0   :  { %vm31_vm0 = vcmask 261120   ;;  %v332_v0 = vmov 0.0   ;;  %vm333_vm1 = vmmov 0   ;;  %vm146_vm2 = vcmask 523264   ;;  %s422_s1 = inlined_call_operand.vmem [shape: bf16[32,64], index: 1, kind: input, shape index: {}]   ;;  %s423_s0 = inlined_call_operand.vmem [shape: bf16[16,32], index: 0, kind: input, shape index: {}]   ;;  %s424_s3 = inlined_call_operand.vmem [shape: bf16[64,32], index: 3, kind: input, shape index: {}]   ;;  %s425_s2 = inlined_call_operand.vmem [shape: f32[1,64], index: 2, kind: input, shape index: {}]   ;;  %s426_s4 = inlined_call_operand.vmem [shape: f32[1,32], index: 4, kind: input, shape index: {}]   ;;  %s427_s5 = inlined_call_operand.vmem [shape: f32[1,32], index: 5, kind: input, shape index: {}]   ;;  %s428_s6 = inlined_call_operand.vmem [shape: f32[1,32], index: 6, kind: input, shape index: {}]   ;;  %s429_s7 = inlined_call_operand.vmem [shape: bf16[16,32], index: 7, kind: output, shape index: {}]  }
   0x1   :  { %298 = vmatprep.subr.bf16.mxu0 %v332_v0  ;;  %v320_v1 = vld [vmem:[%s422_s1] sm:$0xff]   ;;  %302 = vmatprep.mubr.msk.bf16.mxu0 %vm333_vm1, %v332_v0  ;;  %32 = vst.msk [vmem:[#allocation2] sm:$0xff] %vm31_vm0, %v332_v0  ;;  %33 = vst.msk [vmem:[#allocation2 + $0x8] sm:$0xff] %vm31_vm0, %v332_v0  ;;  %v321_v2 = vld [vmem:[%s422_s1 + $0x8] sm:$0xff]   ;;  %vm266_vm3 = vcmask 257024  }
   0x2   :  { %306 = vmatprep.subr.bf16.mxu1 %v332_v0  ;;  %314 = vmatprep.mubr.msk.bf16.mxu1 %vm333_vm1, %v332_v0  ;;  %v34_v3 = vld [vmem:[%s423_s0] sm:$0xff]   ;;  %v324_v5 = vld [vmem:[%s424_s3 + $0x8] sm:$0xff]   ;;  %v325_v6 = vld [vmem:[%s424_s3 + $0x10] sm:$0xff]  }
   0x3   :  { %299 = vmatpush3.bf16.msra.mxu0 %v320_v1  ;;  %v323_v4 = vld [vmem:[%s424_s3] sm:$0xff]   ;;  %v326_v7 = vld [vmem:[%s424_s3 + $0x18] sm:$0xff]   ;;  %v209_v27 = vunpack.c.l.bf16 %v34_v3  ;;  %v210_v30 = vunpack.c.h.bf16 %v34_v3 }
   0x4   :  { %300 = vmatprep.subr.bf16.mxu0 %v332_v0  ;;  %307 = vmatpush3.bf16.msra.mxu1 %v323_v4  ;;  %v273_v8 = vld [vmem:[%s425_s2] ss:$0 sm:$0xff] }
   0x5   :  { %308 = vmatprep.subr.bf16.mxu1 %v332_v0  ;;  %v283_v26 = vld [vmem:[%s426_s4] ss:$0 sm:$0xff] }
   0x6   :  { %v284_v54 = vld [vmem:[%s427_s5] ss:$0 sm:$0xff] }
   0x7   :  { %301 = vmatpush3.bf16.msra.mxu0 %v321_v2  ;;  %v285_v56 = vld [vmem:[%s428_s6] ss:$0 sm:$0xff] }
   0x8   :  { %309 = vmatpush3.bf16.msra.mxu1 %v324_v5  ;;  %v111_v18 = vld [vmem:[#allocation2] sm:$0xff]  ;;  %v112_v20 = vld [vmem:[#allocation2 + $0x8] sm:$0xff] }
   0x9   :  { %310 = vmatprep.subr.bf16.mxu1 %v332_v0 }
   0xa   :  { %303 = vmatmul.mubr.msk.bf16.vlgmr.msra.gmra.mrb[0].mxu0 %vm31_vm0, %v34_v3 }
   0xc   :  { %311 = vmatpush3.bf16.msra.mxu1 %v325_v6 }
   0xd   :  { %312 = vmatprep.subr.bf16.mxu1 %v332_v0 }
  0x10   :  { %313 = vmatpush3.bf16.msra.mxu1 %v326_v7 }
  0xdd   :  { %v102_v9 = vpop.f32.mrb[0].mxu0 }
  0xde   :  { %v103_v10 = vadd.f32 %v273_v8, %v102_v9  ;;  %v304_v11 = vpop.f32.mrb[1].mxu0 }
  0xdf   :  { %v105_v12 = vpop.f32.mrb[2].mxu0 }
  0xe0   :  { %v106_v13 = vadd.f32 %v273_v8, %v105_v12  ;;  %v305_v14 = vpop.f32.mrb[3].mxu0  ;;  %v109_v15 = vmax.f32 %v103_v10, 0.0 }
  0xe2   :  { %v110_v16 = vmax.f32 %v106_v13, 0.0 }
  0xe4   :  { %v113_v17 = vpack.c.bf16 %v110_v16, %v109_v15 }
  0xe6   :  { %315 = vmatmul.mubr.msk.bf16.vlgmr.msra.gmra.mrb[0].mxu1 %vm146_vm2, %v113_v17 }
 0x1b9   :  { %v184_v19 = vpop.f32.mrb[0].mxu1 }
 0x1ba   :  { %v191_v21 = vadd.f32 %v184_v19, %v111_v18  ;;  %v316_v22 = vpop.f32.mrb[1].mxu1 }
 0x1bb   :  { %v187_v23 = vpop.f32.mrb[2].mxu1 }
 0x1bc   :  { %193 = vst.msk [vmem:[#allocation2] sm:$0xff] %vm31_vm0, %v191_v21  ;;  %v192_v24 = vadd.f32 %v187_v23, %v112_v20  ;;  %v317_v25 = vpop.f32.mrb[3].mxu1 }
 0x1be   :  { %194 = vst.msk [vmem:[#allocation2 + $0x8] sm:$0xff] %vm31_vm0, %v192_v24 }
 0x1c3   :  { %v198_v28 = vld [vmem:[#allocation2] sm:$0xff] }
 0x1c4   :  { %v207_v29 = vadd.f32 %v283_v26, %v198_v28 }
 0x1c5   :  { %v199_v31 = vld [vmem:[#allocation2 + $0x8] sm:$0xff] }
 0x1c6   :  { %v211_v32 = vadd.f32 %v209_v27, %v207_v29  ;;  %v208_v33 = vadd.f32 %v283_v26, %v199_v31 }
 0x1c8   :  { %v215_v34 = vsel %vm31_vm0, %v211_v32, 0.0  ;;  %v212_v35 = vadd.f32 %v210_v30, %v208_v33 }
 0x1c9   :  { %216 = vadd.xlane.f32.xlu0 %v215_v34 }
 0x1ca   :  { %v218_v36 = vsel %vm31_vm0, %v212_v35, 0.0 }
 0x1cd   :  { %219 = vadd.xlane.f32.xlu0 %v218_v36 }
 0x256   :  { %v217_v37 = vpop.xlane.xlu0 %216 }
 0x257   :  { %v222_v38 = vmul.f32 0.03125, %v217_v37 }
 0x259   :  { %v224_v39 = vsub.f32 %v211_v32, %v222_v38 }
 0x25a   :  { %v220_v40 = vpop.xlane.xlu0 %219 }
 0x25b   :  { %v223_v41 = vmul.f32 0.03125, %v220_v40  ;;  %v226_v42 = vmul.f32 %v224_v39, %v224_v39 }
 0x25d   :  { %v225_v43 = vsub.f32 %v212_v35, %v223_v41  ;;  %v228_v44 = vsel %vm31_vm0, %v226_v42, 0.0 }
 0x25e   :  { %229 = vadd.xlane.f32.xlu1 %v228_v44 }
 0x25f   :  { %v227_v45 = vmul.f32 %v225_v43, %v225_v43 }
 0x261   :  { %v231_v46 = vsel %vm31_vm0, %v227_v45, 0.0 }
 0x262   :  { %232 = vadd.xlane.f32.xlu1 %v231_v46 }
 0x2eb   :  { %v230_v47 = vpop.xlane.xlu1 %229 }
 0x2ec   :  { %v234_v48 = vmul.f32 0.03125, %v230_v47 }
 0x2ee   :  { %v236_v49 = vadd.f32 1e-05, %v234_v48 }
 0x2ef   :  { %v233_v50 = vpop.xlane.xlu1 %232 }
 0x2f0   :  { %328 = vrsqrt.f32 %v236_v49  ;;  %v235_v51 = vmul.f32 0.03125, %v233_v50 }
 0x2f2   :  { %v237_v52 = vadd.f32 1e-05, %v235_v51 }
 0x2f4   :  { %330 = vrsqrt.f32 %v237_v52 }
 0x2fa   :  { %v329_v53 = vpop.eup %328 }
 0x2fb   :  { %v240_v55 = vmul.f32 %v329_v53, %v224_v39 }
 0x2fd   :  { %v248_v57 = vmul.f32 %v284_v54, %v240_v55 }
 0x2fe   :  { %v331_v58 = vpop.eup %330 }
 0x2ff   :  { %v256_v59 = vadd.f32 %v285_v56, %v248_v57  ;;  %v241_v60 = vmul.f32 %v331_v58, %v225_v43 }
 0x301   :  { %v288_v61 = vpack.c.bf16 %v256_v59, %v256_v59  ;;  %v249_v62 = vmul.f32 %v284_v54, %v241_v60 }
 0x303   :  { %267 = vst.msk [vmem:[%s429_s7] sm:$0xf] %vm266_vm3, %v288_v61  ;;  %v257_v63 = vadd.f32 %v285_v56, %v249_v62 }
 0x305   :  { %v289_v0 = vpack.c.bf16 %v257_v63, %v257_v63 }
 0x307   :  { %268 = vst.msk [vmem:[%s429_s7 + $0x4] sm:$0xf] %vm266_vm3, %v289_v0 }

// kernel: decoder_forward.7
= control target key start
LH: loop header
LB: loop body
LE: loop exit
PB: predicated region body
PF: predicated region fallthrough
CT: control target
= control target key end

     0   :  { %s2231_s30 = smov 0   ;;  %s2233_s10 = smov 0   ;;  %s2598_s0 = inlined_call_operand.vmem [shape: bf16[2,8,32], index: 0, kind: input, shape index: {}]   ;;  %s2599_s1 = inlined_call_operand.vmem [shape: bf16[32,512], index: 1, kind: input, shape index: {}]   ;;  %s2600_s2 = inlined_call_operand.vmem [shape: f32[1,512], index: 2, kind: input, shape index: {}]   ;;  %s2601_s3 = inlined_call_operand.vmem [shape: bf16[32,1024], index: 3, kind: input, shape index: {}]   ;;  %s2602_s4 = inlined_call_operand.vmem [shape: f32[1,1024], index: 4, kind: input, shape index: {}]   ;;  %s2603_s5 = inlined_call_operand.vmem [shape: bf16[512,32], index: 5, kind: input, shape index: {}]   ;;  %s2604_s6 = inlined_call_operand.vmem [shape: f32[1,32], index: 6, kind: input, shape index: {}]   ;;  %s2605_s7 = inlined_call_operand.vmem [shape: f32[1,32], index: 7, kind: input, shape index: {}]   ;;  %s2606_s8 = inlined_call_operand.vmem [shape: f32[1,32], index: 8, kind: input, shape index: {}]   ;;  %s2607_s9 = inlined_call_operand.vmem [shape: bf16[2,8,32], index: 9, kind: output, shape index: {}]  }
   0x1   :  { %s2235_s11 = smov 0  }
   0x2 LB: > { %s31_s12 = sadd.s32 1, %s2171_s10  ;;  %p1801_p0 = scmp.ge.s32.totalorder %s2175_s11, 1  ;;  %s2175_s11 = sphi %s2235_s11, %s19_s11   ;;  %s2171_s10 = sphi %s2233_s10, %s2609_s10   ;;  %s2167_s30 = sphi %s2231_s30, %s2608_s30  }
   0x3   : > { %p33_p1 = scmp.ge.s32.totalorder %s31_s12, 2  ;;  %p300_p2 = scmp.lt.s32.totalorder %s2175_s11, 3 }
   0x5   : > { %s2611_s12 = smov (%p33_p1, %s31_s12), 0  ;;  %p301_p3 = pnand %p1801_p0, %p300_p2 }
   0x6   : > { %v2083_v0 = vld [vmem:[%s2599_s1 + $0x4] ss:$16 sps:$4 sm:$0xff] (!%p301_p3)   ;;  %p337_p4 = scmp.lt.s32.totalorder (!%p301_p3), %s2167_s30, 1  ;;  %v2085_v1 = vld [vmem:[%s2599_s1] ss:$16 sps:$4 sm:$0xff] (!%p301_p3)   ;;  %v2177_v2 = vmov (!%p301_p3), 0   ;;  %v365_v44 = vlaneseq (!%p301_p3) }
   0x7   : > { %304 = sbr.rel (%p301_p3) target bundleno = 1419 (0x58b), region = 56  ;;  %461 = vmatprep.mubr.bf16.mxu0 (!%p301_p3), %v2177_v2  ;;  %502 = vmatprep.mubr.bf16.mxu1 (!%p301_p3), %v2177_v2  ;;  %v2086_v3 = vld [vmem:[%s2599_s1 + $0x24] ss:$16 sps:$4 sm:$0xff] (!%p301_p3)   ;;  %v2088_v4 = vld [vmem:[%s2599_s1 + $0x20] ss:$16 sps:$4 sm:$0xff] (!%p301_p3)   ;;  %vm425_vm0 = vcmask (!%p301_p3), 261120  }
   0x8   : > { %429 = vmatprep.subr.bf16.mxu0 (!%p301_p3), %v2083_v0  ;;  %v517_v5 = vld [vmem:[%s2601_s3] sm:$0xff] (!%p301_p3)  ;;  %v2089_v10 = vld [vmem:[%s2599_s1 + $0xc] ss:$16 sps:$4 sm:$0xff] (!%p301_p3)   ;;  %v2091_v11 = vld [vmem:[%s2599_s1 + $0x8] ss:$16 sps:$4 sm:$0xff] (!%p301_p3)   ;;  %v2178_v35 = vmov (!%p301_p3), 0.0  }
   0x9   : > { %430 = vmatpush1.bf16.msra.mxu0 (!%p301_p3), %v2085_v1  ;;  %v521_v6 = vld [vmem:[%s2601_s3 + $0x20] sm:$0xff] (!%p301_p3)  ;;  %470 = vmatprep.subr.bf16.mxu1 (!%p301_p3), %v2089_v10  ;;  %v2092_v12 = vld [vmem:[%s2599_s1 + $0x2c] ss:$16 sps:$4 sm:$0xff] (!%p301_p3)   ;;  %v2094_v18 = vld [vmem:[%s2599_s1 + $0x28] ss:$16 sps:$4 sm:$0xff] (!%p301_p3)   ;;  %vm2179_vm1 = vmmov (!%p301_p3), 0  }
   0xa   : > { %v525_v7 = vld [vmem:[%s2601_s3 + $0x40] sm:$0xff] (!%p301_p3)  ;;  %431 = vmatprep.subr.bf16.mxu0 (!%p301_p3), %v2086_v3  ;;  %v1815_v9 = vcombine.high (!%p301_p3), %v517_v5, %v521_v6  ;;  %v1814_v14 = vcombine.low (!%p301_p3), %v517_v5, %v521_v6  ;;  %471 = vmatpush1.bf16.msra.mxu1 (!%p301_p3), %v2091_v11  ;;  %v518_v15 = vld [vmem:[%s2601_s3 + $0x8] sm:$0xff] (!%p301_p3)  ;;  %v519_v22 = vld [vmem:[%s2601_s3 + $0x10] sm:$0xff] (!%p301_p3)  ;;  %v2346_v45 = vshrl.u32 (!%p301_p3), %v365_v44, 7  ;;  %vm897_vm2 = vcmask (!%p301_p3), 1043456  }
   0xb   : > { %v529_v8 = vld [vmem:[%s2601_s3 + $0x60] sm:$0xff] (!%p301_p3)  ;;  %v522_v16 = vld [vmem:[%s2601_s3 + $0x28] sm:$0xff] (!%p301_p3)  ;;  %472 = vmatprep.subr.bf16.mxu1 (!%p301_p3), %v2092_v12  ;;  %v523_v23 = vld [vmem:[%s2601_s3 + $0x30] sm:$0xff] (!%p301_p3)  ;;  %vm877_vm4 = vcmask (!%p301_p3), 64512   ;;  %vm1722_vm5 = vcmask (!%p301_p3), 257024  }
   0xc   : > { %v1823_v17 = vcombine.high (!%p301_p3), %v525_v7, %v529_v8  ;;  %v526_v19 = vld [vmem:[%s2601_s3 + $0x48] sm:$0xff] (!%p301_p3)  ;;  %v1817_v21 = vcombine.high (!%p301_p3), %v518_v15, %v522_v16  ;;  %v1822_v24 = vcombine.low (!%p301_p3), %v525_v7, %v529_v8  ;;  %v1816_v25 = vcombine.low (!%p301_p3), %v518_v15, %v522_v16  ;;  %v527_v31 = vld [vmem:[%s2601_s3 + $0x50] sm:$0xff] (!%p301_p3)  ;;  %v520_v36 = vld [vmem:[%s2601_s3 + $0x18] sm:$0xff] (!%p301_p3) }
   0xd   : > { %432 = vmatpush1.bf16.msra.mxu0 (!%p301_p3), %v2088_v4  ;;  %v530_v20 = vld [vmem:[%s2601_s3 + $0x68] sm:$0xff] (!%p301_p3)  ;;  %v1819_v28 = vcombine.high (!%p301_p3), %v519_v22, %v523_v23  ;;  %v1818_v29 = vcombine.low (!%p301_p3), %v519_v22, %v523_v23  ;;  %v531_v32 = vld [vmem:[%s2601_s3 + $0x70] sm:$0xff] (!%p301_p3)  ;;  %v524_v37 = vld [vmem:[%s2601_s3 + $0x38] sm:$0xff] (!%p301_p3)  ;;  %v367_v50 = vsub.s32 (!%p301_p3), 0, %v2346_v45  ;;  %v371_v59 = vsub.s32 (!%p301_p3), 1, %v2346_v45 }
   0xe   : > { %s2613_s30 = smov (!%p337_p4, %s2167_s30), 1  ;;  %657 = vmatprep.subr.bf16.mxu0 %v1815_v9  ;;  %473 = vmatpush1.bf16.msra.mxu1 %v2094_v18  ;;  %v1825_v27 = vcombine.high %v526_v19, %v530_v20  ;;  %v1824_v30 = vcombine.low %v526_v19, %v530_v20  ;;  %v1827_v33 = vcombine.high %v527_v31, %v531_v32  ;;  %v528_v38 = vld [vmem:[%s2601_s3 + $0x58] sm:$0xff]  ;;  %v2351_v49 = vld [vmem:[%s2602_s4] sm:$0xff]  ;;  %v375_v3 = vsub.s32 2, %v2346_v45 }
   0xf   : > { %s1802_s29 = sshll.u32 %s2613_s30, 2  ;;  %698 = vmatprep.subr.bf16.mxu1 %v1817_v21  ;;  %v1826_v34 = vcombine.low %v527_v31, %v531_v32  ;;  %v1820_v39 = vcombine.low %v520_v36, %v524_v37  ;;  %v1821_v40 = vcombine.high %v520_v36, %v524_v37  ;;  %v532_v41 = vld [vmem:[%s2601_s3 + $0x78] sm:$0xff]  ;;  %v537_v52 = vrot.slane %v2351_v49, %v367_v50  ;;  %v363_v55 = vld [vmem:[%s2600_s2] sm:$0xf] }
  0x10   : > { %s340_s17 = scalar_lea.vmem %s2598_s0, %s1802_s29  ;;  %v1829_v42 = vcombine.high %v528_v38, %v532_v41  ;;  %v1828_v43 = vcombine.low %v528_v38, %v532_v41  ;;  %v368_v62 = vrot.slane %v363_v55, %v367_v50  ;;  %v541_v1 = vrot.slane %v2351_v49, %v371_v59  ;;  %s347_s28 = scalar_lea.vmem %s2607_s9, %s1802_s29 }
  0x11   : > { %v2290_v13 = vld [vmem:[%s340_s17] sm:$0xf]  ;;  %v545_v10 = vrot.slane %v2351_v49, %v375_v3  ;;  %v372_v12 = vrot.slane %v363_v55, %v371_v59  ;;  %v379_v15 = vsub.s32 3, %v2346_v45  ;;  %v376_v18 = vrot.slane %v363_v55, %v375_v3 }
  0x12   : > { %1812 = vmatmul.mubr.msk.bf16.vlgmr.msra.gmra.mrb[0].mxu0 %vm425_vm0, %v2290_v13  ;;  %v516_v26 = vld [vmem:[%s340_s17] sm:$0xf]  ;;  %1813 = vmatmul.mubr.msk.bf16.vlgmr.msra.gmra.mrb[0].mxu1 %vm425_vm0, %v2290_v13 }
  0x13   : > { %658 = vmatpush1.bf16.msra.mxu0 %v1814_v14  ;;  %689 = vmatprep.mubr.bf16.mxu0 %v2177_v2  ;;  %v549_v20 = vrot.slane %v2351_v49, %v379_v15 }
  0x14   : > { %659 = vmatprep.subr.bf16.mxu0 %v1823_v17  ;;  %699 = vmatpush1.bf16.msra.mxu1 %v1816_v25 }
  0x15   : > { %730 = vmatprep.mubr.bf16.mxu1 %v2177_v2  ;;  %700 = vmatprep.subr.bf16.mxu1 %v1825_v27 }
  0x17   : > { %660 = vmatpush1.bf16.msra.mxu0 %v1822_v24 }
  0x18   : > { %739 = vmatprep.subr.bf16.mxu0 %v1819_v28  ;;  %701 = vmatpush1.bf16.msra.mxu1 %v1824_v30 }
  0x19   : > { %780 = vmatprep.subr.bf16.mxu1 %v1821_v40  ;;  %v2180_v40 = vmov -1e+09  }
  0x1a   : > { %1830 = vmatmul.mubr.msk.bf16.vlgmr.msra.gmra.mrb[4].mxu0 %vm425_vm0, %v516_v26 }
  0x1b   : > { %740 = vmatpush1.bf16.msra.mxu0 %v1818_v29  ;;  %771 = vmatprep.mubr.bf16.mxu0 %v2177_v2  ;;  %v552_v29 = vsub.s32 4, %v2346_v45 }
  0x1c   : > { %1831 = vmatmul.mubr.msk.bf16.vlgmr.msra.gmra.mrb[4].mxu1 %vm425_vm0, %v516_v26  ;;  %741 = vmatprep.subr.bf16.mxu0 %v1827_v33 }
  0x1d   : > { %812 = vmatprep.mubr.bf16.mxu1 %v2177_v2  ;;  %781 = vmatpush1.bf16.msra.mxu1 %v1820_v39  ;;  %v553_v30 = vrot.slane %v2351_v49, %v552_v29  ;;  %v834_v39 = vand.u32 127, %v365_v44 }
  0x1e   : > { %782 = vmatprep.subr.bf16.mxu1 %v1829_v42 }
  0x1f   : > { %742 = vmatpush1.bf16.msra.mxu0 %v1826_v34  ;;  %vm835_vm3 = vcmp.le.s32.totalorder %v834_v39, %v2346_v45 }
  0x20   : > { %1927 = vmatprep.subr.bf16.mxu0 %v2178_v35  ;;  %v836_v41 = vsel %vm835_vm3, 0.0, %v2180_v40 }
  0x21   : > { %783 = vmatpush1.bf16.msra.mxu1 %v1828_v43 }
  0x22   : > { %1832 = vmatmul.mubr.msk.bf16.vlgmr.msra.gmra.mrb[8].mxu0 %vm425_vm0, %v516_v26  ;;  %1933 = vmatprep.subr.bf16.mxu1 %v2178_v35 }
  0x23   : > { %1929 = vmatprep.mubr.msk.bf16.mxu0 %vm2179_vm1, %v2178_v35 }
  0x24   : > { %1833 = vmatmul.mubr.msk.bf16.vlgmr.msra.gmra.mrb[8].mxu1 %vm425_vm0, %v516_v26  ;;  %v380_v26 = vrot.slane %v363_v55, %v379_v15 }
  0x25   : > { %1935 = vmatprep.mubr.msk.bf16.mxu1 %vm2179_vm1, %v2178_v35 }
  0xe5   : > { %v463_v46 = vpop.f32.mrb[0].mxu0  ;;  %v504_v53 = vpop.f32.mrb[0].mxu1 }
  0xe6   : > { %v465_v47 = vpop.f32.mrb[1].mxu0  ;;  %v506_v54 = vpop.f32.mrb[1].mxu1  ;;  %v464_v5 = vadd.f32 %v463_v46, %v368_v62  ;;  %v505_v22 = vadd.f32 %v504_v53, %v376_v18 }
  0xe7   : > { %v467_v48 = vpop.f32.mrb[2].mxu0  ;;  %v508_v56 = vpop.f32.mrb[2].mxu1  ;;  %v466_v17 = vadd.f32 %v465_v47, %v372_v12  ;;  %v507_v27 = vadd.f32 %v506_v54, %v380_v26 }
  0xe8   : > { %v468_v51 = vpop.f32.mrb[3].mxu0  ;;  %v509_v58 = vpop.f32.mrb[3].mxu1  ;;  %v511_v11 = vpack.c.bf16 %v464_v5, %v464_v5  ;;  %v513_v24 = vpack.c.bf16 %v505_v22, %v505_v22 }
  0xe9   : > { %v512_v21 = vpack.c.bf16 %v466_v17, %v466_v17  ;;  %v514_v28 = vpack.c.bf16 %v507_v27, %v507_v27  ;;  %v560_v17 = vsub.s32 6, %v2346_v45 }
  0xed   : > { %v691_v57 = vpop.f32.mrb[4].mxu0 }
  0xee   : > { %v692_v60 = vadd.f32 %v691_v57, %v537_v52  ;;  %v693_v61 = vpop.f32.mrb[5].mxu0 }
  0xef   : > { %v695_v63 = vpop.f32.mrb[6].mxu0  ;;  %v732_v4 = vpop.f32.mrb[4].mxu1  ;;  %v694_v7 = vadd.f32 %v693_v61, %v541_v1 }
  0xf0   : > { %v821_v0 = vpack.c.bf16 %v692_v60, %v692_v60  ;;  %v696_v2 = vpop.f32.mrb[7].mxu0  ;;  %v734_v6 = vpop.f32.mrb[5].mxu1  ;;  %v733_v16 = vadd.f32 %v732_v4, %v545_v10 }
  0xf1   : > { %v736_v8 = vpop.f32.mrb[6].mxu1  ;;  %v822_v14 = vpack.c.bf16 %v694_v7, %v694_v7  ;;  %v735_v23 = vadd.f32 %v734_v6, %v549_v20 }
  0xf2   : > { %1928 = vmatpush3.bf16.xpose.msra.mxu0 %v821_v0  ;;  %v737_v9 = vpop.f32.mrb[7].mxu1  ;;  %v823_v19 = vpack.c.bf16 %v733_v16, %v733_v16 }
  0xf3   : > { %1939 = vmatprep.subr.bf16.mxu0 %v2178_v35  ;;  %v824_v25 = vpack.c.bf16 %v735_v23, %v735_v23 }
  0xf5   : > { %v773_v31 = vpop.f32.mrb[8].mxu0 }
  0xf6   : > { %v774_v32 = vadd.f32 %v773_v31, %v553_v30  ;;  %v775_v33 = vpop.f32.mrb[9].mxu0  ;;  %v564_v30 = vsub.s32 7, %v2346_v45 }
  0xf7   : > { %v777_v34 = vpop.f32.mrb[10].mxu0  ;;  %v814_v4 = vpop.f32.mrb[8].mxu1 }
  0xf8   : > { %v825_v36 = vpack.c.bf16 %v774_v32, %v774_v32  ;;  %v778_v37 = vpop.f32.mrb[11].mxu0  ;;  %v816_v5 = vpop.f32.mrb[9].mxu1  ;;  %v565_v34 = vrot.slane %v2351_v49, %v564_v30 }
  0xf9   : > { %1930 = vmatmul.mubr.bf16.vlgmr.msra.gmra.mrb[12].mxu0 %v511_v11  ;;  %v818_v6 = vpop.f32.mrb[10].mxu1  ;;  %v556_v11 = vsub.s32 5, %v2346_v45 }
  0xfa   : > { %1940 = vmatpush3.bf16.xpose.msra.mxu0 %v822_v14  ;;  %1941 = vmatprep.mubr.msk.bf16.mxu0 %vm2179_vm1, %v2178_v35  ;;  %v899_v38 = vsel %vm897_vm2, %v825_v36, 0  ;;  %v819_v7 = vpop.f32.mrb[11].mxu1 }
  0xfb   : > { %1951 = vmatprep.subr.bf16.mxu0 %v2178_v35  ;;  %1934 = vmatpush3.bf16.msra.mxu1 %v899_v38  ;;  %v557_v15 = vrot.slane %v2351_v49, %v556_v11 }
  0xfc   : > { %1945 = vmatprep.subr.bf16.mxu1 %v2178_v35 }
 0x101   : > { %1942 = vmatmul.mubr.bf16.vlgmr.msra.gmra.mrb[16].mxu0 %v512_v21  ;;  %v561_v21 = vrot.slane %v2351_v49, %v560_v17 }
 0x102   : > { %1952 = vmatpush3.bf16.xpose.msra.mxu0 %v823_v19  ;;  %1953 = vmatprep.mubr.msk.bf16.mxu0 %vm2179_vm1, %v2178_v35  ;;  %v776_v19 = vadd.f32 %v775_v33, %v557_v15 }
 0x103   : > { %1963 = vmatprep.subr.bf16.mxu0 %v2178_v35  ;;  %v815_v26 = vadd.f32 %v814_v4, %v561_v21  ;;  %v2111_v4 = vld [vmem:[%s2603_s5 + $0x78] sm:$0xff]  }
 0x104   : > { %v826_v23 = vpack.c.bf16 %v776_v19, %v776_v19 }
 0x105   : > { %v827_v33 = vpack.c.bf16 %v815_v26, %v815_v26 }
 0x106   : > { %v1002_v31 = vsel %vm897_vm2, %v826_v23, 0 }
 0x107   : > { %v1105_v38 = vsel %vm897_vm2, %v827_v33, 0  ;;  %v2110_v33 = vld [vmem:[%s2603_s5 + $0xc0] sm:$0xff]  }
 0x109   : > { %1954 = vmatmul.mubr.bf16.vlgmr.msra.gmra.mrb[20].mxu0 %v513_v24 }
 0x10a   : > { %1964 = vmatpush3.bf16.xpose.msra.mxu0 %v824_v25  ;;  %1965 = vmatprep.mubr.msk.bf16.mxu0 %vm2179_vm1, %v2178_v35 }
 0x10b   : > { %1975 = vmatprep.subr.bf16.mxu0 %v2178_v35 }
 0x111   : > { %1966 = vmatmul.mubr.bf16.vlgmr.msra.gmra.mrb[24].mxu0 %v514_v28 }
 0x112   : > { %1991 = vmatprep.mubr.msk.bf16.mxu0 %vm2179_vm1, %v2178_v35 }
 0x1cc   : > { %v871_v42 = vpop.f32.mrb[12].mxu0 }
 0x1cd   : > { %v872_v43 = vadd.f32 %v871_v42, %v836_v41  ;;  %v1931_v46 = vpop.f32.mrb[13].mxu0  ;;  %v817_v42 = vadd.f32 %v816_v5, %v565_v34 }
 0x1ce   : > { %v874_v47 = vpop.f32.mrb[14].mxu0 }
 0x1cf   : > { %v1932_v48 = vpop.f32.mrb[15].mxu0  ;;  %v878_v50 = vsel %vm877_vm4, %v872_v43, -inf  ;;  %v828_v49 = vpack.c.bf16 %v817_v42, %v817_v42 }
 0x1d0   : > { %879 = vmax.xlane.f32.xlu0 %v878_v50 }
 0x1d1   : > { %v1208_v47 = vsel %vm897_vm2, %v828_v49, 0 }
 0x1d4   : > { %v976_v51 = vpop.f32.mrb[16].mxu0 }
 0x1d5   : > { %v977_v52 = vadd.f32 %v976_v51, %v836_v41  ;;  %v1943_v53 = vpop.f32.mrb[17].mxu0 }
 0x1d6   : > { %v979_v54 = vpop.f32.mrb[18].mxu0 }
 0x1d7   : > { %v1944_v55 = vpop.f32.mrb[19].mxu0  ;;  %v982_v44 = vsel %vm877_vm4, %v977_v52, -inf  ;;  %v2095_v54 = vld [vmem:[%s2603_s5] sm:$0xff]  }
 0x1d8   : > { %983 = vmax.xlane.f32.xlu0 %v982_v44  ;;  %v2097_v55 = vld [vmem:[%s2603_s5 + $0x40] sm:$0xff]   ;;  %v2096_v44 = vld [vmem:[%s2603_s5 + $0x8] sm:$0xff]  }
 0x1d9   : > { %1976 = vmatpush3.bf16.msra.mxu0 %v2097_v55 }
 0x1da   : > { %1977 = vmatprep.subr.bf16.mxu0 %v2178_v35 }
 0x1dc   : > { %v1079_v56 = vpop.f32.mrb[20].mxu0 }
 0x1dd   : > { %v1080_v57 = vadd.f32 %v1079_v56, %v836_v41  ;;  %v1955_v58 = vpop.f32.mrb[21].mxu0  ;;  %v2099_v56 = vld [vmem:[%s2603_s5 + $0x48] sm:$0xff]  }
 0x1de   : > { %v1082_v59 = vpop.f32.mrb[22].mxu0  ;;  %1978 = vmatpush3.bf16.msra.mxu0 %v2099_v56  ;;  %v2101_v58 = vld [vmem:[%s2603_s5 + $0x50] sm:$0xff]  }
 0x1df   : > { %v1956_v60 = vpop.f32.mrb[23].mxu0  ;;  %v1085_v61 = vsel %vm877_vm4, %v1080_v57, -inf  ;;  %1979 = vmatprep.subr.bf16.mxu0 %v2178_v35  ;;  %v2100_v59 = vld [vmem:[%s2603_s5 + $0x18] sm:$0xff]  }
 0x1e0   : > { %1086 = vmax.xlane.f32.xlu1 %v1085_v61  ;;  %v2103_v60 = vld [vmem:[%s2603_s5 + $0x58] sm:$0xff]   ;;  %v2102_v61 = vld [vmem:[%s2603_s5 + $0x20] sm:$0xff]  }
 0x1e2   : > { %1980 = vmatpush3.bf16.msra.mxu0 %v2101_v58 }
 0x1e3   : > { %1981 = vmatprep.subr.bf16.mxu0 %v2178_v35 }
 0x1e4   : > { %v1182_v62 = vpop.f32.mrb[24].mxu0 }
 0x1e5   : > { %v1183_v63 = vadd.f32 %v1182_v62, %v836_v41  ;;  %v1967_v0 = vpop.f32.mrb[25].mxu0  ;;  %v2105_v62 = vld [vmem:[%s2603_s5 + $0x60] sm:$0xff]  }
 0x1e6   : > { %v1185_v1 = vpop.f32.mrb[26].mxu0  ;;  %1982 = vmatpush3.bf16.msra.mxu0 %v2103_v60  ;;  %v2106_v0 = vld [vmem:[%s2603_s5 + $0x30] sm:$0xff]  }
 0x1e7   : > { %v1968_v2 = vpop.f32.mrb[27].mxu0  ;;  %v1188_v3 = vsel %vm877_vm4, %v1183_v63, -inf  ;;  %1983 = vmatprep.subr.bf16.mxu0 %v2178_v35  ;;  %v2107_v1 = vld [vmem:[%s2603_s5 + $0x68] sm:$0xff]   ;;  %v2117_v60 = vld [vmem:[%s2603_s5 + $0x90] sm:$0xff]  }
 0x1e8   : > { %1189 = vmax.xlane.f32.xlu1 %v1188_v3  ;;  %v2108_v2 = vld [vmem:[%s2603_s5 + $0x38] sm:$0xff]   ;;  %v2109_v3 = vld [vmem:[%s2603_s5 + $0x70] sm:$0xff]  }
 0x1ea   : > { %1984 = vmatpush3.bf16.msra.mxu0 %v2105_v62 }
 0x1eb   : > { %1985 = vmatprep.subr.bf16.mxu0 %v2178_v35 }
 0x1ee   : > { %1986 = vmatpush3.bf16.msra.mxu0 %v2107_v1 }
 0x1ef   : > { %1987 = vmatprep.subr.bf16.mxu0 %v2178_v35 }
 0x1f2   : > { %1988 = vmatpush3.bf16.msra.mxu0 %v2109_v3 }
 0x1f3   : > { %1989 = vmatprep.subr.bf16.mxu0 %v2178_v35 }
 0x1f6   : > { %1990 = vmatpush3.bf16.msra.mxu0 %v2111_v4 }
 0x1f7   : > { %2015 = vmatprep.subr.bf16.mxu0 %v2178_v35 }
 0x25d   : > { %v2386_v8 = vpop.xlane.xlu0 %879 }
 0x25e   : > { %v881_v9 = vmax.f32 %v2386_v8, -1e+30 }
 0x260   : > { %v885_v10 = vsub.f32 %v872_v43, %v881_v9  ;;  %v882_v5 = vsub.f32 -1e+30, %v881_v9 }
 0x262   : > { %v886_v12 = vmul.f32 1.442695, %v885_v10  ;;  %v883_v6 = vmul.f32 1.442695, %v882_v5 }
 0x264   : > { %2127 = vpow2.f32 %v886_v12 }
 0x265   : > { %v2392_v14 = vpop.xlane.xlu0 %983 }
 0x266   : > { %v985_v16 = vmax.f32 %v2392_v14, -1e+30 }
 0x268   : > { %v989_v18 = vsub.f32 %v977_v52, %v985_v16  ;;  %v986_v7 = vsub.f32 -1e+30, %v985_v16 }
 0x26a   : > { %v990_v20 = vmul.f32 1.442695, %v989_v18  ;;  %v987_v10 = vmul.f32 1.442695, %v986_v7  ;;  %v2121_v7 = vld [vmem:[%s2603_s5 + $0xa0] sm:$0xff]  }
 0x26c   : > { %2129 = vpow2.f32 %v990_v20 }
 0x26d   : > { %v2400_v22 = vpop.xlane.xlu1 %1086 }
 0x26e   : > { %v1088_v24 = vmax.f32 %v2400_v22, -1e+30  ;;  %v2128_v25 = vpop.eup %2127 }
 0x26f   : > { %v889_v28 = vsel %vm877_vm4, %v2128_v25, 0.0  ;;  %v893_v29 = vpack.c.bf16 %v2128_v25, %v2128_v25 }
 0x270   : > { %v1092_v27 = vsub.f32 %v1080_v57, %v1088_v24  ;;  %890 = vadd.xlane.f32.xlu1 %v889_v28  ;;  %v2098_v57 = vld [vmem:[%s2603_s5 + $0x10] sm:$0xff]   ;;  %v1089_v11 = vsub.f32 -1e+30, %v1088_v24 }
 0x271   : > { %1936 = vmatmul.mubr.msk.bf16.vlgmr.msra.gmra.mrb[12].mxu1 %vm877_vm4, %v893_v29 }
 0x272   : > { %v1093_v32 = vmul.f32 1.442695, %v1092_v27  ;;  %1946 = vmatpush3.bf16.msra.mxu1 %v1002_v31  ;;  %1947 = vmatprep.mubr.msk.bf16.mxu1 %vm2179_vm1, %v2178_v35  ;;  %v1090_v15 = vmul.f32 1.442695, %v1089_v11  ;;  %v2123_v11 = vld [vmem:[%s2603_s5 + $0xa8] sm:$0xff]  }
 0x273   : > { %1957 = vmatprep.subr.bf16.mxu1 %v2178_v35 }
 0x274   : > { %2131 = vpow2.f32 %v1093_v32 }
 0x275   : > { %v2413_v36 = vpop.xlane.xlu1 %1189 }
 0x276   : > { %v1191_v45 = vmax.f32 %v2413_v36, -1e+30  ;;  %v2130_v37 = vpop.eup %2129 }
 0x277   : > { %v993_v40 = vsel %vm877_vm4, %v2130_v37, 0.0  ;;  %v997_v41 = vpack.c.bf16 %v2130_v37, %v2130_v37  ;;  %v2112_v37 = vld [vmem:[%s2603_s5 + $0xc8] sm:$0xff]  }
 0x278   : > { %v1195_v39 = vsub.f32 %v1183_v63, %v1191_v45  ;;  %994 = vadd.xlane.f32.xlu0 %v993_v40  ;;  %v2104_v63 = vld [vmem:[%s2603_s5 + $0x28] sm:$0xff]   ;;  %v1192_v8 = vsub.f32 -1e+30, %v1191_v45 }
 0x279   : > { %1948 = vmatmul.mubr.msk.bf16.vlgmr.msra.gmra.mrb[16].mxu1 %vm877_vm4, %v997_v41 }
 0x27a   : > { %v1196_v43 = vmul.f32 1.442695, %v1195_v39  ;;  %1958 = vmatpush3.bf16.msra.mxu1 %v1105_v38  ;;  %1959 = vmatprep.mubr.msk.bf16.mxu1 %vm2179_vm1, %v2178_v35  ;;  %v1193_v20 = vmul.f32 1.442695, %v1192_v8 }
 0x27b   : > { %1969 = vmatprep.subr.bf16.mxu1 %v2178_v35 }
 0x27c   : > { %2133 = vpow2.f32 %v1196_v43 }
 0x27d   : > { %2135 = vpow2.f32 %v883_v6 }
 0x27e   : > { %v2132_v46 = vpop.eup %2131  ;;  %2137 = vpow2.f32 %v987_v10  ;;  %v2122_v10 = vld [vmem:[%s2603_s5 + $0xf0] sm:$0xff]  }
 0x27f   : > { %v1096_v48 = vsel %vm877_vm4, %v2132_v46, 0.0  ;;  %v1100_v50 = vpack.c.bf16 %v2132_v46, %v2132_v46  ;;  %2139 = vpow2.f32 %v1090_v15  ;;  %v2125_v15 = vld [vmem:[%s2603_s5 + $0xb0] sm:$0xff]  }
 0x280   : > { %1097 = vadd.xlane.f32.xlu0 %v1096_v48  ;;  %v2113_v48 = vld [vmem:[%s2603_s5 + $0x80] sm:$0xff]  }
 0x281   : > { %1960 = vmatmul.mubr.msk.bf16.vlgmr.msra.gmra.mrb[20].mxu1 %vm877_vm4, %v1100_v50  ;;  %v2114_v50 = vld [vmem:[%s2603_s5 + $0xd0] sm:$0xff]  }
 0x282   : > { %1970 = vmatpush3.bf16.msra.mxu1 %v1208_v47  ;;  %1971 = vmatprep.mubr.msk.bf16.mxu1 %vm2179_vm1, %v2178_v35 }
 0x283   : > { %1995 = vmatprep.subr.bf16.mxu1 %v2178_v35 }
 0x286   : > { %v2134_v51 = vpop.eup %2133 }
 0x287   : > { %v1199_v52 = vsel %vm877_vm4, %v2134_v51, 0.0  ;;  %v1203_v53 = vpack.c.bf16 %v2134_v51, %v2134_v51  ;;  %v2136_v12 = vpop.eup %2135 }
 0x288   : > { %1200 = vadd.xlane.f32.xlu1 %v1199_v52  ;;  %v888_v18 = vmul.f32 0.0, %v2136_v12  ;;  %v2138_v9 = vpop.eup %2137  ;;  %v2124_v12 = vld [vmem:[%s2603_s5 + $0xf8] sm:$0xff]  }
 0x289   : > { %1972 = vmatmul.mubr.msk.bf16.vlgmr.msra.gmra.mrb[24].mxu1 %vm877_vm4, %v1203_v53  ;;  %v992_v14 = vmul.f32 0.0, %v2138_v9  ;;  %v2140_v23 = vpop.eup %2139  ;;  %v2115_v53 = vld [vmem:[%s2603_s5 + $0x88] sm:$0xff]  }
 0x28a   : > { %2011 = vmatprep.mubr.msk.bf16.mxu1 %vm2179_vm1, %v2178_v35  ;;  %1996 = vmatpush3.bf16.msra.mxu1 %v2095_v54  ;;  %v1095_v28 = vmul.f32 0.0, %v2140_v23  ;;  %v2116_v54 = vld [vmem:[%s2603_s5 + $0xd8] sm:$0xff]  }
 0x28b   : > { %1997 = vmatprep.subr.bf16.mxu1 %v2178_v35 }
 0x28e   : > { %1998 = vmatpush3.bf16.msra.mxu1 %v2096_v44 }
 0x28f   : > { %1999 = vmatprep.subr.bf16.mxu1 %v2178_v35 }
 0x292   : > { %2000 = vmatpush3.bf16.msra.mxu1 %v2098_v57 }
 0x293   : > { %2001 = vmatprep.subr.bf16.mxu1 %v2178_v35 }
 0x296   : > { %2002 = vmatpush3.bf16.msra.mxu1 %v2100_v59 }
 0x297   : > { %2003 = vmatprep.subr.bf16.mxu1 %v2178_v35 }
 0x29a   : > { %2004 = vmatpush3.bf16.msra.mxu1 %v2102_v61  ;;  %v2118_v61 = vld [vmem:[%s2603_s5 + $0xe0] sm:$0xff]  }
 0x29b   : > { %2005 = vmatprep.subr.bf16.mxu1 %v2178_v35 }
 0x29e   : > { %2006 = vmatpush3.bf16.msra.mxu1 %v2104_v63  ;;  %v2119_v63 = vld [vmem:[%s2603_s5 + $0x98] sm:$0xff]  }
 0x29f   : > { %2007 = vmatprep.subr.bf16.mxu1 %v2178_v35 }
 0x2a2   : > { %2008 = vmatpush3.bf16.msra.mxu1 %v2106_v0  ;;  %v2120_v0 = vld [vmem:[%s2603_s5 + $0xe8] sm:$0xff]  }
 0x2a3   : > { %2009 = vmatprep.subr.bf16.mxu1 %v2178_v35 }
 0x2a6   : > { %2010 = vmatpush3.bf16.msra.mxu1 %v2108_v2 }
 0x2a7   : > { %2035 = vmatprep.subr.bf16.mxu1 %v2178_v35 }
 0x2fd   : > { %v891_v17 = vpop.xlane.xlu1 %890 }
 0x2fe   : > { %v892_v19 = vadd.f32 %v891_v17, %v888_v18 }
 0x300   : > { %2141 = vrcp.f32 %v892_v19 }
 0x301   : > { %2143 = vpow2.f32 %v1193_v20 }
 0x305   : > { %v995_v21 = vpop.xlane.xlu0 %994 }
 0x306   : > { %v996_v16 = vadd.f32 %v995_v21, %v992_v14 }
 0x308   : > { %2145 = vrcp.f32 %v996_v16 }
 0x30a   : > { %v2142_v27 = vpop.eup %2141 }
 0x30b   : > { %v2144_v36 = vpop.eup %2143 }
 0x30c   : > { %v1198_v42 = vmul.f32 0.0, %v2144_v36  ;;  %v1689_v36 = vunpack.c.l.bf16 %v2290_v13  ;;  %v1871_v13 = vld [vmem:[%s2605_s7] ss:$0 sm:$0xff] }
 0x30d   : > { %v1098_v24 = vpop.xlane.xlu0 %1097 }
 0x30e   : > { %v1099_v32 = vadd.f32 %v1098_v24, %v1095_v28 }
 0x310   : > { %2147 = vrcp.f32 %v1099_v32  ;;  %v1870_v32 = vld [vmem:[%s2604_s6] ss:$0 sm:$0xff] }
 0x312   : > { %v2146_v41 = vpop.eup %2145 }
 0x315   : > { %v1201_v38 = vpop.xlane.xlu1 %1200 }
 0x316   : > { %v1202_v47 = vadd.f32 %v1201_v38, %v1198_v42 }
 0x318   : > { %2149 = vrcp.f32 %v1202_v47 }
 0x31a   : > { %v2148_v56 = vpop.eup %2147 }
 0x322   : > { %v2150_v3 = vpop.eup %2149 }
 0x344   : > { %v935_v22 = vpop.f32.mrb[12].mxu1 }
 0x345   : > { %v941_v25 = vadd.f32 %v935_v22, %v888_v18  ;;  %v1937_v26 = vpop.f32.mrb[13].mxu1  ;;  %v2126_v18 = vld [vmem:[%s2603_s5 + $0xb8] sm:$0xff]  }
 0x346   : > { %v938_v29 = vpop.f32.mrb[14].mxu1 }
 0x347   : > { %v1252_v30 = vmul.f32 %v2142_v27, %v941_v25  ;;  %v1938_v31 = vpop.f32.mrb[15].mxu1 }
 0x349   : > { %v1253_v34 = vpack.c.bf16 %v1252_v30, %v1252_v30 }
 0x34b   : > { %2012 = vmatmul.mubr.bf16.vlgmr.msra.gmra.mrb[28].mxu1 %v1253_v34 }
 0x34c   : > { %2036 = vmatpush3.bf16.msra.mxu1 %v2110_v33  ;;  %v1038_v45 = vpop.f32.mrb[16].mxu1  ;;  %2051 = vmatprep.mubr.msk.bf16.mxu1 %vm2179_vm1, %v2178_v35 }
 0x34d   : > { %v1044_v39 = vadd.f32 %v1038_v45, %v992_v14  ;;  %v1949_v40 = vpop.f32.mrb[17].mxu1  ;;  %2037 = vmatprep.subr.bf16.mxu1 %v2178_v35 }
 0x34e   : > { %v1041_v43 = vpop.f32.mrb[18].mxu1 }
 0x34f   : > { %v1271_v49 = vmul.f32 %v2146_v41, %v1044_v39  ;;  %v1950_v46 = vpop.f32.mrb[19].mxu1 }
 0x350   : > { %2038 = vmatpush3.bf16.msra.mxu1 %v2112_v37 }
 0x351   : > { %v1272_v51 = vpack.c.bf16 %v1271_v49, %v1271_v49  ;;  %2039 = vmatprep.subr.bf16.mxu1 %v2178_v35 }
 0x353   : > { %1992 = vmatmul.mubr.bf16.vlgmr.msra.gmra.mrb[28].mxu0 %v1272_v51  ;;  %v1872_v51 = vld [vmem:[%s2606_s8] ss:$0 sm:$0xff] }
 0x354   : > { %2016 = vmatpush3.bf16.msra.mxu0 %v2113_v48  ;;  %2040 = vmatpush3.bf16.msra.mxu1 %v2114_v50  ;;  %v1141_v52 = vpop.f32.mrb[20].mxu1 }
 0x355   : > { %v1147_v55 = vadd.f32 %v1141_v52, %v1095_v28  ;;  %v1961_v44 = vpop.f32.mrb[21].mxu1  ;;  %2017 = vmatprep.subr.bf16.mxu0 %v2178_v35  ;;  %2041 = vmatprep.subr.bf16.mxu1 %v2178_v35 }
 0x356   : > { %v1144_v57 = vpop.f32.mrb[22].mxu1  ;;  %2031 = vmatprep.mubr.msk.bf16.mxu0 %vm2179_vm1, %v2178_v35 }
 0x357   : > { %v1466_v58 = vmul.f32 %v2148_v56, %v1147_v55  ;;  %v1962_v59 = vpop.f32.mrb[23].mxu1 }
 0x358   : > { %2018 = vmatpush3.bf16.msra.mxu0 %v2115_v53  ;;  %2042 = vmatpush3.bf16.msra.mxu1 %v2116_v54 }
 0x359   : > { %2019 = vmatprep.subr.bf16.mxu0 %v2178_v35  ;;  %2043 = vmatprep.subr.bf16.mxu1 %v2178_v35  ;;  %v1467_v19 = vpack.c.bf16 %v1466_v58, %v1466_v58 }
 0x35c   : > { %2020 = vmatpush3.bf16.msra.mxu0 %v2117_v60  ;;  %2044 = vmatpush3.bf16.msra.mxu1 %v2118_v61  ;;  %v1244_v62 = vpop.f32.mrb[24].mxu1 }
 0x35d   : > { %v1250_v1 = vadd.f32 %v1244_v62, %v1198_v42  ;;  %v1973_v2 = vpop.f32.mrb[25].mxu1  ;;  %2021 = vmatprep.subr.bf16.mxu0 %v2178_v35  ;;  %2045 = vmatprep.subr.bf16.mxu1 %v2178_v35 }
 0x35e   : > { %v1247_v4 = vpop.f32.mrb[26].mxu1 }
 0x35f   : > { %v1574_v5 = vmul.f32 %v2150_v3, %v1250_v1  ;;  %v1974_v6 = vpop.f32.mrb[27].mxu1 }
 0x360   : > { %2022 = vmatpush3.bf16.msra.mxu0 %v2119_v63  ;;  %2046 = vmatpush3.bf16.msra.mxu1 %v2120_v0 }
 0x361   : > { %2023 = vmatprep.subr.bf16.mxu0 %v2178_v35  ;;  %2047 = vmatprep.subr.bf16.mxu1 %v2178_v35  ;;  %v1575_v17 = vpack.c.bf16 %v1574_v5, %v1574_v5 }
 0x364   : > { %2024 = vmatpush3.bf16.msra.mxu0 %v2121_v7  ;;  %2048 = vmatpush3.bf16.msra.mxu1 %v2122_v10 }
 0x365   : > { %2025 = vmatprep.subr.bf16.mxu0 %v2178_v35  ;;  %2049 = vmatprep.subr.bf16.mxu1 %v2178_v35 }
 0x368   : > { %2026 = vmatpush3.bf16.msra.mxu0 %v2123_v11  ;;  %2050 = vmatpush3.bf16.msra.mxu1 %v2124_v12 }
 0x369   : > { %2027 = vmatprep.subr.bf16.mxu0 %v2178_v35 }
 0x36b   : > { %2052 = vmatmul.mubr.bf16.vlgmr.msra.gmra.mrb[32].mxu1 %v1575_v17 }
 0x36c   : > { %2028 = vmatpush3.bf16.msra.mxu0 %v2125_v15 }
 0x36d   : > { %2029 = vmatprep.subr.bf16.mxu0 %v2178_v35 }
 0x370   : > { %2030 = vmatpush3.bf16.msra.mxu0 %v2126_v18 }
 0x373   : > { %2032 = vmatmul.mubr.bf16.vlgmr.msra.gmra.mrb[32].mxu0 %v1467_v19 }
 0x41e   : > { %v1459_v8 = vpop.f32.mrb[28].mxu1 }
 0x41f   : > { %v2013_v9 = vpop.f32.mrb[29].mxu1 }
 0x420   : > { %v1462_v20 = vpop.f32.mrb[30].mxu1 }
 0x421   : > { %v2014_v21 = vpop.f32.mrb[31].mxu1 }
 0x426   : > { %v1371_v14 = vpop.f32.mrb[28].mxu0 }
 0x427   : > { %v1460_v16 = vadd.f32 %v1459_v8, %v1371_v14  ;;  %v1993_v23 = vpop.f32.mrb[29].mxu0 }
 0x428   : > { %v1374_v22 = vpop.f32.mrb[30].mxu0 }
 0x429   : > { %v1994_v24 = vpop.f32.mrb[31].mxu0 }
 0x43e   : > { %v1674_v25 = vpop.f32.mrb[32].mxu1 }
 0x43f   : > { %v2053_v26 = vpop.f32.mrb[33].mxu1 }
 0x440   : > { %v1677_v27 = vpop.f32.mrb[34].mxu1 }
 0x441   : > { %v2054_v28 = vpop.f32.mrb[35].mxu1 }
 0x446   : > { %v1566_v29 = vpop.f32.mrb[32].mxu0 }
 0x447   : > { %v1572_v30 = vadd.f32 %v1566_v29, %v1460_v16  ;;  %v2033_v31 = vpop.f32.mrb[33].mxu0 }
 0x448   : > { %v1569_v35 = vpop.f32.mrb[34].mxu0 }
 0x449   : > { %v1680_v33 = vadd.f32 %v1674_v25, %v1572_v30  ;;  %v2034_v34 = vpop.f32.mrb[35].mxu0 }
 0x44b   : > { %v1688_v45 = vadd.f32 %v1870_v32, %v1680_v33 }
 0x44d   : > { %v1690_v37 = vadd.f32 %v1689_v36, %v1688_v45 }
 0x44f   : > { %v1693_v38 = vsel %vm425_vm0, %v1690_v37, 0.0 }
 0x450   : > { %1694 = vadd.xlane.f32.xlu0 %v1693_v38 }
 0x4dd   : > { %v1695_v39 = vpop.xlane.xlu0 %1694 }
 0x4de   : > { %v1697_v40 = vmul.f32 0.03125, %v1695_v39 }
 0x4e0   : > { %v1698_v41 = vsub.f32 %v1690_v37, %v1697_v40 }
 0x4e2   : > { %v1699_v42 = vmul.f32 %v1698_v41, %v1698_v41 }
 0x4e4   : > { %v1700_v43 = vsel %vm425_vm0, %v1699_v42, 0.0 }
 0x4e5   : > { %1701 = vadd.xlane.f32.xlu1 %v1700_v43 }
 0x572   : > { %v1702_v49 = vpop.xlane.xlu1 %1701 }
 0x573   : > { %v1703_v46 = vmul.f32 0.03125, %v1702_v49 }
 0x575   : > { %v1704_v47 = vadd.f32 1e-05, %v1703_v46 }
 0x577   : > { %2151 = vrsqrt.f32 %v1704_v47 }
 0x581   : > { %v2152_v48 = vpop.eup %2151 }
 0x582   : > { %v1706_v50 = vmul.f32 %v2152_v48, %v1698_v41 }
 0x584   : > { %v1713_v52 = vmul.f32 %v1871_v13, %v1706_v50 }
 0x586   : > { %v1720_v53 = vadd.f32 %v1872_v51, %v1713_v52 }
 0x588   : > { %v1721_v54 = vpack.c.bf16 %v1720_v53, %v1720_v53 }
 0x58a   : > { %1723 = vst.msk [vmem:[%s347_s28] sm:$0xf] %vm1722_vm5, %v1721_v54 }
 0x58b PF: > { %s19_s11 = sadd.s32 1, %s2175_s11   ;;  %s2608_s30 = smov %s2171_s10 }
 0x58c   : > { %p16_p5 = scmp.ge.s32.totalorder %s19_s11, 4   ;;  %s2609_s10 = smov %s2611_s12 }
 0x58e   :  { %18 = sbr.rel (!%p16_p5) target bundleno = 2 (0x2), region = 87 }

// kernel: decoder_forward.8
= control target key start
LH: loop header
LB: loop body
LE: loop exit
PB: predicated region body
PF: predicated region fallthrough
CT: control target
= control target key end

     0   :  { %s2353_s17 = smov 0   ;;  %s2355_s18 = smov 0   ;;  %s2725_s0 = inlined_call_operand.vmem [shape: bf16[2,8,32], index: 0, kind: input, shape index: {}]   ;;  %s2726_s1 = inlined_call_operand.vmem [shape: bf16[2,8,32], index: 1, kind: input, shape index: {}]   ;;  %s2727_s2 = inlined_call_operand.vmem [shape: f32[2,1,8], index: 2, kind: input, shape index: {}]   ;;  %s2728_s3 = inlined_call_operand.vmem [shape: bf16[32,512], index: 3, kind: input, shape index: {}]   ;;  %s2729_s4 = inlined_call_operand.vmem [shape: f32[1,512], index: 4, kind: input, shape index: {}]   ;;  %s2730_s5 = inlined_call_operand.vmem [shape: bf16[32,1024], index: 5, kind: input, shape index: {}]   ;;  %s2731_s6 = inlined_call_operand.vmem [shape: f32[1,1024], index: 6, kind: input, shape index: {}]   ;;  %s2732_s7 = inlined_call_operand.vmem [shape: bf16[512,32], index: 7, kind: input, shape index: {}]   ;;  %s2733_s8 = inlined_call_operand.vmem [shape: f32[1,32], index: 8, kind: input, shape index: {}]   ;;  %s2734_s9 = inlined_call_operand.vmem [shape: f32[1,32], index: 9, kind: input, shape index: {}]   ;;  %s2735_s10 = inlined_call_operand.vmem [shape: f32[1,32], index: 10, kind: input, shape index: {}]   ;;  %s2736_s11 = inlined_call_operand.vmem [shape: bf16[2,8,32], index: 11, kind: output, shape index: {}]  }
   0x1   :  { %s2357_s19 = smov 0  }
   0x2 LB: > { %s33_s20 = sadd.s32 1, %s2284_s18  ;;  %p1913_p0 = scmp.ge.s32.totalorder %s2288_s19, 1  ;;  %s2288_s19 = sphi %s2357_s19, %s21_s19   ;;  %s2284_s18 = sphi %s2355_s18, %s2738_s18   ;;  %s2280_s17 = sphi %s2353_s17, %s2737_s17  }
   0x3   : > { %p35_p1 = scmp.ge.s32.totalorder %s33_s20, 2  ;;  %p372_p2 = scmp.lt.s32.totalorder %s2288_s19, 3 }
   0x5   : > { %s2740_s20 = smov (%p35_p1, %s33_s20), 0  ;;  %p373_p3 = pnand %p1913_p0, %p372_p2 }
   0x6   : > { %v2196_v0 = vld [vmem:[%s2728_s3 + $0x4] ss:$16 sps:$4 sm:$0xff] (!%p373_p3)   ;;  %p423_p4 = scmp.lt.s32.totalorder (!%p373_p3), %s2280_s17, 1  ;;  %v2198_v1 = vld [vmem:[%s2728_s3] ss:$16 sps:$4 sm:$0xff] (!%p373_p3)   ;;  %v2290_v2 = vmov (!%p373_p3), 0   ;;  %v456_v44 = vlaneseq (!%p373_p3) }
   0x7   : > { %376 = sbr.rel (%p373_p3) target bundleno = 1419 (0x58b), region = 64  ;;  %552 = vmatprep.mubr.bf16.mxu0 (!%p373_p3), %v2290_v2  ;;  %593 = vmatprep.mubr.bf16.mxu1 (!%p373_p3), %v2290_v2  ;;  %v2199_v3 = vld [vmem:[%s2728_s3 + $0x24] ss:$16 sps:$4 sm:$0xff] (!%p373_p3)   ;;  %v2201_v4 = vld [vmem:[%s2728_s3 + $0x20] ss:$16 sps:$4 sm:$0xff] (!%p373_p3)   ;;  %vm516_vm0 = vcmask (!%p373_p3), 261120  }
   0x8   : > { %520 = vmatprep.subr.bf16.mxu0 (!%p373_p3), %v2196_v0  ;;  %v608_v5 = vld [vmem:[%s2730_s5] sm:$0xff] (!%p373_p3)  ;;  %v2202_v10 = vld [vmem:[%s2728_s3 + $0xc] ss:$16 sps:$4 sm:$0xff] (!%p373_p3)   ;;  %v2204_v11 = vld [vmem:[%s2728_s3 + $0x8] ss:$16 sps:$4 sm:$0xff] (!%p373_p3)   ;;  %v2291_v35 = vmov (!%p373_p3), 0.0  }
   0x9   : > { %521 = vmatpush1.bf16.msra.mxu0 (!%p373_p3), %v2198_v1  ;;  %v612_v6 = vld [vmem:[%s2730_s5 + $0x20] sm:$0xff] (!%p373_p3)  ;;  %561 = vmatprep.subr.bf16.mxu1 (!%p373_p3), %v2202_v10  ;;  %v2205_v12 = vld [vmem:[%s2728_s3 + $0x2c] ss:$16 sps:$4 sm:$0xff] (!%p373_p3)   ;;  %v2207_v18 = vld [vmem:[%s2728_s3 + $0x28] ss:$16 sps:$4 sm:$0xff] (!%p373_p3)   ;;  %vm2292_vm1 = vmmov (!%p373_p3), 0  }
   0xa   : > { %v616_v7 = vld [vmem:[%s2730_s5 + $0x40] sm:$0xff] (!%p373_p3)  ;;  %522 = vmatprep.subr.bf16.mxu0 (!%p373_p3), %v2199_v3  ;;  %v1928_v9 = vcombine.high (!%p373_p3), %v608_v5, %v612_v6  ;;  %v1927_v14 = vcombine.low (!%p373_p3), %v608_v5, %v612_v6  ;;  %562 = vmatpush1.bf16.msra.mxu1 (!%p373_p3), %v2204_v11  ;;  %v609_v15 = vld [vmem:[%s2730_s5 + $0x8] sm:$0xff] (!%p373_p3)  ;;  %v610_v22 = vld [vmem:[%s2730_s5 + $0x10] sm:$0xff] (!%p373_p3)  ;;  %v2472_v45 = vshrl.u32 (!%p373_p3), %v456_v44, 7  ;;  %vm987_vm2 = vcmask (!%p373_p3), 1043456  }
   0xb   : > { %v620_v8 = vld [vmem:[%s2730_s5 + $0x60] sm:$0xff] (!%p373_p3)  ;;  %v613_v16 = vld [vmem:[%s2730_s5 + $0x28] sm:$0xff] (!%p373_p3)  ;;  %563 = vmatprep.subr.bf16.mxu1 (!%p373_p3), %v2205_v12  ;;  %v614_v23 = vld [vmem:[%s2730_s5 + $0x30] sm:$0xff] (!%p373_p3)  ;;  %vm967_vm3 = vcmask (!%p373_p3), 64512   ;;  %vm1812_vm4 = vcmask (!%p373_p3), 257024  }
   0xc   : > { %v1936_v17 = vcombine.high (!%p373_p3), %v616_v7, %v620_v8  ;;  %v617_v19 = vld [vmem:[%s2730_s5 + $0x48] sm:$0xff] (!%p373_p3)  ;;  %v1930_v21 = vcombine.high (!%p373_p3), %v609_v15, %v613_v16  ;;  %v1935_v24 = vcombine.low (!%p373_p3), %v616_v7, %v620_v8  ;;  %v1929_v25 = vcombine.low (!%p373_p3), %v609_v15, %v613_v16  ;;  %v618_v31 = vld [vmem:[%s2730_s5 + $0x50] sm:$0xff] (!%p373_p3)  ;;  %v611_v36 = vld [vmem:[%s2730_s5 + $0x18] sm:$0xff] (!%p373_p3) }
   0xd   : > { %523 = vmatpush1.bf16.msra.mxu0 (!%p373_p3), %v2201_v4  ;;  %v621_v20 = vld [vmem:[%s2730_s5 + $0x68] sm:$0xff] (!%p373_p3)  ;;  %v1932_v28 = vcombine.high (!%p373_p3), %v610_v22, %v614_v23  ;;  %v1931_v29 = vcombine.low (!%p373_p3), %v610_v22, %v614_v23  ;;  %v622_v32 = vld [vmem:[%s2730_s5 + $0x70] sm:$0xff] (!%p373_p3)  ;;  %v615_v37 = vld [vmem:[%s2730_s5 + $0x38] sm:$0xff] (!%p373_p3)  ;;  %v458_v50 = vsub.s32 (!%p373_p3), 0, %v2472_v45  ;;  %v462_v59 = vsub.s32 (!%p373_p3), 1, %v2472_v45 }
   0xe   : > { %s2742_s17 = smov (!%p423_p4, %s2280_s17), 1  ;;  %748 = vmatprep.subr.bf16.mxu0 %v1928_v9  ;;  %564 = vmatpush1.bf16.msra.mxu1 %v2207_v18  ;;  %v1938_v27 = vcombine.high %v617_v19, %v621_v20  ;;  %v1937_v30 = vcombine.low %v617_v19, %v621_v20  ;;  %v1940_v33 = vcombine.high %v618_v31, %v622_v32  ;;  %v619_v38 = vld [vmem:[%s2730_s5 + $0x58] sm:$0xff]  ;;  %v2477_v49 = vld [vmem:[%s2731_s6] sm:$0xff]  ;;  %v466_v3 = vsub.s32 2, %v2472_v45 }
   0xf   : > { %s2398_s22 = sshll.u32 %s2742_s17, 2  ;;  %789 = vmatprep.subr.bf16.mxu1 %v1930_v21  ;;  %v1939_v34 = vcombine.low %v618_v31, %v622_v32  ;;  %v1933_v39 = vcombine.low %v611_v36, %v615_v37  ;;  %v1934_v40 = vcombine.high %v611_v36, %v615_v37  ;;  %v623_v41 = vld [vmem:[%s2730_s5 + $0x78] sm:$0xff]  ;;  %v628_v52 = vrot.slane %v2477_v49, %v458_v50  ;;  %v454_v55 = vld [vmem:[%s2729_s4] sm:$0xf]  ;;  %s436_s25 = scalar_lea.vmem %s2727_s2, %s2742_s17 }
  0x10   : > { %s429_s27 = scalar_lea.vmem %s2725_s0, %s2398_s22  ;;  %s433_s15 = scalar_lea.vmem %s2726_s1, %s2398_s22  ;;  %v1942_v42 = vcombine.high %v619_v38, %v623_v41  ;;  %v1941_v43 = vcombine.low %v619_v38, %v623_v41  ;;  %v459_v62 = vrot.slane %v454_v55, %v458_v50  ;;  %v632_v1 = vrot.slane %v2477_v49, %v462_v59 }
  0x11   : > { %v2413_v13 = vld [vmem:[%s429_s27] sm:$0xf]  ;;  %v636_v10 = vrot.slane %v2477_v49, %v466_v3  ;;  %v463_v12 = vrot.slane %v454_v55, %v462_v59  ;;  %v470_v15 = vsub.s32 3, %v2472_v45  ;;  %v467_v18 = vrot.slane %v454_v55, %v466_v3  ;;  %s443_s23 = scalar_lea.vmem %s2736_s11, %s2398_s22 }
  0x12   : > { %1925 = vmatmul.mubr.msk.bf16.vlgmr.msra.gmra.mrb[0].mxu0 %vm516_vm0, %v2413_v13  ;;  %v607_v26 = vld [vmem:[%s433_s15] sm:$0xf]  ;;  %1926 = vmatmul.mubr.msk.bf16.vlgmr.msra.gmra.mrb[0].mxu1 %vm516_vm0, %v2413_v13 }
  0x13   : > { %749 = vmatpush1.bf16.msra.mxu0 %v1927_v14  ;;  %780 = vmatprep.mubr.bf16.mxu0 %v2290_v2  ;;  %v640_v20 = vrot.slane %v2477_v49, %v470_v15 }
  0x14   : > { %750 = vmatprep.subr.bf16.mxu0 %v1936_v17  ;;  %790 = vmatpush1.bf16.msra.mxu1 %v1929_v25 }
  0x15   : > { %821 = vmatprep.mubr.bf16.mxu1 %v2290_v2  ;;  %791 = vmatprep.subr.bf16.mxu1 %v1938_v27 }
  0x17   : > { %751 = vmatpush1.bf16.msra.mxu0 %v1935_v24 }
  0x18   : > { %830 = vmatprep.subr.bf16.mxu0 %v1932_v28  ;;  %792 = vmatpush1.bf16.msra.mxu1 %v1937_v30 }
  0x19   : > { %871 = vmatprep.subr.bf16.mxu1 %v1934_v40 }
  0x1a   : > { %1943 = vmatmul.mubr.msk.bf16.vlgmr.msra.gmra.mrb[4].mxu0 %vm516_vm0, %v607_v26 }
  0x1b   : > { %831 = vmatpush1.bf16.msra.mxu0 %v1931_v29  ;;  %862 = vmatprep.mubr.bf16.mxu0 %v2290_v2  ;;  %v643_v29 = vsub.s32 4, %v2472_v45 }
  0x1c   : > { %1944 = vmatmul.mubr.msk.bf16.vlgmr.msra.gmra.mrb[4].mxu1 %vm516_vm0, %v607_v26  ;;  %832 = vmatprep.subr.bf16.mxu0 %v1940_v33 }
  0x1d   : > { %903 = vmatprep.mubr.bf16.mxu1 %v2290_v2  ;;  %872 = vmatpush1.bf16.msra.mxu1 %v1933_v39  ;;  %v644_v30 = vrot.slane %v2477_v49, %v643_v29  ;;  %v1947_v39 = vld [vmem:[%s436_s25] ss:$0 sm:$0xff] }
  0x1e   : > { %873 = vmatprep.subr.bf16.mxu1 %v1942_v42 }
  0x1f   : > { %833 = vmatpush1.bf16.msra.mxu0 %v1939_v34 }
  0x20   : > { %2041 = vmatprep.subr.bf16.mxu0 %v2291_v35 }
  0x21   : > { %874 = vmatpush1.bf16.msra.mxu1 %v1941_v43 }
  0x22   : > { %1945 = vmatmul.mubr.msk.bf16.vlgmr.msra.gmra.mrb[8].mxu0 %vm516_vm0, %v607_v26  ;;  %2047 = vmatprep.subr.bf16.mxu1 %v2291_v35 }
  0x23   : > { %2043 = vmatprep.mubr.msk.bf16.mxu0 %vm2292_vm1, %v2291_v35 }
  0x24   : > { %1946 = vmatmul.mubr.msk.bf16.vlgmr.msra.gmra.mrb[8].mxu1 %vm516_vm0, %v607_v26  ;;  %v471_v26 = vrot.slane %v454_v55, %v470_v15  ;;  %v651_v15 = vsub.s32 6, %v2472_v45 }
  0x25   : > { %2049 = vmatprep.mubr.msk.bf16.mxu1 %vm2292_vm1, %v2291_v35 }
  0xe5   : > { %v554_v46 = vpop.f32.mrb[0].mxu0  ;;  %v595_v53 = vpop.f32.mrb[0].mxu1 }
  0xe6   : > { %v556_v47 = vpop.f32.mrb[1].mxu0  ;;  %v597_v54 = vpop.f32.mrb[1].mxu1  ;;  %v555_v5 = vadd.f32 %v554_v46, %v459_v62  ;;  %v596_v22 = vadd.f32 %v595_v53, %v467_v18 }
  0xe7   : > { %v558_v48 = vpop.f32.mrb[2].mxu0  ;;  %v599_v56 = vpop.f32.mrb[2].mxu1  ;;  %v557_v17 = vadd.f32 %v556_v47, %v463_v12  ;;  %v598_v27 = vadd.f32 %v597_v54, %v471_v26 }
  0xe8   : > { %v559_v51 = vpop.f32.mrb[3].mxu0  ;;  %v600_v58 = vpop.f32.mrb[3].mxu1  ;;  %v602_v11 = vpack.c.bf16 %v555_v5, %v555_v5  ;;  %v604_v24 = vpack.c.bf16 %v596_v22, %v596_v22 }
  0xe9   : > { %v603_v21 = vpack.c.bf16 %v557_v17, %v557_v17  ;;  %v605_v28 = vpack.c.bf16 %v598_v27, %v598_v27 }
  0xed   : > { %v782_v57 = vpop.f32.mrb[4].mxu0 }
  0xee   : > { %v783_v60 = vadd.f32 %v782_v57, %v628_v52  ;;  %v784_v61 = vpop.f32.mrb[5].mxu0 }
  0xef   : > { %v786_v63 = vpop.f32.mrb[6].mxu0  ;;  %v823_v4 = vpop.f32.mrb[4].mxu1  ;;  %v785_v7 = vadd.f32 %v784_v61, %v632_v1 }
  0xf0   : > { %v912_v0 = vpack.c.bf16 %v783_v60, %v783_v60  ;;  %v787_v2 = vpop.f32.mrb[7].mxu0  ;;  %v825_v6 = vpop.f32.mrb[5].mxu1  ;;  %v824_v16 = vadd.f32 %v823_v4, %v636_v10 }
  0xf1   : > { %v827_v8 = vpop.f32.mrb[6].mxu1  ;;  %v913_v14 = vpack.c.bf16 %v785_v7, %v785_v7  ;;  %v826_v23 = vadd.f32 %v825_v6, %v640_v20 }
  0xf2   : > { %2042 = vmatpush3.bf16.xpose.msra.mxu0 %v912_v0  ;;  %v828_v9 = vpop.f32.mrb[7].mxu1  ;;  %v914_v19 = vpack.c.bf16 %v824_v16, %v824_v16 }
  0xf3   : > { %2053 = vmatprep.subr.bf16.mxu0 %v2291_v35  ;;  %v915_v25 = vpack.c.bf16 %v826_v23, %v826_v23  ;;  %v647_v9 = vsub.s32 5, %v2472_v45 }
  0xf5   : > { %v864_v31 = vpop.f32.mrb[8].mxu0  ;;  %v648_v12 = vrot.slane %v2477_v49, %v647_v9 }
  0xf6   : > { %v865_v32 = vadd.f32 %v864_v31, %v644_v30  ;;  %v866_v33 = vpop.f32.mrb[9].mxu0 }
  0xf7   : > { %v868_v34 = vpop.f32.mrb[10].mxu0  ;;  %v905_v2 = vpop.f32.mrb[8].mxu1  ;;  %v867_v17 = vadd.f32 %v866_v33, %v648_v12 }
  0xf8   : > { %v916_v36 = vpack.c.bf16 %v865_v32, %v865_v32  ;;  %v869_v37 = vpop.f32.mrb[11].mxu0  ;;  %v907_v3 = vpop.f32.mrb[9].mxu1 }
  0xf9   : > { %2044 = vmatmul.mubr.bf16.vlgmr.msra.gmra.mrb[12].mxu0 %v602_v11  ;;  %v909_v4 = vpop.f32.mrb[10].mxu1 }
  0xfa   : > { %2054 = vmatpush3.bf16.xpose.msra.mxu0 %v913_v14  ;;  %2055 = vmatprep.mubr.msk.bf16.mxu0 %vm2292_vm1, %v2291_v35  ;;  %v989_v38 = vsel %vm987_vm2, %v916_v36, 0  ;;  %v910_v5 = vpop.f32.mrb[11].mxu1 }
  0xfb   : > { %2065 = vmatprep.subr.bf16.mxu0 %v2291_v35  ;;  %2048 = vmatpush3.bf16.msra.mxu1 %v989_v38 }
  0xfc   : > { %2059 = vmatprep.subr.bf16.mxu1 %v2291_v35 }
 0x101   : > { %2056 = vmatmul.mubr.bf16.vlgmr.msra.gmra.mrb[16].mxu0 %v603_v21  ;;  %v917_v21 = vpack.c.bf16 %v867_v17, %v867_v17 }
 0x102   : > { %2066 = vmatpush3.bf16.xpose.msra.mxu0 %v914_v19  ;;  %2067 = vmatprep.mubr.msk.bf16.mxu0 %vm2292_vm1, %v2291_v35  ;;  %v652_v19 = vrot.slane %v2477_v49, %v651_v15 }
 0x103   : > { %2077 = vmatprep.subr.bf16.mxu0 %v2291_v35  ;;  %v1092_v29 = vsel %vm987_vm2, %v917_v21, 0 }
 0x109   : > { %2068 = vmatmul.mubr.bf16.vlgmr.msra.gmra.mrb[20].mxu0 %v604_v24  ;;  %v906_v24 = vadd.f32 %v905_v2, %v652_v19  ;;  %v2224_v2 = vld [vmem:[%s2732_s7 + $0x78] sm:$0xff]  }
 0x10a   : > { %2078 = vmatpush3.bf16.xpose.msra.mxu0 %v915_v25  ;;  %2079 = vmatprep.mubr.msk.bf16.mxu0 %vm2292_vm1, %v2291_v35 }
 0x10b   : > { %2089 = vmatprep.subr.bf16.mxu0 %v2291_v35  ;;  %v918_v31 = vpack.c.bf16 %v906_v24, %v906_v24 }
 0x10d   : > { %v1195_v36 = vsel %vm987_vm2, %v918_v31, 0  ;;  %v2223_v31 = vld [vmem:[%s2732_s7 + $0xc0] sm:$0xff]  }
 0x111   : > { %2080 = vmatmul.mubr.bf16.vlgmr.msra.gmra.mrb[24].mxu0 %v605_v28  ;;  %v655_v28 = vsub.s32 7, %v2472_v45 }
 0x112   : > { %2105 = vmatprep.mubr.msk.bf16.mxu0 %vm2292_vm1, %v2291_v35 }
 0x113   : > { %v656_v32 = vrot.slane %v2477_v49, %v655_v28 }
 0x1cc   : > { %v961_v40 = vpop.f32.mrb[12].mxu0 }
 0x1cd   : > { %v962_v41 = vadd.f32 %v1947_v39, %v961_v40  ;;  %v2045_v42 = vpop.f32.mrb[13].mxu0  ;;  %v908_v40 = vadd.f32 %v907_v3, %v656_v32 }
 0x1ce   : > { %v964_v43 = vpop.f32.mrb[14].mxu0 }
 0x1cf   : > { %v2046_v44 = vpop.f32.mrb[15].mxu0  ;;  %v968_v46 = vsel %vm967_vm3, %v962_v41, -inf  ;;  %v919_v49 = vpack.c.bf16 %v908_v40, %v908_v40 }
 0x1d0   : > { %969 = vmax.xlane.f32.xlu0 %v968_v46 }
 0x1d1   : > { %v1298_v43 = vsel %vm987_vm2, %v919_v49, 0 }
 0x1d4   : > { %v1066_v47 = vpop.f32.mrb[16].mxu0 }
 0x1d5   : > { %v1067_v48 = vadd.f32 %v1947_v39, %v1066_v47  ;;  %v2057_v50 = vpop.f32.mrb[17].mxu0 }
 0x1d6   : > { %v1069_v51 = vpop.f32.mrb[18].mxu0 }
 0x1d7   : > { %v2058_v52 = vpop.f32.mrb[19].mxu0  ;;  %v1072_v53 = vsel %vm967_vm3, %v1067_v48, -inf  ;;  %v2208_v51 = vld [vmem:[%s2732_s7] sm:$0xff]  }
 0x1d8   : > { %1073 = vmax.xlane.f32.xlu0 %v1072_v53  ;;  %v2210_v52 = vld [vmem:[%s2732_s7 + $0x40] sm:$0xff]   ;;  %v2209_v53 = vld [vmem:[%s2732_s7 + $0x8] sm:$0xff]  }
 0x1d9   : > { %2090 = vmatpush3.bf16.msra.mxu0 %v2210_v52 }
 0x1da   : > { %2091 = vmatprep.subr.bf16.mxu0 %v2291_v35 }
 0x1dc   : > { %v1169_v54 = vpop.f32.mrb[20].mxu0 }
 0x1dd   : > { %v1170_v55 = vadd.f32 %v1947_v39, %v1169_v54  ;;  %v2069_v56 = vpop.f32.mrb[21].mxu0  ;;  %v2212_v54 = vld [vmem:[%s2732_s7 + $0x48] sm:$0xff]  }
 0x1de   : > { %v1172_v57 = vpop.f32.mrb[22].mxu0  ;;  %2092 = vmatpush3.bf16.msra.mxu0 %v2212_v54  ;;  %v2214_v56 = vld [vmem:[%s2732_s7 + $0x50] sm:$0xff]  }
 0x1df   : > { %v2070_v58 = vpop.f32.mrb[23].mxu0  ;;  %v1175_v59 = vsel %vm967_vm3, %v1170_v55, -inf  ;;  %2093 = vmatprep.subr.bf16.mxu0 %v2291_v35  ;;  %v2213_v57 = vld [vmem:[%s2732_s7 + $0x18] sm:$0xff]  }
 0x1e0   : > { %1176 = vmax.xlane.f32.xlu1 %v1175_v59  ;;  %v2216_v58 = vld [vmem:[%s2732_s7 + $0x58] sm:$0xff]   ;;  %v2215_v59 = vld [vmem:[%s2732_s7 + $0x20] sm:$0xff]  }
 0x1e2   : > { %2094 = vmatpush3.bf16.msra.mxu0 %v2214_v56 }
 0x1e3   : > { %2095 = vmatprep.subr.bf16.mxu0 %v2291_v35 }
 0x1e4   : > { %v1272_v60 = vpop.f32.mrb[24].mxu0 }
 0x1e5   : > { %v1273_v61 = vadd.f32 %v1947_v39, %v1272_v60  ;;  %v2081_v62 = vpop.f32.mrb[25].mxu0  ;;  %v2218_v60 = vld [vmem:[%s2732_s7 + $0x60] sm:$0xff]  }
 0x1e6   : > { %v1275_v63 = vpop.f32.mrb[26].mxu0  ;;  %2096 = vmatpush3.bf16.msra.mxu0 %v2216_v58  ;;  %v2219_v62 = vld [vmem:[%s2732_s7 + $0x30] sm:$0xff]  }
 0x1e7   : > { %v2082_v0 = vpop.f32.mrb[27].mxu0  ;;  %v1278_v1 = vsel %vm967_vm3, %v1273_v61, -inf  ;;  %2097 = vmatprep.subr.bf16.mxu0 %v2291_v35  ;;  %v2220_v63 = vld [vmem:[%s2732_s7 + $0x68] sm:$0xff]   ;;  %v2230_v58 = vld [vmem:[%s2732_s7 + $0x90] sm:$0xff]  }
 0x1e8   : > { %1279 = vmax.xlane.f32.xlu1 %v1278_v1  ;;  %v2221_v0 = vld [vmem:[%s2732_s7 + $0x38] sm:$0xff]   ;;  %v2222_v1 = vld [vmem:[%s2732_s7 + $0x70] sm:$0xff]  }
 0x1ea   : > { %2098 = vmatpush3.bf16.msra.mxu0 %v2218_v60 }
 0x1eb   : > { %2099 = vmatprep.subr.bf16.mxu0 %v2291_v35 }
 0x1ee   : > { %2100 = vmatpush3.bf16.msra.mxu0 %v2220_v63 }
 0x1ef   : > { %2101 = vmatprep.subr.bf16.mxu0 %v2291_v35 }
 0x1f2   : > { %2102 = vmatpush3.bf16.msra.mxu0 %v2222_v1 }
 0x1f3   : > { %2103 = vmatprep.subr.bf16.mxu0 %v2291_v35 }
 0x1f6   : > { %2104 = vmatpush3.bf16.msra.mxu0 %v2224_v2 }
 0x1f7   : > { %2129 = vmatprep.subr.bf16.mxu0 %v2291_v35 }
 0x25d   : > { %v2514_v6 = vpop.xlane.xlu0 %969 }
 0x25e   : > { %v971_v7 = vmax.f32 %v2514_v6, -1e+30 }
 0x260   : > { %v975_v8 = vsub.f32 %v962_v41, %v971_v7  ;;  %v972_v3 = vsub.f32 -1e+30, %v971_v7 }
 0x262   : > { %v976_v10 = vmul.f32 1.442695, %v975_v8  ;;  %v973_v4 = vmul.f32 1.442695, %v972_v3 }
 0x264   : > { %2240 = vpow2.f32 %v976_v10 }
 0x265   : > { %v2520_v11 = vpop.xlane.xlu0 %1073 }
 0x266   : > { %v1075_v14 = vmax.f32 %v2520_v11, -1e+30 }
 0x268   : > { %v1079_v16 = vsub.f32 %v1067_v48, %v1075_v14  ;;  %v1076_v5 = vsub.f32 -1e+30, %v1075_v14 }
 0x26a   : > { %v1080_v18 = vmul.f32 1.442695, %v1079_v16  ;;  %v1077_v8 = vmul.f32 1.442695, %v1076_v5  ;;  %v2234_v5 = vld [vmem:[%s2732_s7 + $0xa0] sm:$0xff]  }
 0x26c   : > { %2242 = vpow2.f32 %v1080_v18 }
 0x26d   : > { %v2528_v20 = vpop.xlane.xlu1 %1176 }
 0x26e   : > { %v1178_v22 = vmax.f32 %v2528_v20, -1e+30  ;;  %v2241_v23 = vpop.eup %2240 }
 0x26f   : > { %v979_v26 = vsel %vm967_vm3, %v2241_v23, 0.0  ;;  %v983_v27 = vpack.c.bf16 %v2241_v23, %v2241_v23 }
 0x270   : > { %v1182_v25 = vsub.f32 %v1170_v55, %v1178_v22  ;;  %980 = vadd.xlane.f32.xlu1 %v979_v26  ;;  %v2211_v55 = vld [vmem:[%s2732_s7 + $0x10] sm:$0xff]   ;;  %v1179_v9 = vsub.f32 -1e+30, %v1178_v22 }
 0x271   : > { %2050 = vmatmul.mubr.msk.bf16.vlgmr.msra.gmra.mrb[12].mxu1 %vm967_vm3, %v983_v27 }
 0x272   : > { %v1183_v30 = vmul.f32 1.442695, %v1182_v25  ;;  %2060 = vmatpush3.bf16.msra.mxu1 %v1092_v29  ;;  %2061 = vmatprep.mubr.msk.bf16.mxu1 %vm2292_vm1, %v2291_v35  ;;  %v1180_v12 = vmul.f32 1.442695, %v1179_v9  ;;  %v2236_v9 = vld [vmem:[%s2732_s7 + $0xa8] sm:$0xff]  }
 0x273   : > { %2071 = vmatprep.subr.bf16.mxu1 %v2291_v35 }
 0x274   : > { %2244 = vpow2.f32 %v1183_v30 }
 0x275   : > { %v2541_v33 = vpop.xlane.xlu1 %1279 }
 0x276   : > { %v1281_v45 = vmax.f32 %v2541_v33, -1e+30  ;;  %v2243_v34 = vpop.eup %2242 }
 0x277   : > { %v1083_v38 = vsel %vm967_vm3, %v2243_v34, 0.0  ;;  %v1087_v39 = vpack.c.bf16 %v2243_v34, %v2243_v34  ;;  %v2225_v34 = vld [vmem:[%s2732_s7 + $0xc8] sm:$0xff]  }
 0x278   : > { %v1285_v37 = vsub.f32 %v1273_v61, %v1281_v45  ;;  %1084 = vadd.xlane.f32.xlu0 %v1083_v38  ;;  %v2217_v61 = vld [vmem:[%s2732_s7 + $0x28] sm:$0xff]   ;;  %v1282_v6 = vsub.f32 -1e+30, %v1281_v45 }
 0x279   : > { %2062 = vmatmul.mubr.msk.bf16.vlgmr.msra.gmra.mrb[16].mxu1 %vm967_vm3, %v1087_v39 }
 0x27a   : > { %v1286_v41 = vmul.f32 1.442695, %v1285_v37  ;;  %2072 = vmatpush3.bf16.msra.mxu1 %v1195_v36  ;;  %2073 = vmatprep.mubr.msk.bf16.mxu1 %vm2292_vm1, %v2291_v35  ;;  %v1283_v18 = vmul.f32 1.442695, %v1282_v6 }
 0x27b   : > { %2083 = vmatprep.subr.bf16.mxu1 %v2291_v35 }
 0x27c   : > { %2246 = vpow2.f32 %v1286_v41 }
 0x27d   : > { %2248 = vpow2.f32 %v973_v4 }
 0x27e   : > { %v2245_v42 = vpop.eup %2244  ;;  %2250 = vpow2.f32 %v1077_v8  ;;  %v2235_v8 = vld [vmem:[%s2732_s7 + $0xf0] sm:$0xff]  }
 0x27f   : > { %v1186_v44 = vsel %vm967_vm3, %v2245_v42, 0.0  ;;  %v1190_v46 = vpack.c.bf16 %v2245_v42, %v2245_v42  ;;  %2252 = vpow2.f32 %v1180_v12  ;;  %v2238_v12 = vld [vmem:[%s2732_s7 + $0xb0] sm:$0xff]  }
 0x280   : > { %1187 = vadd.xlane.f32.xlu0 %v1186_v44  ;;  %v2226_v44 = vld [vmem:[%s2732_s7 + $0x80] sm:$0xff]  }
 0x281   : > { %2074 = vmatmul.mubr.msk.bf16.vlgmr.msra.gmra.mrb[20].mxu1 %vm967_vm3, %v1190_v46  ;;  %v2227_v46 = vld [vmem:[%s2732_s7 + $0xd0] sm:$0xff]  }
 0x282   : > { %2084 = vmatpush3.bf16.msra.mxu1 %v1298_v43  ;;  %2085 = vmatprep.mubr.msk.bf16.mxu1 %vm2292_vm1, %v2291_v35 }
 0x283   : > { %2109 = vmatprep.subr.bf16.mxu1 %v2291_v35 }
 0x286   : > { %v2247_v47 = vpop.eup %2246 }
 0x287   : > { %v1289_v48 = vsel %vm967_vm3, %v2247_v47, 0.0  ;;  %v1293_v50 = vpack.c.bf16 %v2247_v47, %v2247_v47  ;;  %v2249_v10 = vpop.eup %2248 }
 0x288   : > { %1290 = vadd.xlane.f32.xlu1 %v1289_v48  ;;  %v978_v16 = vmul.f32 0.0, %v2249_v10  ;;  %v2251_v7 = vpop.eup %2250  ;;  %v2237_v10 = vld [vmem:[%s2732_s7 + $0xf8] sm:$0xff]  }
 0x289   : > { %2086 = vmatmul.mubr.msk.bf16.vlgmr.msra.gmra.mrb[24].mxu1 %vm967_vm3, %v1293_v50  ;;  %v1082_v11 = vmul.f32 0.0, %v2251_v7  ;;  %v2253_v21 = vpop.eup %2252  ;;  %v2228_v50 = vld [vmem:[%s2732_s7 + $0x88] sm:$0xff]  }
 0x28a   : > { %2125 = vmatprep.mubr.msk.bf16.mxu1 %vm2292_vm1, %v2291_v35  ;;  %2110 = vmatpush3.bf16.msra.mxu1 %v2208_v51  ;;  %v1185_v26 = vmul.f32 0.0, %v2253_v21  ;;  %v2229_v51 = vld [vmem:[%s2732_s7 + $0xd8] sm:$0xff]  }
 0x28b   : > { %2111 = vmatprep.subr.bf16.mxu1 %v2291_v35 }
 0x28e   : > { %2112 = vmatpush3.bf16.msra.mxu1 %v2209_v53 }
 0x28f   : > { %2113 = vmatprep.subr.bf16.mxu1 %v2291_v35 }
 0x292   : > { %2114 = vmatpush3.bf16.msra.mxu1 %v2211_v55 }
 0x293   : > { %2115 = vmatprep.subr.bf16.mxu1 %v2291_v35 }
 0x296   : > { %2116 = vmatpush3.bf16.msra.mxu1 %v2213_v57 }
 0x297   : > { %2117 = vmatprep.subr.bf16.mxu1 %v2291_v35 }
 0x29a   : > { %2118 = vmatpush3.bf16.msra.mxu1 %v2215_v59  ;;  %v2231_v59 = vld [vmem:[%s2732_s7 + $0xe0] sm:$0xff]  }
 0x29b   : > { %2119 = vmatprep.subr.bf16.mxu1 %v2291_v35 }
 0x29e   : > { %2120 = vmatpush3.bf16.msra.mxu1 %v2217_v61  ;;  %v2232_v61 = vld [vmem:[%s2732_s7 + $0x98] sm:$0xff]  }
 0x29f   : > { %2121 = vmatprep.subr.bf16.mxu1 %v2291_v35 }
 0x2a2   : > { %2122 = vmatpush3.bf16.msra.mxu1 %v2219_v62  ;;  %v2233_v62 = vld [vmem:[%s2732_s7 + $0xe8] sm:$0xff]  }
 0x2a3   : > { %2123 = vmatprep.subr.bf16.mxu1 %v2291_v35 }
 0x2a6   : > { %2124 = vmatpush3.bf16.msra.mxu1 %v2221_v0 }
 0x2a7   : > { %2149 = vmatprep.subr.bf16.mxu1 %v2291_v35 }
 0x2fd   : > { %v981_v15 = vpop.xlane.xlu1 %980 }
 0x2fe   : > { %v982_v17 = vadd.f32 %v981_v15, %v978_v16 }
 0x300   : > { %2254 = vrcp.f32 %v982_v17 }
 0x301   : > { %2256 = vpow2.f32 %v1283_v18 }
 0x305   : > { %v1085_v19 = vpop.xlane.xlu0 %1084 }
 0x306   : > { %v1086_v14 = vadd.f32 %v1085_v19, %v1082_v11 }
 0x308   : > { %2258 = vrcp.f32 %v1086_v14 }
 0x30a   : > { %v2255_v25 = vpop.eup %2254 }
 0x30b   : > { %v2257_v33 = vpop.eup %2256 }
 0x30c   : > { %v1288_v40 = vmul.f32 0.0, %v2257_v33  ;;  %v1779_v33 = vunpack.c.l.bf16 %v2413_v13  ;;  %v1985_v13 = vld [vmem:[%s2734_s9] ss:$0 sm:$0xff] }
 0x30d   : > { %v1188_v22 = vpop.xlane.xlu0 %1187 }
 0x30e   : > { %v1189_v30 = vadd.f32 %v1188_v22, %v1185_v26 }
 0x310   : > { %2260 = vrcp.f32 %v1189_v30  ;;  %v1984_v30 = vld [vmem:[%s2733_s8] ss:$0 sm:$0xff] }
 0x312   : > { %v2259_v39 = vpop.eup %2258 }
 0x315   : > { %v1291_v36 = vpop.xlane.xlu1 %1290 }
 0x316   : > { %v1292_v43 = vadd.f32 %v1291_v36, %v1288_v40 }
 0x318   : > { %2262 = vrcp.f32 %v1292_v43 }
 0x31a   : > { %v2261_v54 = vpop.eup %2260 }
 0x322   : > { %v2263_v1 = vpop.eup %2262 }
 0x344   : > { %v1025_v20 = vpop.f32.mrb[12].mxu1 }
 0x345   : > { %v1031_v23 = vadd.f32 %v1025_v20, %v978_v16  ;;  %v2051_v24 = vpop.f32.mrb[13].mxu1  ;;  %v2239_v16 = vld [vmem:[%s2732_s7 + $0xb8] sm:$0xff]  }
 0x346   : > { %v1028_v27 = vpop.f32.mrb[14].mxu1 }
 0x347   : > { %v1342_v28 = vmul.f32 %v2255_v25, %v1031_v23  ;;  %v2052_v29 = vpop.f32.mrb[15].mxu1 }
 0x349   : > { %v1343_v32 = vpack.c.bf16 %v1342_v28, %v1342_v28 }
 0x34b   : > { %2126 = vmatmul.mubr.bf16.vlgmr.msra.gmra.mrb[28].mxu1 %v1343_v32 }
 0x34c   : > { %2150 = vmatpush3.bf16.msra.mxu1 %v2223_v31  ;;  %v1128_v45 = vpop.f32.mrb[16].mxu1  ;;  %2165 = vmatprep.mubr.msk.bf16.mxu1 %vm2292_vm1, %v2291_v35 }
 0x34d   : > { %v1134_v37 = vadd.f32 %v1128_v45, %v1082_v11  ;;  %v2063_v38 = vpop.f32.mrb[17].mxu1  ;;  %2151 = vmatprep.subr.bf16.mxu1 %v2291_v35 }
 0x34e   : > { %v1131_v41 = vpop.f32.mrb[18].mxu1 }
 0x34f   : > { %v1361_v49 = vmul.f32 %v2259_v39, %v1134_v37  ;;  %v2064_v42 = vpop.f32.mrb[19].mxu1 }
 0x350   : > { %2152 = vmatpush3.bf16.msra.mxu1 %v2225_v34 }
 0x351   : > { %v1362_v47 = vpack.c.bf16 %v1361_v49, %v1361_v49  ;;  %2153 = vmatprep.subr.bf16.mxu1 %v2291_v35 }
 0x353   : > { %2106 = vmatmul.mubr.bf16.vlgmr.msra.gmra.mrb[28].mxu0 %v1362_v47  ;;  %v1986_v47 = vld [vmem:[%s2735_s10] ss:$0 sm:$0xff] }
 0x354   : > { %2130 = vmatpush3.bf16.msra.mxu0 %v2226_v44  ;;  %2154 = vmatpush3.bf16.msra.mxu1 %v2227_v46  ;;  %v1231_v48 = vpop.f32.mrb[20].mxu1 }
 0x355   : > { %v1237_v52 = vadd.f32 %v1231_v48, %v1185_v26  ;;  %v2075_v53 = vpop.f32.mrb[21].mxu1  ;;  %2131 = vmatprep.subr.bf16.mxu0 %v2291_v35  ;;  %2155 = vmatprep.subr.bf16.mxu1 %v2291_v35 }
 0x356   : > { %v1234_v55 = vpop.f32.mrb[22].mxu1  ;;  %2145 = vmatprep.mubr.msk.bf16.mxu0 %vm2292_vm1, %v2291_v35 }
 0x357   : > { %v1556_v56 = vmul.f32 %v2261_v54, %v1237_v52  ;;  %v2076_v57 = vpop.f32.mrb[23].mxu1 }
 0x358   : > { %2132 = vmatpush3.bf16.msra.mxu0 %v2228_v50  ;;  %2156 = vmatpush3.bf16.msra.mxu1 %v2229_v51 }
 0x359   : > { %2133 = vmatprep.subr.bf16.mxu0 %v2291_v35  ;;  %2157 = vmatprep.subr.bf16.mxu1 %v2291_v35  ;;  %v1557_v17 = vpack.c.bf16 %v1556_v56, %v1556_v56 }
 0x35c   : > { %2134 = vmatpush3.bf16.msra.mxu0 %v2230_v58  ;;  %2158 = vmatpush3.bf16.msra.mxu1 %v2231_v59  ;;  %v1334_v60 = vpop.f32.mrb[24].mxu1 }
 0x35d   : > { %v1340_v63 = vadd.f32 %v1334_v60, %v1288_v40  ;;  %v2087_v0 = vpop.f32.mrb[25].mxu1  ;;  %2135 = vmatprep.subr.bf16.mxu0 %v2291_v35  ;;  %2159 = vmatprep.subr.bf16.mxu1 %v2291_v35 }
 0x35e   : > { %v1337_v2 = vpop.f32.mrb[26].mxu1 }
 0x35f   : > { %v1664_v3 = vmul.f32 %v2263_v1, %v1340_v63  ;;  %v2088_v4 = vpop.f32.mrb[27].mxu1 }
 0x360   : > { %2136 = vmatpush3.bf16.msra.mxu0 %v2232_v61  ;;  %2160 = vmatpush3.bf16.msra.mxu1 %v2233_v62 }
 0x361   : > { %2137 = vmatprep.subr.bf16.mxu0 %v2291_v35  ;;  %2161 = vmatprep.subr.bf16.mxu1 %v2291_v35  ;;  %v1665_v15 = vpack.c.bf16 %v1664_v3, %v1664_v3 }
 0x364   : > { %2138 = vmatpush3.bf16.msra.mxu0 %v2234_v5  ;;  %2162 = vmatpush3.bf16.msra.mxu1 %v2235_v8 }
 0x365   : > { %2139 = vmatprep.subr.bf16.mxu0 %v2291_v35  ;;  %2163 = vmatprep.subr.bf16.mxu1 %v2291_v35 }
 0x368   : > { %2140 = vmatpush3.bf16.msra.mxu0 %v2236_v9  ;;  %2164 = vmatpush3.bf16.msra.mxu1 %v2237_v10 }
 0x369   : > { %2141 = vmatprep.subr.bf16.mxu0 %v2291_v35 }
 0x36b   : > { %2166 = vmatmul.mubr.bf16.vlgmr.msra.gmra.mrb[32].mxu1 %v1665_v15 }
 0x36c   : > { %2142 = vmatpush3.bf16.msra.mxu0 %v2238_v12 }
 0x36d   : > { %2143 = vmatprep.subr.bf16.mxu0 %v2291_v35 }
 0x370   : > { %2144 = vmatpush3.bf16.msra.mxu0 %v2239_v16 }
 0x373   : > { %2146 = vmatmul.mubr.bf16.vlgmr.msra.gmra.mrb[32].mxu0 %v1557_v17 }
 0x41e   : > { %v1549_v6 = vpop.f32.mrb[28].mxu1 }
 0x41f   : > { %v2127_v7 = vpop.f32.mrb[29].mxu1 }
 0x420   : > { %v1552_v18 = vpop.f32.mrb[30].mxu1 }
 0x421   : > { %v2128_v19 = vpop.f32.mrb[31].mxu1 }
 0x426   : > { %v1461_v11 = vpop.f32.mrb[28].mxu0 }
 0x427   : > { %v1550_v14 = vadd.f32 %v1549_v6, %v1461_v11  ;;  %v2107_v21 = vpop.f32.mrb[29].mxu0 }
 0x428   : > { %v1464_v20 = vpop.f32.mrb[30].mxu0 }
 0x429   : > { %v2108_v22 = vpop.f32.mrb[31].mxu0 }
 0x43e   : > { %v1764_v23 = vpop.f32.mrb[32].mxu1 }
 0x43f   : > { %v2167_v24 = vpop.f32.mrb[33].mxu1 }
 0x440   : > { %v1767_v25 = vpop.f32.mrb[34].mxu1 }
 0x441   : > { %v2168_v26 = vpop.f32.mrb[35].mxu1 }
 0x446   : > { %v1656_v27 = vpop.f32.mrb[32].mxu0 }
 0x447   : > { %v1662_v28 = vadd.f32 %v1656_v27, %v1550_v14  ;;  %v2147_v29 = vpop.f32.mrb[33].mxu0 }
 0x448   : > { %v1659_v35 = vpop.f32.mrb[34].mxu0 }
 0x449   : > { %v1770_v31 = vadd.f32 %v1764_v23, %v1662_v28  ;;  %v2148_v32 = vpop.f32.mrb[35].mxu0 }
 0x44b   : > { %v1778_v45 = vadd.f32 %v1984_v30, %v1770_v31 }
 0x44d   : > { %v1780_v34 = vadd.f32 %v1779_v33, %v1778_v45 }
 0x44f   : > { %v1783_v36 = vsel %vm516_vm0, %v1780_v34, 0.0 }
 0x450   : > { %1784 = vadd.xlane.f32.xlu0 %v1783_v36 }
 0x4dd   : > { %v1785_v37 = vpop.xlane.xlu0 %1784 }
 0x4de   : > { %v1787_v38 = vmul.f32 0.03125, %v1785_v37 }
 0x4e0   : > { %v1788_v39 = vsub.f32 %v1780_v34, %v1787_v38 }
 0x4e2   : > { %v1789_v40 = vmul.f32 %v1788_v39, %v1788_v39 }
 0x4e4   : > { %v1790_v41 = vsel %vm516_vm0, %v1789_v40, 0.0 }
 0x4e5   : > { %1791 = vadd.xlane.f32.xlu1 %v1790_v41 }
 0x572   : > { %v1792_v49 = vpop.xlane.xlu1 %1791 }
 0x573   : > { %v1793_v42 = vmul.f32 0.03125, %v1792_v49 }
 0x575   : > { %v1794_v43 = vadd.f32 1e-05, %v1793_v42 }
 0x577   : > { %2264 = vrsqrt.f32 %v1794_v43 }
 0x581   : > { %v2265_v44 = vpop.eup %2264 }
 0x582   : > { %v1796_v46 = vmul.f32 %v2265_v44, %v1788_v39 }
 0x584   : > { %v1803_v48 = vmul.f32 %v1985_v13, %v1796_v46 }
 0x586   : > { %v1810_v50 = vadd.f32 %v1986_v47, %v1803_v48 }
 0x588   : > { %v1811_v51 = vpack.c.bf16 %v1810_v50, %v1810_v50 }
 0x58a   : > { %1813 = vst.msk [vmem:[%s443_s23] sm:$0xf] %vm1812_vm4, %v1811_v51 }
 0x58b PF: > { %s21_s19 = sadd.s32 1, %s2288_s19   ;;  %s2737_s17 = smov %s2284_s18 }
 0x58c   : > { %p18_p5 = scmp.ge.s32.totalorder %s21_s19, 4   ;;  %s2738_s18 = smov %s2740_s20 }
 0x58e   :  { %20 = sbr.rel (!%p18_p5) target bundleno = 2 (0x2), region = 100 }

</bundles_post_ra>
